<compile_context>
chip_gen: v7x
topology: tpu7x:2x2x1
jax: 0.10.0
libtpu: 0.0.40
codegen_flags: <defaults>
</compile_context>

<pallas_src>
import jax
import jax.numpy as jnp
from jax.experimental import pallas as pl
from jax.experimental.pallas import tpu as pltpu


def _mm_bias_relu_kernel(x_ref, w_ref, b_ref, o_ref):
    """o = relu(x @ w + b): single fused MXU matmul + VPU epilogue."""
    y = jnp.dot(x_ref[...], w_ref[...], preferred_element_type=jnp.float32)
    o_ref[...] = jnp.maximum(y + b_ref[...], 0.0)


def _mm_bias_relu(x, w, b):
    M, K = x.shape
    N = w.shape[1]
    vmem = pl.BlockSpec(memory_space=pltpu.MemorySpace.VMEM)
    cost = pl.CostEstimate(
        flops=2 * M * K * N + 2 * M * N,          # matmul + bias/relu epilogue
        transcendentals=0,
        bytes_accessed=4 * (M * K + K * N + N + M * N),
    )
    return pl.pallas_call(
        _mm_bias_relu_kernel,
        out_shape=jax.ShapeDtypeStruct((M, N), jnp.float32),
        in_specs=[vmem, vmem, vmem],
        out_specs=vmem,
        cost_estimate=cost,
    )(x, w, b)


# TODO(synk): im2col patch extraction is pure data movement (no FLOPs); it is
# left to XLA strided slices here, all arithmetic runs inside the Pallas kernels.
def _im2col(x_nhwc, k, s):
    """Extract k x k patches with stride s. Returns (B, OH, OW, k*k*C) with
    patch-channel index = (ky*k + kx)*C + c (matches the weight restacking)."""
    B, H, W, C = x_nhwc.shape
    oh = (H - k) // s + 1
    ow = (W - k) // s + 1
    cols = []
    for ky in range(k):
        for kx in range(k):
            cols.append(jax.lax.slice(
                x_nhwc,
                (0, ky, kx, 0),
                (B, ky + (oh - 1) * s + 1, kx + (ow - 1) * s + 1, C),
                (1, s, s, 1)))
    return jnp.concatenate(cols, axis=-1)


def prepare_params(p):
    """One-time host-side restack of PyTorch-layout weights into matmul layout."""
    d = p["w3"].shape[0]
    # Conv weights: (Cout, Cin, kH, kW) -> (kH, kW, Cin, Cout) -> (kH*kW*Cin, Cout)
    w1m = jnp.transpose(p["w1"], (2, 3, 1, 0)).reshape(8 * 8 * 3, 16)      # (192, 16)
    w2m = jnp.transpose(p["w2"], (2, 3, 1, 0)).reshape(4 * 4 * 16, 32)     # (256, 32)
    # PyTorch flatten order is (C, H, W); the kernel path flattens as (H, W, C),
    # so permute the Linear weight rows accordingly (numerically identical).
    w3m = jnp.transpose(p["w3"].reshape(d, 32, 9, 9), (2, 3, 1, 0)).reshape(9 * 9 * 32, d)
    return {"w1m": w1m, "b1m": p["b1"][None, :],
            "w2m": w2m, "b2m": p["b2"][None, :],
            "w3m": w3m, "b3m": p["b3"][None, :]}


def perception_forward(x, hidden, mask, prep):
    """Pallas forward of Perception. hidden/mask are unused (as in the module)."""
    del hidden, mask
    B = x.shape[0]
    x_nhwc = jnp.transpose(x, (0, 2, 3, 1))                    # (B, 84, 84, 3)

    # Conv1 (k8, s4) as one matmul: (B*400, 192) @ (192, 16) + b, ReLU
    p1 = _im2col(x_nhwc, 8, 4).reshape(B * 20 * 20, 192)
    a1 = _mm_bias_relu(p1, prep["w1m"], prep["b1m"])           # (B*400, 16)

    # Conv2 (k4, s2) as one matmul: (B*81, 256) @ (256, 32) + b, ReLU
    p2 = _im2col(a1.reshape(B, 20, 20, 16), 4, 2).reshape(B * 9 * 9, 256)
    a2 = _mm_bias_relu(p2, prep["w2m"], prep["b2m"])           # (B*81, 32)

    # Flatten (HWC order, weight rows permuted to match) + Linear + ReLU
    flat = a2.reshape(B, 9 * 9 * 32)                           # (B, 2592)
    return _mm_bias_relu(flat, prep["w3m"], prep["b3m"])       # (B, d)


def init_params(key, d=32):
    """Deterministic synthetic parameters in PyTorch layouts."""
    ks = jax.random.split(key, 6)

    def u(k, shape, fan_in):
        s = 1.0 / jnp.sqrt(jnp.float32(fan_in))
        return jax.random.uniform(k, shape, jnp.float32, -s, s)

    return {
        "w1": u(ks[0], (16, 3, 8, 8), 3 * 8 * 8),
        "b1": u(ks[1], (16,), 3 * 8 * 8),
        "w2": u(ks[2], (32, 16, 4, 4), 16 * 4 * 4),
        "b2": u(ks[3], (32,), 16 * 4 * 4),
        "w3": u(ks[4], (d, 32 * 9 * 9), 32 * 9 * 9),
        "b3": u(ks[5], (d,), 32 * 9 * 9),
    }


def _reference(x, p):
    """Pure-JAX/XLA mirror of the PyTorch module (NCHW convs, CHW flatten)."""
    y = jax.lax.conv_general_dilated(x, p["w1"], (4, 4), "VALID",
                                     dimension_numbers=("NCHW", "OIHW", "NCHW"))
    y = jax.nn.relu(y + p["b1"][None, :, None, None])
    y = jax.lax.conv_general_dilated(y, p["w2"], (2, 2), "VALID",
                                     dimension_numbers=("NCHW", "OIHW", "NCHW"))
    y = jax.nn.relu(y + p["b2"][None, :, None, None])
    y = y.reshape(y.shape[0], -1)                               # (B, 32*9*9), CHW order
    return jax.nn.relu(y @ p["w3"].T + p["b3"][None, :])


if __name__ == "__main__":
    B, d = 2, 32
    key = jax.random.PRNGKey(0)
    kx, kp = jax.random.split(key)

    x = jax.random.normal(kx, (B, 3, 84, 84), jnp.float32)      # 84x84 frame (implied by 32*9*9)
    hidden = (jnp.zeros((B, d), jnp.float32), jnp.zeros((B, d), jnp.float32))
    mask = jnp.ones((B, 1), jnp.float32)

    params = init_params(kp, d)
    prep = prepare_params(params)

    fwd = jax.jit(perception_forward)
    out = fwd(x, hidden, mask, prep)
    jax.block_until_ready(out)

    ref = _reference(x, params)
    assert out.shape == (B, d), f"bad output shape {out.shape}"
    err = float(jnp.max(jnp.abs(out - ref)))
    assert err < 1e-2, f"output mismatch, max abs err = {err}"

    print("KERNEL_OK")
</pallas_src>

<mosaic_0001>
module attributes {stable_mosaic.version = 11 : i64} {
  func.func @_mm_bias_relu_kernel(%arg0: memref<800x192xf32, #tpu.memory_space<vmem>>, %arg1: memref<192x16xf32, #tpu.memory_space<vmem>>, %arg2: memref<1x16xf32, #tpu.memory_space<vmem>>, %arg3: memref<800x16xf32, #tpu.memory_space<vmem>>) attributes {dimension_semantics = [], scalar_prefetch = 0 : i64, scratch_operands = 0 : i64, tpu.core_type = #tpu.core_type<tc>} {
    %c0 = arith.constant 0 : index
    %c0_0 = arith.constant 0 : index
    %0 = vector.load %arg0[%c0, %c0_0] : memref<800x192xf32, #tpu.memory_space<vmem>>, vector<800x192xf32>
    %c0_1 = arith.constant 0 : index
    %c0_2 = arith.constant 0 : index
    %1 = vector.load %arg1[%c0_1, %c0_2] : memref<192x16xf32, #tpu.memory_space<vmem>>, vector<192x16xf32>
    %cst = arith.constant dense<0.000000e+00> : vector<800x16xf32>
    %2 = tpu.matmul %0, %1, %cst {dimension_numbers = #tpu.dot_dimension_numbers<[1], [0], [0], [1], [0, 0, 1, 1], [], []>} : vector<800x192xf32>, vector<192x16xf32>, vector<800x16xf32> -> vector<800x16xf32>
    %c0_3 = arith.constant 0 : index
    %c0_4 = arith.constant 0 : index
    %3 = vector.load %arg2[%c0_3, %c0_4] : memref<1x16xf32, #tpu.memory_space<vmem>>, vector<1x16xf32>
    %4 = vector.broadcast %3 : vector<1x16xf32> to vector<800x16xf32>
    %5 = arith.addf %2, %4 : vector<800x16xf32>
    %cst_5 = arith.constant 0.000000e+00 : f32
    %6 = vector.broadcast %cst_5 : f32 to vector<800x16xf32>
    %7 = arith.maximumf %5, %6 : vector<800x16xf32>
    %c0_6 = arith.constant 0 : index
    %c0_7 = arith.constant 0 : index
    %8 = vector.load %arg3[%c0_6, %c0_7] : memref<800x16xf32, #tpu.memory_space<vmem>>, vector<800x16xf32>
    tpu.vector_store %arg3[%c0_6, %c0_7], %7 {strides = array<i32>} : memref<800x16xf32, #tpu.memory_space<vmem>>, vector<800x16xf32>,
    return
  }
}

module attributes {stable_mosaic.version = 11 : i64} {
  func.func @_mm_bias_relu_kernel(%arg0: memref<162x256xf32, #tpu.memory_space<vmem>>, %arg1: memref<256x32xf32, #tpu.memory_space<vmem>>, %arg2: memref<1x32xf32, #tpu.memory_space<vmem>>, %arg3: memref<162x32xf32, #tpu.memory_space<vmem>>) attributes {dimension_semantics = [], scalar_prefetch = 0 : i64, scratch_operands = 0 : i64, tpu.core_type = #tpu.core_type<tc>} {
    %c0 = arith.constant 0 : index
    %c0_0 = arith.constant 0 : index
    %0 = vector.load %arg0[%c0, %c0_0] : memref<162x256xf32, #tpu.memory_space<vmem>>, vector<162x256xf32>
    %c0_1 = arith.constant 0 : index
    %c0_2 = arith.constant 0 : index
    %1 = vector.load %arg1[%c0_1, %c0_2] : memref<256x32xf32, #tpu.memory_space<vmem>>, vector<256x32xf32>
    %cst = arith.constant dense<0.000000e+00> : vector<162x32xf32>
    %2 = tpu.matmul %0, %1, %cst {dimension_numbers = #tpu.dot_dimension_numbers<[1], [0], [0], [1], [0, 0, 1, 1], [], []>} : vector<162x256xf32>, vector<256x32xf32>, vector<162x32xf32> -> vector<162x32xf32>
    %c0_3 = arith.constant 0 : index
    %c0_4 = arith.constant 0 : index
    %3 = vector.load %arg2[%c0_3, %c0_4] : memref<1x32xf32, #tpu.memory_space<vmem>>, vector<1x32xf32>
    %4 = vector.broadcast %3 : vector<1x32xf32> to vector<162x32xf32>
    %5 = arith.addf %2, %4 : vector<162x32xf32>
    %cst_5 = arith.constant 0.000000e+00 : f32
    %6 = vector.broadcast %cst_5 : f32 to vector<162x32xf32>
    %7 = arith.maximumf %5, %6 : vector<162x32xf32>
    %c0_6 = arith.constant 0 : index
    %c0_7 = arith.constant 0 : index
    %8 = vector.load %arg3[%c0_6, %c0_7] : memref<162x32xf32, #tpu.memory_space<vmem>>, vector<162x32xf32>
    tpu.vector_store %arg3[%c0_6, %c0_7], %7 {strides = array<i32>} : memref<162x32xf32, #tpu.memory_space<vmem>>, vector<162x32xf32>,
    return
  }
}

module attributes {stable_mosaic.version = 11 : i64} {
  func.func @_mm_bias_relu_kernel(%arg0: memref<2x2592xf32, #tpu.memory_space<vmem>>, %arg1: memref<2592x32xf32, #tpu.memory_space<vmem>>, %arg2: memref<1x32xf32, #tpu.memory_space<vmem>>, %arg3: memref<2x32xf32, #tpu.memory_space<vmem>>) attributes {dimension_semantics = [], scalar_prefetch = 0 : i64, scratch_operands = 0 : i64, tpu.core_type = #tpu.core_type<tc>} {
    %c0 = arith.constant 0 : index
    %c0_0 = arith.constant 0 : index
    %0 = vector.load %arg0[%c0, %c0_0] : memref<2x2592xf32, #tpu.memory_space<vmem>>, vector<2x2592xf32>
    %c0_1 = arith.constant 0 : index
    %c0_2 = arith.constant 0 : index
    %1 = vector.load %arg1[%c0_1, %c0_2] : memref<2592x32xf32, #tpu.memory_space<vmem>>, vector<2592x32xf32>
    %cst = arith.constant dense<0.000000e+00> : vector<2x32xf32>
    %2 = tpu.matmul %0, %1, %cst {dimension_numbers = #tpu.dot_dimension_numbers<[1], [0], [0], [1], [0, 0, 1, 1], [], []>} : vector<2x2592xf32>, vector<2592x32xf32>, vector<2x32xf32> -> vector<2x32xf32>
    %c0_3 = arith.constant 0 : index
    %c0_4 = arith.constant 0 : index
    %3 = vector.load %arg2[%c0_3, %c0_4] : memref<1x32xf32, #tpu.memory_space<vmem>>, vector<1x32xf32>
    %4 = vector.broadcast %3 : vector<1x32xf32> to vector<2x32xf32>
    %5 = arith.addf %2, %4 : vector<2x32xf32>
    %cst_5 = arith.constant 0.000000e+00 : f32
    %6 = vector.broadcast %cst_5 : f32 to vector<2x32xf32>
    %7 = arith.maximumf %5, %6 : vector<2x32xf32>
    %c0_6 = arith.constant 0 : index
    %c0_7 = arith.constant 0 : index
    %8 = vector.load %arg3[%c0_6, %c0_7] : memref<2x32xf32, #tpu.memory_space<vmem>>, vector<2x32xf32>
    tpu.vector_store %arg3[%c0_6, %c0_7], %7 {strides = array<i32>} : memref<2x32xf32, #tpu.memory_space<vmem>>, vector<2x32xf32>,
    return
  }
}

</mosaic_0001>

<bundles_post_ra>
// kernel: perception_forward.3
= control target key start
LH: loop header
LB: loop body
LE: loop exit
PB: predicated region body
PF: predicated region fallthrough
CT: control target
= control target key end

     0   :  { %v1478_v0 = vmov 0.0|0.0   ;;  %vm245_vm0 = vcmask 523264   ;;  %vm1211_vm1 = vcmask 130048   ;;  %s2800_s1 = inlined_call_operand.vmem [shape: f32[192,16], index: 1, kind: input, shape index: {}]   ;;  %s2801_s0 = inlined_call_operand.vmem [shape: f32[800,192], index: 0, kind: input, shape index: {}]   ;;  %s2802_s2 = inlined_call_operand.vmem [shape: f32[1,16], index: 2, kind: input, shape index: {}]   ;;  %s2803_s3 = inlined_call_operand.vmem [shape: f32[800,16], index: 3, kind: output, shape index: {}]  }
   0x1   :  { %1417 = vmatprep.subr.bf16.mxu0 %v1478_v0  ;;  %1453 = vmatprep.subr.bf16.mxu1 %v1478_v0  ;;  %v214_v1 = vld [vmem:[%s2800_s1] sm:$0xff]  ;;  %v215_v2 = vld [vmem:[%s2800_s1 + $0x8] sm:$0xff]  ;;  %v216_v3 = vld [vmem:[%s2800_s1 + $0x10] sm:$0xff] }
   0x2   :  { %v1418_v4 = vpack.c.bf16 %v215_v2, %v214_v1  ;;  %v217_v5 = vld [vmem:[%s2800_s1 + $0x18] sm:$0xff]  ;;  %v218_v7 = vld [vmem:[%s2800_s1 + $0x20] sm:$0xff]  ;;  %v219_v8 = vld [vmem:[%s2800_s1 + $0x28] sm:$0xff] }
   0x3   :  { %v1421_v6 = vpack.c.bf16 %v217_v5, %v216_v3  ;;  %v1424_v9 = vpack.c.bf16 %v219_v8, %v218_v7  ;;  %v220_v10 = vld [vmem:[%s2800_s1 + $0x30] sm:$0xff]  ;;  %v221_v11 = vld [vmem:[%s2800_s1 + $0x38] sm:$0xff]  ;;  %v15_v12 = vld [vmem:[%s2801_s0 + $0x8] sm:$0xff] }
   0x4   :  { %1419 = vmatpush1.bf16.msra.mxu0 %v1418_v4  ;;  %1465 = vmatpush1.bf16.msra.mxu1 %v1418_v4  ;;  %v115_v13 = vld [vmem:[%s2801_s0 + $0x328] sm:$0xff]  ;;  %v1427_v14 = vpack.c.bf16 %v221_v11, %v220_v10  ;;  %v222_v15 = vld [vmem:[%s2800_s1 + $0x40] sm:$0xff]  ;;  %v224_v18 = vld [vmem:[%s2800_s1 + $0x50] sm:$0xff] }
   0x5   :  { %1420 = vmatprep.subr.bf16.mxu0 %v1478_v0  ;;  %1454 = vmatprep.subr.bf16.mxu1 %v1478_v0  ;;  %v223_v16 = vld [vmem:[%s2800_s1 + $0x48] sm:$0xff]  ;;  %v225_v19 = vld [vmem:[%s2800_s1 + $0x58] sm:$0xff]  ;;  %v226_v21 = vld [vmem:[%s2800_s1 + $0x60] sm:$0xff] }
   0x6   :  { %1317 = vmatprep.mubr.msk.f32.mxu0 %vm245_vm0, %v15_v12  ;;  %1367 = vmatprep.mubr.msk.f32.mxu1 %vm245_vm0, %v115_v13  ;;  %v1430_v17 = vpack.c.bf16 %v223_v16, %v222_v15  ;;  %v1433_v20 = vpack.c.bf16 %v225_v19, %v224_v18  ;;  %v227_v22 = vld [vmem:[%s2800_s1 + $0x68] sm:$0xff]  ;;  %v228_v24 = vld [vmem:[%s2800_s1 + $0x70] sm:$0xff]  ;;  %v229_v25 = vld [vmem:[%s2800_s1 + $0x78] sm:$0xff] }
   0x7   :  { %v1436_v23 = vpack.c.bf16 %v227_v22, %v226_v21  ;;  %v1439_v26 = vpack.c.bf16 %v229_v25, %v228_v24  ;;  %v230_v27 = vld [vmem:[%s2800_s1 + $0x80] sm:$0xff]  ;;  %v231_v28 = vld [vmem:[%s2800_s1 + $0x88] sm:$0xff]  ;;  %v232_v30 = vld [vmem:[%s2800_s1 + $0x90] sm:$0xff] }
   0x8   :  { %1422 = vmatpush1.bf16.msra.mxu0 %v1421_v6  ;;  %1466 = vmatpush1.bf16.msra.mxu1 %v1421_v6  ;;  %v1442_v29 = vpack.c.bf16 %v231_v28, %v230_v27  ;;  %v233_v31 = vld [vmem:[%s2800_s1 + $0x98] sm:$0xff]  ;;  %v234_v33 = vld [vmem:[%s2800_s1 + $0xa0] sm:$0xff]  ;;  %v235_v34 = vld [vmem:[%s2800_s1 + $0xa8] sm:$0xff] }
   0x9   :  { %1423 = vmatprep.subr.bf16.mxu0 %v1478_v0  ;;  %1455 = vmatprep.subr.bf16.mxu1 %v1478_v0  ;;  %v1445_v32 = vpack.c.bf16 %v233_v31, %v232_v30  ;;  %v1448_v35 = vpack.c.bf16 %v235_v34, %v234_v33  ;;  %v236_v36 = vld [vmem:[%s2800_s1 + $0xb0] sm:$0xff]  ;;  %v237_v37 = vld [vmem:[%s2800_s1 + $0xb8] sm:$0xff]  ;;  %v14_v39 = vld [vmem:[%s2801_s0] sm:$0xff] }
   0xa   :  { %v1451_v38 = vpack.c.bf16 %v237_v37, %v236_v36  ;;  %v114_v40 = vld [vmem:[%s2801_s0 + $0x320] sm:$0xff]  ;;  %v17_v41 = vld [vmem:[%s2801_s0 + $0x18] sm:$0xff]  ;;  %v16_v43 = vld [vmem:[%s2801_s0 + $0x10] sm:$0xff] }
   0xb   :  { %v117_v42 = vld [vmem:[%s2801_s0 + $0x338] sm:$0xff]  ;;  %v116_v44 = vld [vmem:[%s2801_s0 + $0x330] sm:$0xff]  ;;  %v19_v45 = vld [vmem:[%s2801_s0 + $0x28] sm:$0xff] }
   0xc   :  { %1425 = vmatpush1.bf16.msra.mxu0 %v1424_v9  ;;  %1467 = vmatpush1.bf16.msra.mxu1 %v1424_v9  ;;  %v119_v46 = vld [vmem:[%s2801_s0 + $0x348] sm:$0xff]  ;;  %v18_v47 = vld [vmem:[%s2801_s0 + $0x20] sm:$0xff]  ;;  %v21_v49 = vld [vmem:[%s2801_s0 + $0x38] sm:$0xff] }
   0xd   :  { %1426 = vmatprep.subr.bf16.mxu0 %v1478_v0  ;;  %1456 = vmatprep.subr.bf16.mxu1 %v1478_v0  ;;  %v118_v48 = vld [vmem:[%s2801_s0 + $0x340] sm:$0xff]  ;;  %v121_v50 = vld [vmem:[%s2801_s0 + $0x358] sm:$0xff]  ;;  %v20_v51 = vld [vmem:[%s2801_s0 + $0x30] sm:$0xff] }
   0xe   :  { %v120_v52 = vld [vmem:[%s2801_s0 + $0x350] sm:$0xff]  ;;  %v23_v53 = vld [vmem:[%s2801_s0 + $0x48] sm:$0xff]  ;;  %v22_v55 = vld [vmem:[%s2801_s0 + $0x40] sm:$0xff] }
   0xf   :  { %v123_v54 = vld [vmem:[%s2801_s0 + $0x368] sm:$0xff]  ;;  %v122_v56 = vld [vmem:[%s2801_s0 + $0x360] sm:$0xff]  ;;  %v25_v57 = vld [vmem:[%s2801_s0 + $0x58] sm:$0xff] }
  0x10   :  { %1428 = vmatpush1.bf16.msra.mxu0 %v1427_v14  ;;  %1468 = vmatpush1.bf16.msra.mxu1 %v1427_v14  ;;  %v125_v58 = vld [vmem:[%s2801_s0 + $0x378] sm:$0xff]  ;;  %v24_v59 = vld [vmem:[%s2801_s0 + $0x50] sm:$0xff]  ;;  %v27_v61 = vld [vmem:[%s2801_s0 + $0x68] sm:$0xff] }
  0x11   :  { %1429 = vmatprep.subr.bf16.mxu0 %v1478_v0  ;;  %1457 = vmatprep.subr.bf16.mxu1 %v1478_v0  ;;  %v124_v60 = vld [vmem:[%s2801_s0 + $0x370] sm:$0xff]  ;;  %v127_v62 = vld [vmem:[%s2801_s0 + $0x388] sm:$0xff]  ;;  %v26_v63 = vld [vmem:[%s2801_s0 + $0x60] sm:$0xff] }
  0x12   :  { %v29_v1 = vld [vmem:[%s2801_s0 + $0x78] sm:$0xff]  ;;  %v28_v3 = vld [vmem:[%s2801_s0 + $0x70] sm:$0xff]  ;;  %v31_v5 = vld [vmem:[%s2801_s0 + $0x88] sm:$0xff] }
  0x13   :  { %v129_v2 = vld [vmem:[%s2801_s0 + $0x398] sm:$0xff]  ;;  %v128_v4 = vld [vmem:[%s2801_s0 + $0x390] sm:$0xff]  ;;  %v131_v6 = vld [vmem:[%s2801_s0 + $0x3a8] sm:$0xff] }
  0x14   :  { %1431 = vmatpush1.bf16.msra.mxu0 %v1430_v17  ;;  %1469 = vmatpush1.bf16.msra.mxu1 %v1430_v17  ;;  %v30_v7 = vld [vmem:[%s2801_s0 + $0x80] sm:$0xff]  ;;  %v33_v9 = vld [vmem:[%s2801_s0 + $0x98] sm:$0xff]  ;;  %v32_v11 = vld [vmem:[%s2801_s0 + $0x90] sm:$0xff] }
  0x15   :  { %1432 = vmatprep.subr.bf16.mxu0 %v1478_v0  ;;  %1458 = vmatprep.subr.bf16.mxu1 %v1478_v0  ;;  %v130_v8 = vld [vmem:[%s2801_s0 + $0x3a0] sm:$0xff]  ;;  %v133_v10 = vld [vmem:[%s2801_s0 + $0x3b8] sm:$0xff]  ;;  %v132_v12 = vld [vmem:[%s2801_s0 + $0x3b0] sm:$0xff] }
  0x16   :  { %v35_v13 = vld [vmem:[%s2801_s0 + $0xa8] sm:$0xff]  ;;  %v34_v15 = vld [vmem:[%s2801_s0 + $0xa0] sm:$0xff]  ;;  %v37_v17 = vld [vmem:[%s2801_s0 + $0xb8] sm:$0xff] }
  0x17   :  { %v135_v14 = vld [vmem:[%s2801_s0 + $0x3c8] sm:$0xff]  ;;  %v134_v16 = vld [vmem:[%s2801_s0 + $0x3c0] sm:$0xff]  ;;  %v137_v18 = vld [vmem:[%s2801_s0 + $0x3d8] sm:$0xff] }
  0x18   :  { %1434 = vmatpush1.bf16.msra.mxu0 %v1433_v20  ;;  %1470 = vmatpush1.bf16.msra.mxu1 %v1433_v20  ;;  %v36_v19 = vld [vmem:[%s2801_s0 + $0xb0] sm:$0xff]  ;;  %v39_v21 = vld [vmem:[%s2801_s0 + $0xc8] sm:$0xff]  ;;  %v138_v24 = vld [vmem:[%s2801_s0 + $0x3e0] sm:$0xff] }
  0x19   :  { %1435 = vmatprep.subr.bf16.mxu0 %v1478_v0  ;;  %1459 = vmatprep.subr.bf16.mxu1 %v1478_v0  ;;  %v136_v20 = vld [vmem:[%s2801_s0 + $0x3d0] sm:$0xff]  ;;  %v139_v22 = vld [vmem:[%s2801_s0 + $0x3e8] sm:$0xff]  ;;  %v41_v25 = vld [vmem:[%s2801_s0 + $0xd8] sm:$0xff] }
  0x1a   :  { %v40_v27 = vld [vmem:[%s2801_s0 + $0xd0] sm:$0xff]  ;;  %v143_v30 = vld [vmem:[%s2801_s0 + $0x408] sm:$0xff]  ;;  %v42_v31 = vld [vmem:[%s2801_s0 + $0xe0] sm:$0xff] }
  0x1b   :  { %v140_v28 = vld [vmem:[%s2801_s0 + $0x3f0] sm:$0xff]  ;;  %v45_v33 = vld [vmem:[%s2801_s0 + $0xf8] sm:$0xff]  ;;  %v47_v37 = vld [vmem:[%s2801_s0 + $0x108] sm:$0xff] }
  0x1c   :  { %1437 = vmatpush1.bf16.msra.mxu0 %v1436_v23  ;;  %1471 = vmatpush1.bf16.msra.mxu1 %v1436_v23  ;;  %v38_v23 = vld [vmem:[%s2801_s0 + $0xc0] sm:$0xff]  ;;  %v145_v34 = vld [vmem:[%s2801_s0 + $0x418] sm:$0xff]  ;;  %v144_v36 = vld [vmem:[%s2801_s0 + $0x410] sm:$0xff] }
  0x1d   :  { %1438 = vmatprep.subr.bf16.mxu0 %v1478_v0  ;;  %1460 = vmatprep.subr.bf16.mxu1 %v1478_v0 }
  0x20   :  { %1440 = vmatpush1.bf16.msra.mxu0 %v1439_v26  ;;  %1472 = vmatpush1.bf16.msra.mxu1 %v1439_v26  ;;  %v141_v26 = vld [vmem:[%s2801_s0 + $0x3f8] sm:$0xff] }
  0x21   :  { %1441 = vmatprep.subr.bf16.mxu0 %v1478_v0  ;;  %1461 = vmatprep.subr.bf16.mxu1 %v1478_v0 }
  0x24   :  { %1443 = vmatpush1.bf16.msra.mxu0 %v1442_v29  ;;  %1473 = vmatpush1.bf16.msra.mxu1 %v1442_v29  ;;  %v43_v29 = vld [vmem:[%s2801_s0 + $0xe8] sm:$0xff] }
  0x25   :  { %1444 = vmatprep.subr.bf16.mxu0 %v1478_v0  ;;  %1462 = vmatprep.subr.bf16.mxu1 %v1478_v0 }
  0x28   :  { %1446 = vmatpush1.bf16.msra.mxu0 %v1445_v32  ;;  %1474 = vmatpush1.bf16.msra.mxu1 %v1445_v32  ;;  %v142_v32 = vld [vmem:[%s2801_s0 + $0x400] sm:$0xff] }
  0x29   :  { %1447 = vmatprep.subr.bf16.mxu0 %v1478_v0  ;;  %1463 = vmatprep.subr.bf16.mxu1 %v1478_v0 }
  0x2c   :  { %1449 = vmatpush1.bf16.msra.mxu0 %v1448_v35  ;;  %1475 = vmatpush1.bf16.msra.mxu1 %v1448_v35  ;;  %v44_v35 = vld [vmem:[%s2801_s0 + $0xf0] sm:$0xff] }
  0x2d   :  { %1450 = vmatprep.subr.bf16.mxu0 %v1478_v0  ;;  %1464 = vmatprep.subr.bf16.mxu1 %v1478_v0  ;;  %v126_v0 = vld [vmem:[%s2801_s0 + $0x380] sm:$0xff] }
  0x30   :  { %1452 = vmatpush1.bf16.msra.mxu0 %v1451_v38  ;;  %1476 = vmatpush1.bf16.msra.mxu1 %v1451_v38  ;;  %v147_v38 = vld [vmem:[%s2801_s0 + $0x428] sm:$0xff] }
  0x33   :  { %611 = vmatmul.mubr.f32.vlgmr.msra.gmra.mrb[0].mxu0 %v14_v39  ;;  %861 = vmatmul.mubr.f32.vlgmr.msra.gmra.mrb[0].mxu1 %v114_v40  ;;  %v46_v39 = vld [vmem:[%s2801_s0 + $0x100] sm:$0xff] }
  0x34   :  { %1318 = vmatprep.mubr.msk.f32.mxu0 %vm245_vm0, %v17_v41  ;;  %1368 = vmatprep.mubr.msk.f32.mxu1 %vm245_vm0, %v117_v42  ;;  %v146_v40 = vld [vmem:[%s2801_s0 + $0x420] sm:$0xff]  ;;  %v49_v41 = vld [vmem:[%s2801_s0 + $0x118] sm:$0xff] }
  0x35   :  { %v149_v42 = vld [vmem:[%s2801_s0 + $0x438] sm:$0xff] }
  0x37   :  { %616 = vmatmul.mubr.f32.gmra.mrb[2].mxu0 %v16_v43  ;;  %866 = vmatmul.mubr.f32.gmra.mrb[2].mxu1 %v116_v44  ;;  %v48_v43 = vld [vmem:[%s2801_s0 + $0x110] sm:$0xff] }
  0x38   :  { %1319 = vmatprep.mubr.msk.f32.mxu0 %vm245_vm0, %v19_v45  ;;  %1369 = vmatprep.mubr.msk.f32.mxu1 %vm245_vm0, %v119_v46  ;;  %v148_v44 = vld [vmem:[%s2801_s0 + $0x430] sm:$0xff]  ;;  %v51_v45 = vld [vmem:[%s2801_s0 + $0x128] sm:$0xff] }
  0x39   :  { %v151_v46 = vld [vmem:[%s2801_s0 + $0x448] sm:$0xff] }
  0x3b   :  { %621 = vmatmul.mubr.f32.gmra.mrb[4].mxu0 %v18_v47  ;;  %871 = vmatmul.mubr.f32.gmra.mrb[4].mxu1 %v118_v48  ;;  %v50_v47 = vld [vmem:[%s2801_s0 + $0x120] sm:$0xff] }
  0x3c   :  { %1320 = vmatprep.mubr.msk.f32.mxu0 %vm245_vm0, %v21_v49  ;;  %1370 = vmatprep.mubr.msk.f32.mxu1 %vm245_vm0, %v121_v50  ;;  %v150_v48 = vld [vmem:[%s2801_s0 + $0x440] sm:$0xff]  ;;  %v53_v49 = vld [vmem:[%s2801_s0 + $0x138] sm:$0xff] }
  0x3d   :  { %v153_v50 = vld [vmem:[%s2801_s0 + $0x458] sm:$0xff] }
  0x3f   :  { %626 = vmatmul.mubr.f32.gmra.mrb[6].mxu0 %v20_v51  ;;  %876 = vmatmul.mubr.f32.gmra.mrb[6].mxu1 %v120_v52  ;;  %v52_v51 = vld [vmem:[%s2801_s0 + $0x130] sm:$0xff] }
  0x40   :  { %1321 = vmatprep.mubr.msk.f32.mxu0 %vm245_vm0, %v23_v53  ;;  %1371 = vmatprep.mubr.msk.f32.mxu1 %vm245_vm0, %v123_v54  ;;  %v152_v52 = vld [vmem:[%s2801_s0 + $0x450] sm:$0xff]  ;;  %v55_v53 = vld [vmem:[%s2801_s0 + $0x148] sm:$0xff] }
  0x41   :  { %v155_v54 = vld [vmem:[%s2801_s0 + $0x468] sm:$0xff] }
  0x43   :  { %631 = vmatmul.mubr.f32.gmra.mrb[8].mxu0 %v22_v55  ;;  %881 = vmatmul.mubr.f32.gmra.mrb[8].mxu1 %v122_v56  ;;  %v54_v55 = vld [vmem:[%s2801_s0 + $0x140] sm:$0xff] }
  0x44   :  { %1322 = vmatprep.mubr.msk.f32.mxu0 %vm245_vm0, %v25_v57  ;;  %1372 = vmatprep.mubr.msk.f32.mxu1 %vm245_vm0, %v125_v58  ;;  %v154_v56 = vld [vmem:[%s2801_s0 + $0x460] sm:$0xff]  ;;  %v57_v57 = vld [vmem:[%s2801_s0 + $0x158] sm:$0xff] }
  0x45   :  { %v157_v58 = vld [vmem:[%s2801_s0 + $0x478] sm:$0xff] }
  0x47   :  { %636 = vmatmul.mubr.f32.gmra.mrb[10].mxu0 %v24_v59  ;;  %886 = vmatmul.mubr.f32.gmra.mrb[10].mxu1 %v124_v60  ;;  %v56_v59 = vld [vmem:[%s2801_s0 + $0x150] sm:$0xff] }
  0x48   :  { %1323 = vmatprep.mubr.msk.f32.mxu0 %vm245_vm0, %v27_v61  ;;  %1373 = vmatprep.mubr.msk.f32.mxu1 %vm245_vm0, %v127_v62  ;;  %v156_v60 = vld [vmem:[%s2801_s0 + $0x470] sm:$0xff]  ;;  %v59_v61 = vld [vmem:[%s2801_s0 + $0x168] sm:$0xff] }
  0x49   :  { %v159_v62 = vld [vmem:[%s2801_s0 + $0x488] sm:$0xff] }
  0x4b   :  { %641 = vmatmul.mubr.f32.gmra.mrb[12].mxu0 %v26_v63  ;;  %891 = vmatmul.mubr.f32.gmra.mrb[12].mxu1 %v126_v0  ;;  %v58_v63 = vld [vmem:[%s2801_s0 + $0x160] sm:$0xff] }
  0x4c   :  { %1324 = vmatprep.mubr.msk.f32.mxu0 %vm245_vm0, %v29_v1  ;;  %1374 = vmatprep.mubr.msk.f32.mxu1 %vm245_vm0, %v129_v2  ;;  %v158_v0 = vld [vmem:[%s2801_s0 + $0x480] sm:$0xff]  ;;  %v61_v1 = vld [vmem:[%s2801_s0 + $0x178] sm:$0xff] }
  0x4d   :  { %v161_v2 = vld [vmem:[%s2801_s0 + $0x498] sm:$0xff] }
  0x4f   :  { %646 = vmatmul.mubr.f32.gmra.mrb[14].mxu0 %v28_v3  ;;  %896 = vmatmul.mubr.f32.gmra.mrb[14].mxu1 %v128_v4  ;;  %v60_v3 = vld [vmem:[%s2801_s0 + $0x170] sm:$0xff] }
  0x50   :  { %1325 = vmatprep.mubr.msk.f32.mxu0 %vm245_vm0, %v31_v5  ;;  %1375 = vmatprep.mubr.msk.f32.mxu1 %vm245_vm0, %v131_v6  ;;  %v160_v4 = vld [vmem:[%s2801_s0 + $0x490] sm:$0xff]  ;;  %v63_v5 = vld [vmem:[%s2801_s0 + $0x188] sm:$0xff] }
  0x51   :  { %v163_v6 = vld [vmem:[%s2801_s0 + $0x4a8] sm:$0xff] }
  0x53   :  { %651 = vmatmul.mubr.f32.gmra.mrb[16].mxu0 %v30_v7  ;;  %901 = vmatmul.mubr.f32.gmra.mrb[16].mxu1 %v130_v8  ;;  %v62_v7 = vld [vmem:[%s2801_s0 + $0x180] sm:$0xff] }
  0x54   :  { %1326 = vmatprep.mubr.msk.f32.mxu0 %vm245_vm0, %v33_v9  ;;  %1376 = vmatprep.mubr.msk.f32.mxu1 %vm245_vm0, %v133_v10  ;;  %v162_v8 = vld [vmem:[%s2801_s0 + $0x4a0] sm:$0xff]  ;;  %v65_v9 = vld [vmem:[%s2801_s0 + $0x198] sm:$0xff] }
  0x55   :  { %v165_v10 = vld [vmem:[%s2801_s0 + $0x4b8] sm:$0xff] }
  0x57   :  { %656 = vmatmul.mubr.f32.gmra.mrb[18].mxu0 %v32_v11  ;;  %906 = vmatmul.mubr.f32.gmra.mrb[18].mxu1 %v132_v12  ;;  %v64_v11 = vld [vmem:[%s2801_s0 + $0x190] sm:$0xff] }
  0x58   :  { %1327 = vmatprep.mubr.msk.f32.mxu0 %vm245_vm0, %v35_v13  ;;  %1377 = vmatprep.mubr.msk.f32.mxu1 %vm245_vm0, %v135_v14  ;;  %v164_v12 = vld [vmem:[%s2801_s0 + $0x4b0] sm:$0xff]  ;;  %v67_v13 = vld [vmem:[%s2801_s0 + $0x1a8] sm:$0xff] }
  0x59   :  { %v167_v14 = vld [vmem:[%s2801_s0 + $0x4c8] sm:$0xff] }
  0x5b   :  { %661 = vmatmul.mubr.f32.gmra.mrb[20].mxu0 %v34_v15  ;;  %911 = vmatmul.mubr.f32.gmra.mrb[20].mxu1 %v134_v16  ;;  %v66_v15 = vld [vmem:[%s2801_s0 + $0x1a0] sm:$0xff] }
  0x5c   :  { %1328 = vmatprep.mubr.msk.f32.mxu0 %vm245_vm0, %v37_v17  ;;  %1378 = vmatprep.mubr.msk.f32.mxu1 %vm245_vm0, %v137_v18  ;;  %v166_v16 = vld [vmem:[%s2801_s0 + $0x4c0] sm:$0xff]  ;;  %v69_v17 = vld [vmem:[%s2801_s0 + $0x1b8] sm:$0xff] }
  0x5d   :  { %v169_v18 = vld [vmem:[%s2801_s0 + $0x4d8] sm:$0xff] }
  0x5f   :  { %666 = vmatmul.mubr.f32.gmra.mrb[22].mxu0 %v36_v19  ;;  %916 = vmatmul.mubr.f32.gmra.mrb[22].mxu1 %v136_v20  ;;  %v68_v19 = vld [vmem:[%s2801_s0 + $0x1b0] sm:$0xff] }
  0x60   :  { %1329 = vmatprep.mubr.msk.f32.mxu0 %vm245_vm0, %v39_v21  ;;  %1379 = vmatprep.mubr.msk.f32.mxu1 %vm245_vm0, %v139_v22  ;;  %v168_v20 = vld [vmem:[%s2801_s0 + $0x4d0] sm:$0xff]  ;;  %v71_v21 = vld [vmem:[%s2801_s0 + $0x1c8] sm:$0xff] }
  0x61   :  { %v171_v22 = vld [vmem:[%s2801_s0 + $0x4e8] sm:$0xff] }
  0x63   :  { %671 = vmatmul.mubr.f32.gmra.mrb[24].mxu0 %v38_v23  ;;  %921 = vmatmul.mubr.f32.gmra.mrb[24].mxu1 %v138_v24  ;;  %v70_v23 = vld [vmem:[%s2801_s0 + $0x1c0] sm:$0xff] }
  0x64   :  { %1330 = vmatprep.mubr.msk.f32.mxu0 %vm245_vm0, %v41_v25  ;;  %1380 = vmatprep.mubr.msk.f32.mxu1 %vm245_vm0, %v141_v26  ;;  %v170_v24 = vld [vmem:[%s2801_s0 + $0x4e0] sm:$0xff]  ;;  %v73_v25 = vld [vmem:[%s2801_s0 + $0x1d8] sm:$0xff] }
  0x65   :  { %v173_v26 = vld [vmem:[%s2801_s0 + $0x4f8] sm:$0xff] }
  0x67   :  { %676 = vmatmul.mubr.f32.gmra.mrb[26].mxu0 %v40_v27  ;;  %926 = vmatmul.mubr.f32.gmra.mrb[26].mxu1 %v140_v28  ;;  %v72_v27 = vld [vmem:[%s2801_s0 + $0x1d0] sm:$0xff] }
  0x68   :  { %1331 = vmatprep.mubr.msk.f32.mxu0 %vm245_vm0, %v43_v29  ;;  %1381 = vmatprep.mubr.msk.f32.mxu1 %vm245_vm0, %v143_v30  ;;  %v172_v28 = vld [vmem:[%s2801_s0 + $0x4f0] sm:$0xff]  ;;  %v75_v29 = vld [vmem:[%s2801_s0 + $0x1e8] sm:$0xff] }
  0x69   :  { %v175_v30 = vld [vmem:[%s2801_s0 + $0x508] sm:$0xff] }
  0x6b   :  { %681 = vmatmul.mubr.f32.gmra.mrb[28].mxu0 %v42_v31  ;;  %931 = vmatmul.mubr.f32.gmra.mrb[28].mxu1 %v142_v32  ;;  %v74_v31 = vld [vmem:[%s2801_s0 + $0x1e0] sm:$0xff] }
  0x6c   :  { %1332 = vmatprep.mubr.msk.f32.mxu0 %vm245_vm0, %v45_v33  ;;  %1382 = vmatprep.mubr.msk.f32.mxu1 %vm245_vm0, %v145_v34  ;;  %v174_v32 = vld [vmem:[%s2801_s0 + $0x500] sm:$0xff]  ;;  %v77_v33 = vld [vmem:[%s2801_s0 + $0x1f8] sm:$0xff] }
  0x6d   :  { %v177_v34 = vld [vmem:[%s2801_s0 + $0x518] sm:$0xff] }
  0x6f   :  { %686 = vmatmul.mubr.f32.gmra.mrb[30].mxu0 %v44_v35  ;;  %936 = vmatmul.mubr.f32.gmra.mrb[30].mxu1 %v144_v36  ;;  %v76_v35 = vld [vmem:[%s2801_s0 + $0x1f0] sm:$0xff] }
  0x70   :  { %1333 = vmatprep.mubr.msk.f32.mxu0 %vm245_vm0, %v47_v37  ;;  %1383 = vmatprep.mubr.msk.f32.mxu1 %vm245_vm0, %v147_v38  ;;  %v176_v36 = vld [vmem:[%s2801_s0 + $0x510] sm:$0xff]  ;;  %v79_v37 = vld [vmem:[%s2801_s0 + $0x208] sm:$0xff] }
  0x71   :  { %v179_v38 = vld [vmem:[%s2801_s0 + $0x528] sm:$0xff] }
  0x73   :  { %691 = vmatmul.mubr.f32.gmra.mrb[32].mxu0 %v46_v39  ;;  %941 = vmatmul.mubr.f32.gmra.mrb[32].mxu1 %v146_v40  ;;  %v78_v39 = vld [vmem:[%s2801_s0 + $0x200] sm:$0xff] }
  0x74   :  { %1334 = vmatprep.mubr.msk.f32.mxu0 %vm245_vm0, %v49_v41  ;;  %1384 = vmatprep.mubr.msk.f32.mxu1 %vm245_vm0, %v149_v42  ;;  %v178_v40 = vld [vmem:[%s2801_s0 + $0x520] sm:$0xff]  ;;  %v81_v41 = vld [vmem:[%s2801_s0 + $0x218] sm:$0xff] }
  0x75   :  { %v181_v42 = vld [vmem:[%s2801_s0 + $0x538] sm:$0xff] }
  0x77   :  { %696 = vmatmul.mubr.f32.gmra.mrb[34].mxu0 %v48_v43  ;;  %946 = vmatmul.mubr.f32.gmra.mrb[34].mxu1 %v148_v44  ;;  %v80_v43 = vld [vmem:[%s2801_s0 + $0x210] sm:$0xff] }
  0x78   :  { %1335 = vmatprep.mubr.msk.f32.mxu0 %vm245_vm0, %v51_v45  ;;  %1385 = vmatprep.mubr.msk.f32.mxu1 %vm245_vm0, %v151_v46  ;;  %v180_v44 = vld [vmem:[%s2801_s0 + $0x530] sm:$0xff]  ;;  %v83_v45 = vld [vmem:[%s2801_s0 + $0x228] sm:$0xff] }
  0x79   :  { %v183_v46 = vld [vmem:[%s2801_s0 + $0x548] sm:$0xff] }
  0x7b   :  { %701 = vmatmul.mubr.f32.gmra.mrb[36].mxu0 %v50_v47  ;;  %951 = vmatmul.mubr.f32.gmra.mrb[36].mxu1 %v150_v48  ;;  %v82_v47 = vld [vmem:[%s2801_s0 + $0x220] sm:$0xff] }
  0x7c   :  { %1336 = vmatprep.mubr.msk.f32.mxu0 %vm245_vm0, %v53_v49  ;;  %1386 = vmatprep.mubr.msk.f32.mxu1 %vm245_vm0, %v153_v50  ;;  %v182_v48 = vld [vmem:[%s2801_s0 + $0x540] sm:$0xff]  ;;  %v85_v49 = vld [vmem:[%s2801_s0 + $0x238] sm:$0xff] }
  0x7d   :  { %v185_v50 = vld [vmem:[%s2801_s0 + $0x558] sm:$0xff] }
  0x7f   :  { %706 = vmatmul.mubr.f32.gmra.mrb[38].mxu0 %v52_v51  ;;  %956 = vmatmul.mubr.f32.gmra.mrb[38].mxu1 %v152_v52  ;;  %v84_v51 = vld [vmem:[%s2801_s0 + $0x230] sm:$0xff] }
  0x80   :  { %1337 = vmatprep.mubr.msk.f32.mxu0 %vm245_vm0, %v55_v53  ;;  %1387 = vmatprep.mubr.msk.f32.mxu1 %vm245_vm0, %v155_v54  ;;  %v184_v52 = vld [vmem:[%s2801_s0 + $0x550] sm:$0xff]  ;;  %v87_v53 = vld [vmem:[%s2801_s0 + $0x248] sm:$0xff] }
  0x81   :  { %v187_v54 = vld [vmem:[%s2801_s0 + $0x568] sm:$0xff] }
  0x83   :  { %711 = vmatmul.mubr.f32.gmra.mrb[40].mxu0 %v54_v55  ;;  %961 = vmatmul.mubr.f32.gmra.mrb[40].mxu1 %v154_v56  ;;  %v86_v55 = vld [vmem:[%s2801_s0 + $0x240] sm:$0xff] }
  0x84   :  { %1338 = vmatprep.mubr.msk.f32.mxu0 %vm245_vm0, %v57_v57  ;;  %1388 = vmatprep.mubr.msk.f32.mxu1 %vm245_vm0, %v157_v58  ;;  %v186_v56 = vld [vmem:[%s2801_s0 + $0x560] sm:$0xff]  ;;  %v89_v57 = vld [vmem:[%s2801_s0 + $0x258] sm:$0xff] }
  0x85   :  { %v189_v58 = vld [vmem:[%s2801_s0 + $0x578] sm:$0xff] }
  0x87   :  { %716 = vmatmul.mubr.f32.gmra.mrb[42].mxu0 %v56_v59  ;;  %966 = vmatmul.mubr.f32.gmra.mrb[42].mxu1 %v156_v60  ;;  %v88_v59 = vld [vmem:[%s2801_s0 + $0x250] sm:$0xff] }
  0x88   :  { %1339 = vmatprep.mubr.msk.f32.mxu0 %vm245_vm0, %v59_v61  ;;  %1389 = vmatprep.mubr.msk.f32.mxu1 %vm245_vm0, %v159_v62  ;;  %v188_v60 = vld [vmem:[%s2801_s0 + $0x570] sm:$0xff]  ;;  %v91_v61 = vld [vmem:[%s2801_s0 + $0x268] sm:$0xff] }
  0x89   :  { %v191_v62 = vld [vmem:[%s2801_s0 + $0x588] sm:$0xff] }
  0x8b   :  { %721 = vmatmul.mubr.f32.gmra.mrb[44].mxu0 %v58_v63  ;;  %971 = vmatmul.mubr.f32.gmra.mrb[44].mxu1 %v158_v0  ;;  %v90_v63 = vld [vmem:[%s2801_s0 + $0x260] sm:$0xff] }
  0x8c   :  { %1340 = vmatprep.mubr.msk.f32.mxu0 %vm245_vm0, %v61_v1  ;;  %1390 = vmatprep.mubr.msk.f32.mxu1 %vm245_vm0, %v161_v2  ;;  %v190_v0 = vld [vmem:[%s2801_s0 + $0x580] sm:$0xff]  ;;  %v93_v1 = vld [vmem:[%s2801_s0 + $0x278] sm:$0xff] }
  0x8d   :  { %v193_v2 = vld [vmem:[%s2801_s0 + $0x598] sm:$0xff] }
  0x8f   :  { %726 = vmatmul.mubr.f32.gmra.mrb[46].mxu0 %v60_v3  ;;  %976 = vmatmul.mubr.f32.gmra.mrb[46].mxu1 %v160_v4  ;;  %v92_v3 = vld [vmem:[%s2801_s0 + $0x270] sm:$0xff] }
  0x90   :  { %1341 = vmatprep.mubr.msk.f32.mxu0 %vm245_vm0, %v63_v5  ;;  %1391 = vmatprep.mubr.msk.f32.mxu1 %vm245_vm0, %v163_v6  ;;  %v192_v4 = vld [vmem:[%s2801_s0 + $0x590] sm:$0xff]  ;;  %v95_v5 = vld [vmem:[%s2801_s0 + $0x288] sm:$0xff] }
  0x91   :  { %v195_v6 = vld [vmem:[%s2801_s0 + $0x5a8] sm:$0xff] }
  0x93   :  { %731 = vmatmul.mubr.f32.gmra.mrb[48].mxu0 %v62_v7  ;;  %981 = vmatmul.mubr.f32.gmra.mrb[48].mxu1 %v162_v8  ;;  %v94_v7 = vld [vmem:[%s2801_s0 + $0x280] sm:$0xff] }
  0x94   :  { %1342 = vmatprep.mubr.msk.f32.mxu0 %vm245_vm0, %v65_v9  ;;  %1392 = vmatprep.mubr.msk.f32.mxu1 %vm245_vm0, %v165_v10  ;;  %v194_v8 = vld [vmem:[%s2801_s0 + $0x5a0] sm:$0xff]  ;;  %v97_v9 = vld [vmem:[%s2801_s0 + $0x298] sm:$0xff] }
  0x95   :  { %v197_v10 = vld [vmem:[%s2801_s0 + $0x5b8] sm:$0xff] }
  0x97   :  { %736 = vmatmul.mubr.f32.gmra.mrb[50].mxu0 %v64_v11  ;;  %986 = vmatmul.mubr.f32.gmra.mrb[50].mxu1 %v164_v12  ;;  %v96_v11 = vld [vmem:[%s2801_s0 + $0x290] sm:$0xff] }
  0x98   :  { %1343 = vmatprep.mubr.msk.f32.mxu0 %vm245_vm0, %v67_v13  ;;  %1393 = vmatprep.mubr.msk.f32.mxu1 %vm245_vm0, %v167_v14  ;;  %v196_v12 = vld [vmem:[%s2801_s0 + $0x5b0] sm:$0xff]  ;;  %v99_v13 = vld [vmem:[%s2801_s0 + $0x2a8] sm:$0xff] }
  0x99   :  { %v199_v14 = vld [vmem:[%s2801_s0 + $0x5c8] sm:$0xff] }
  0x9b   :  { %741 = vmatmul.mubr.f32.gmra.mrb[52].mxu0 %v66_v15  ;;  %991 = vmatmul.mubr.f32.gmra.mrb[52].mxu1 %v166_v16  ;;  %v98_v15 = vld [vmem:[%s2801_s0 + $0x2a0] sm:$0xff] }
  0x9c   :  { %1344 = vmatprep.mubr.msk.f32.mxu0 %vm245_vm0, %v69_v17  ;;  %1394 = vmatprep.mubr.msk.f32.mxu1 %vm245_vm0, %v169_v18  ;;  %v198_v16 = vld [vmem:[%s2801_s0 + $0x5c0] sm:$0xff]  ;;  %v101_v17 = vld [vmem:[%s2801_s0 + $0x2b8] sm:$0xff] }
  0x9d   :  { %v201_v18 = vld [vmem:[%s2801_s0 + $0x5d8] sm:$0xff] }
  0x9f   :  { %746 = vmatmul.mubr.f32.gmra.mrb[54].mxu0 %v68_v19  ;;  %996 = vmatmul.mubr.f32.gmra.mrb[54].mxu1 %v168_v20  ;;  %v100_v19 = vld [vmem:[%s2801_s0 + $0x2b0] sm:$0xff] }
  0xa0   :  { %1345 = vmatprep.mubr.msk.f32.mxu0 %vm245_vm0, %v71_v21  ;;  %1395 = vmatprep.mubr.msk.f32.mxu1 %vm245_vm0, %v171_v22  ;;  %v200_v20 = vld [vmem:[%s2801_s0 + $0x5d0] sm:$0xff]  ;;  %v103_v21 = vld [vmem:[%s2801_s0 + $0x2c8] sm:$0xff] }
  0xa1   :  { %v203_v22 = vld [vmem:[%s2801_s0 + $0x5e8] sm:$0xff] }
  0xa3   :  { %751 = vmatmul.mubr.f32.gmra.mrb[56].mxu0 %v70_v23  ;;  %1001 = vmatmul.mubr.f32.gmra.mrb[56].mxu1 %v170_v24  ;;  %v102_v23 = vld [vmem:[%s2801_s0 + $0x2c0] sm:$0xff] }
  0xa4   :  { %1346 = vmatprep.mubr.msk.f32.mxu0 %vm245_vm0, %v73_v25  ;;  %1396 = vmatprep.mubr.msk.f32.mxu1 %vm245_vm0, %v173_v26  ;;  %v202_v24 = vld [vmem:[%s2801_s0 + $0x5e0] sm:$0xff]  ;;  %v105_v25 = vld [vmem:[%s2801_s0 + $0x2d8] sm:$0xff] }
  0xa5   :  { %v205_v26 = vld [vmem:[%s2801_s0 + $0x5f8] sm:$0xff] }
  0xa7   :  { %756 = vmatmul.mubr.f32.gmra.mrb[58].mxu0 %v72_v27  ;;  %1006 = vmatmul.mubr.f32.gmra.mrb[58].mxu1 %v172_v28  ;;  %v104_v27 = vld [vmem:[%s2801_s0 + $0x2d0] sm:$0xff] }
  0xa8   :  { %1347 = vmatprep.mubr.msk.f32.mxu0 %vm245_vm0, %v75_v29  ;;  %1397 = vmatprep.mubr.msk.f32.mxu1 %vm245_vm0, %v175_v30  ;;  %v204_v28 = vld [vmem:[%s2801_s0 + $0x5f0] sm:$0xff]  ;;  %v107_v29 = vld [vmem:[%s2801_s0 + $0x2e8] sm:$0xff] }
  0xa9   :  { %v207_v30 = vld [vmem:[%s2801_s0 + $0x608] sm:$0xff] }
  0xab   :  { %761 = vmatmul.mubr.f32.gmra.mrb[60].mxu0 %v74_v31  ;;  %1011 = vmatmul.mubr.f32.gmra.mrb[60].mxu1 %v174_v32  ;;  %v106_v31 = vld [vmem:[%s2801_s0 + $0x2e0] sm:$0xff] }
  0xac   :  { %1348 = vmatprep.mubr.msk.f32.mxu0 %vm245_vm0, %v77_v33  ;;  %1398 = vmatprep.mubr.msk.f32.mxu1 %vm245_vm0, %v177_v34  ;;  %v206_v32 = vld [vmem:[%s2801_s0 + $0x600] sm:$0xff]  ;;  %v109_v33 = vld [vmem:[%s2801_s0 + $0x2f8] sm:$0xff] }
  0xad   :  { %v209_v34 = vld [vmem:[%s2801_s0 + $0x618] sm:$0xff] }
  0xaf   :  { %766 = vmatmul.mubr.f32.gmra.mrb[62].mxu0 %v76_v35  ;;  %1016 = vmatmul.mubr.f32.gmra.mrb[62].mxu1 %v176_v36  ;;  %v108_v35 = vld [vmem:[%s2801_s0 + $0x2f0] sm:$0xff] }
  0xb0   :  { %1349 = vmatprep.mubr.msk.f32.mxu0 %vm245_vm0, %v79_v37  ;;  %1399 = vmatprep.mubr.msk.f32.mxu1 %vm245_vm0, %v179_v38  ;;  %v208_v36 = vld [vmem:[%s2801_s0 + $0x610] sm:$0xff]  ;;  %v111_v37 = vld [vmem:[%s2801_s0 + $0x308] sm:$0xff] }
  0xb1   :  { %v211_v38 = vld [vmem:[%s2801_s0 + $0x628] sm:$0xff] }
  0xb3   :  { %771 = vmatmul.mubr.f32.gmra.mrb[64].mxu0 %v78_v39  ;;  %1021 = vmatmul.mubr.f32.gmra.mrb[64].mxu1 %v178_v40  ;;  %v110_v39 = vld [vmem:[%s2801_s0 + $0x300] sm:$0xff] }
  0xb4   :  { %1350 = vmatprep.mubr.msk.f32.mxu0 %vm245_vm0, %v81_v41  ;;  %1400 = vmatprep.mubr.msk.f32.mxu1 %vm245_vm0, %v181_v42  ;;  %v210_v40 = vld [vmem:[%s2801_s0 + $0x620] sm:$0xff]  ;;  %v113_v41 = vld [vmem:[%s2801_s0 + $0x318] sm:$0xff] }
  0xb5   :  { %v213_v42 = vld [vmem:[%s2801_s0 + $0x638] sm:$0xff] }
  0xb7   :  { %776 = vmatmul.mubr.f32.gmra.mrb[66].mxu0 %v80_v43  ;;  %1026 = vmatmul.mubr.f32.gmra.mrb[66].mxu1 %v180_v44  ;;  %v112_v43 = vld [vmem:[%s2801_s0 + $0x310] sm:$0xff] }
  0xb8   :  { %1351 = vmatprep.mubr.msk.f32.mxu0 %vm245_vm0, %v83_v45  ;;  %1401 = vmatprep.mubr.msk.f32.mxu1 %vm245_vm0, %v183_v46  ;;  %v212_v44 = vld [vmem:[%s2801_s0 + $0x630] sm:$0xff]  ;;  %v2298_v45 = vld [vmem:[%s2802_s2] ss:$0 sm:$0xff] }
  0xbb   :  { %781 = vmatmul.mubr.f32.gmra.mrb[68].mxu0 %v82_v47  ;;  %1031 = vmatmul.mubr.f32.gmra.mrb[68].mxu1 %v182_v48 }
  0xbc   :  { %1352 = vmatprep.mubr.msk.f32.mxu0 %vm245_vm0, %v85_v49  ;;  %1402 = vmatprep.mubr.msk.f32.mxu1 %vm245_vm0, %v185_v50 }
  0xbf   :  { %786 = vmatmul.mubr.f32.gmra.mrb[70].mxu0 %v84_v51  ;;  %1036 = vmatmul.mubr.f32.gmra.mrb[70].mxu1 %v184_v52 }
  0xc0   :  { %1353 = vmatprep.mubr.msk.f32.mxu0 %vm245_vm0, %v87_v53  ;;  %1403 = vmatprep.mubr.msk.f32.mxu1 %vm245_vm0, %v187_v54 }
  0xc3   :  { %791 = vmatmul.mubr.f32.gmra.mrb[72].mxu0 %v86_v55  ;;  %1041 = vmatmul.mubr.f32.gmra.mrb[72].mxu1 %v186_v56 }
  0xc4   :  { %1354 = vmatprep.mubr.msk.f32.mxu0 %vm245_vm0, %v89_v57  ;;  %1404 = vmatprep.mubr.msk.f32.mxu1 %vm245_vm0, %v189_v58 }
  0xc7   :  { %796 = vmatmul.mubr.f32.gmra.mrb[74].mxu0 %v88_v59  ;;  %1046 = vmatmul.mubr.f32.gmra.mrb[74].mxu1 %v188_v60 }
  0xc8   :  { %1355 = vmatprep.mubr.msk.f32.mxu0 %vm245_vm0, %v91_v61  ;;  %1405 = vmatprep.mubr.msk.f32.mxu1 %vm245_vm0, %v191_v62 }
  0xcb   :  { %801 = vmatmul.mubr.f32.gmra.mrb[76].mxu0 %v90_v63  ;;  %1051 = vmatmul.mubr.f32.gmra.mrb[76].mxu1 %v190_v0 }
  0xcc   :  { %1356 = vmatprep.mubr.msk.f32.mxu0 %vm245_vm0, %v93_v1  ;;  %1406 = vmatprep.mubr.msk.f32.mxu1 %vm245_vm0, %v193_v2 }
  0xcf   :  { %806 = vmatmul.mubr.f32.gmra.mrb[78].mxu0 %v92_v3  ;;  %1056 = vmatmul.mubr.f32.gmra.mrb[78].mxu1 %v192_v4 }
  0xd0   :  { %1357 = vmatprep.mubr.msk.f32.mxu0 %vm245_vm0, %v95_v5  ;;  %1407 = vmatprep.mubr.msk.f32.mxu1 %vm245_vm0, %v195_v6 }
  0xd3   :  { %811 = vmatmul.mubr.f32.gmra.mrb[80].mxu0 %v94_v7  ;;  %1061 = vmatmul.mubr.f32.gmra.mrb[80].mxu1 %v194_v8 }
  0xd4   :  { %1358 = vmatprep.mubr.msk.f32.mxu0 %vm245_vm0, %v97_v9  ;;  %1408 = vmatprep.mubr.msk.f32.mxu1 %vm245_vm0, %v197_v10 }
  0xd7   :  { %816 = vmatmul.mubr.f32.gmra.mrb[82].mxu0 %v96_v11  ;;  %1066 = vmatmul.mubr.f32.gmra.mrb[82].mxu1 %v196_v12 }
  0xd8   :  { %1359 = vmatprep.mubr.msk.f32.mxu0 %vm245_vm0, %v99_v13  ;;  %1409 = vmatprep.mubr.msk.f32.mxu1 %vm245_vm0, %v199_v14 }
  0xdb   :  { %821 = vmatmul.mubr.f32.gmra.mrb[84].mxu0 %v98_v15  ;;  %1071 = vmatmul.mubr.f32.gmra.mrb[84].mxu1 %v198_v16 }
  0xdc   :  { %1360 = vmatprep.mubr.msk.f32.mxu0 %vm245_vm0, %v101_v17  ;;  %1410 = vmatprep.mubr.msk.f32.mxu1 %vm245_vm0, %v201_v18 }
  0xdf   :  { %826 = vmatmul.mubr.f32.gmra.mrb[86].mxu0 %v100_v19  ;;  %1076 = vmatmul.mubr.f32.gmra.mrb[86].mxu1 %v200_v20 }
  0xe0   :  { %1361 = vmatprep.mubr.msk.f32.mxu0 %vm245_vm0, %v103_v21  ;;  %1411 = vmatprep.mubr.msk.f32.mxu1 %vm245_vm0, %v203_v22 }
  0xe3   :  { %831 = vmatmul.mubr.f32.gmra.mrb[88].mxu0 %v102_v23  ;;  %1081 = vmatmul.mubr.f32.gmra.mrb[88].mxu1 %v202_v24 }
  0xe4   :  { %1362 = vmatprep.mubr.msk.f32.mxu0 %vm245_vm0, %v105_v25  ;;  %1412 = vmatprep.mubr.msk.f32.mxu1 %vm245_vm0, %v205_v26 }
  0xe7   :  { %836 = vmatmul.mubr.f32.gmra.mrb[90].mxu0 %v104_v27  ;;  %1086 = vmatmul.mubr.f32.gmra.mrb[90].mxu1 %v204_v28 }
  0xe8   :  { %1363 = vmatprep.mubr.msk.f32.mxu0 %vm245_vm0, %v107_v29  ;;  %1413 = vmatprep.mubr.msk.f32.mxu1 %vm245_vm0, %v207_v30 }
  0xeb   :  { %841 = vmatmul.mubr.f32.gmra.mrb[92].mxu0 %v106_v31  ;;  %1091 = vmatmul.mubr.f32.gmra.mrb[92].mxu1 %v206_v32 }
  0xec   :  { %1364 = vmatprep.mubr.msk.f32.mxu0 %vm245_vm0, %v109_v33  ;;  %1414 = vmatprep.mubr.msk.f32.mxu1 %vm245_vm0, %v209_v34 }
  0xef   :  { %846 = vmatmul.mubr.f32.gmra.mrb[94].mxu0 %v108_v35  ;;  %1096 = vmatmul.mubr.f32.gmra.mrb[94].mxu1 %v208_v36 }
  0xf0   :  { %1365 = vmatprep.mubr.msk.f32.mxu0 %vm245_vm0, %v111_v37  ;;  %1415 = vmatprep.mubr.msk.f32.mxu1 %vm245_vm0, %v211_v38 }
  0xf3   :  { %851 = vmatmul.mubr.f32.gmra.mrb[96].mxu0 %v110_v39  ;;  %1101 = vmatmul.mubr.f32.gmra.mrb[96].mxu1 %v210_v40 }
  0xf4   :  { %1366 = vmatprep.mubr.msk.f32.mxu0 %vm245_vm0, %v113_v41  ;;  %1416 = vmatprep.mubr.msk.f32.mxu1 %vm245_vm0, %v213_v42 }
  0xf7   :  { %856 = vmatmul.mubr.f32.gmra.mrb[98].mxu0 %v112_v43  ;;  %1106 = vmatmul.mubr.f32.gmra.mrb[98].mxu1 %v212_v44 }
 0x106   :  { %v612_v46 = vpop.f32.mrb[0].mxu0  ;;  %v862_v47 = vpop.f32.mrb[0].mxu1 }
 0x107   :  { %v613_v48 = vadd.f32 %v2298_v45, %v612_v46  ;;  %v863_v49 = vadd.f32 %v2298_v45, %v862_v47  ;;  %v614_v50 = vpop.f32.mrb[1].mxu0  ;;  %v864_v51 = vpop.f32.mrb[1].mxu1 }
 0x109   :  { %v1111_v52 = vmax.f32 %v613_v48, 0.0  ;;  %v1161_v53 = vmax.f32 %v863_v49, 0.0 }
 0x10a   :  { %v617_v54 = vpop.f32.mrb[2].mxu0  ;;  %v867_v55 = vpop.f32.mrb[2].mxu1 }
 0x10b   :  { %1212 = vst.msk [vmem:[%s2803_s3] sm:$0xff] %vm1211_vm1, %v1111_v52  ;;  %1262 = vst.msk [vmem:[%s2803_s3 + $0x190] sm:$0xff] %vm1211_vm1, %v1161_v53  ;;  %v618_v56 = vadd.f32 %v2298_v45, %v617_v54  ;;  %v868_v57 = vadd.f32 %v2298_v45, %v867_v55  ;;  %v619_v58 = vpop.f32.mrb[3].mxu0  ;;  %v869_v59 = vpop.f32.mrb[3].mxu1 }
 0x10d   :  { %v1112_v60 = vmax.f32 %v618_v56, 0.0  ;;  %v1162_v61 = vmax.f32 %v868_v57, 0.0 }
 0x10e   :  { %v622_v62 = vpop.f32.mrb[4].mxu0  ;;  %v872_v63 = vpop.f32.mrb[4].mxu1 }
 0x10f   :  { %1213 = vst.msk [vmem:[%s2803_s3 + $0x8] sm:$0xff] %vm1211_vm1, %v1112_v60  ;;  %1263 = vst.msk [vmem:[%s2803_s3 + $0x198] sm:$0xff] %vm1211_vm1, %v1162_v61  ;;  %v623_v0 = vadd.f32 %v2298_v45, %v622_v62  ;;  %v873_v1 = vadd.f32 %v2298_v45, %v872_v63  ;;  %v624_v2 = vpop.f32.mrb[5].mxu0  ;;  %v874_v3 = vpop.f32.mrb[5].mxu1 }
 0x111   :  { %v1113_v4 = vmax.f32 %v623_v0, 0.0  ;;  %v1163_v5 = vmax.f32 %v873_v1, 0.0 }
 0x112   :  { %v627_v6 = vpop.f32.mrb[6].mxu0  ;;  %v877_v7 = vpop.f32.mrb[6].mxu1 }
 0x113   :  { %1214 = vst.msk [vmem:[%s2803_s3 + $0x10] sm:$0xff] %vm1211_vm1, %v1113_v4  ;;  %1264 = vst.msk [vmem:[%s2803_s3 + $0x1a0] sm:$0xff] %vm1211_vm1, %v1163_v5  ;;  %v628_v8 = vadd.f32 %v2298_v45, %v627_v6  ;;  %v878_v9 = vadd.f32 %v2298_v45, %v877_v7  ;;  %v629_v10 = vpop.f32.mrb[7].mxu0  ;;  %v879_v11 = vpop.f32.mrb[7].mxu1 }
 0x115   :  { %v1114_v12 = vmax.f32 %v628_v8, 0.0  ;;  %v1164_v13 = vmax.f32 %v878_v9, 0.0 }
 0x116   :  { %v632_v14 = vpop.f32.mrb[8].mxu0  ;;  %v882_v15 = vpop.f32.mrb[8].mxu1 }
 0x117   :  { %1215 = vst.msk [vmem:[%s2803_s3 + $0x18] sm:$0xff] %vm1211_vm1, %v1114_v12  ;;  %1265 = vst.msk [vmem:[%s2803_s3 + $0x1a8] sm:$0xff] %vm1211_vm1, %v1164_v13  ;;  %v633_v16 = vadd.f32 %v2298_v45, %v632_v14  ;;  %v883_v17 = vadd.f32 %v2298_v45, %v882_v15  ;;  %v634_v18 = vpop.f32.mrb[9].mxu0  ;;  %v884_v19 = vpop.f32.mrb[9].mxu1 }
 0x119   :  { %v1115_v20 = vmax.f32 %v633_v16, 0.0  ;;  %v1165_v21 = vmax.f32 %v883_v17, 0.0 }
 0x11a   :  { %v637_v22 = vpop.f32.mrb[10].mxu0  ;;  %v887_v23 = vpop.f32.mrb[10].mxu1 }
 0x11b   :  { %1216 = vst.msk [vmem:[%s2803_s3 + $0x20] sm:$0xff] %vm1211_vm1, %v1115_v20  ;;  %1266 = vst.msk [vmem:[%s2803_s3 + $0x1b0] sm:$0xff] %vm1211_vm1, %v1165_v21  ;;  %v638_v24 = vadd.f32 %v2298_v45, %v637_v22  ;;  %v888_v25 = vadd.f32 %v2298_v45, %v887_v23  ;;  %v639_v26 = vpop.f32.mrb[11].mxu0  ;;  %v889_v27 = vpop.f32.mrb[11].mxu1 }
 0x11d   :  { %v1116_v28 = vmax.f32 %v638_v24, 0.0  ;;  %v1166_v29 = vmax.f32 %v888_v25, 0.0 }
 0x11e   :  { %v642_v30 = vpop.f32.mrb[12].mxu0  ;;  %v892_v31 = vpop.f32.mrb[12].mxu1 }
 0x11f   :  { %1217 = vst.msk [vmem:[%s2803_s3 + $0x28] sm:$0xff] %vm1211_vm1, %v1116_v28  ;;  %1267 = vst.msk [vmem:[%s2803_s3 + $0x1b8] sm:$0xff] %vm1211_vm1, %v1166_v29  ;;  %v643_v32 = vadd.f32 %v2298_v45, %v642_v30  ;;  %v893_v33 = vadd.f32 %v2298_v45, %v892_v31  ;;  %v644_v34 = vpop.f32.mrb[13].mxu0  ;;  %v894_v35 = vpop.f32.mrb[13].mxu1 }
 0x121   :  { %v1117_v36 = vmax.f32 %v643_v32, 0.0  ;;  %v1167_v37 = vmax.f32 %v893_v33, 0.0 }
 0x122   :  { %v647_v38 = vpop.f32.mrb[14].mxu0  ;;  %v897_v39 = vpop.f32.mrb[14].mxu1 }
 0x123   :  { %1218 = vst.msk [vmem:[%s2803_s3 + $0x30] sm:$0xff] %vm1211_vm1, %v1117_v36  ;;  %1268 = vst.msk [vmem:[%s2803_s3 + $0x1c0] sm:$0xff] %vm1211_vm1, %v1167_v37  ;;  %v648_v40 = vadd.f32 %v2298_v45, %v647_v38  ;;  %v898_v41 = vadd.f32 %v2298_v45, %v897_v39  ;;  %v649_v42 = vpop.f32.mrb[15].mxu0  ;;  %v899_v43 = vpop.f32.mrb[15].mxu1 }
 0x125   :  { %v1118_v44 = vmax.f32 %v648_v40, 0.0  ;;  %v1168_v46 = vmax.f32 %v898_v41, 0.0 }
 0x126   :  { %v652_v47 = vpop.f32.mrb[16].mxu0  ;;  %v902_v48 = vpop.f32.mrb[16].mxu1 }
 0x127   :  { %1219 = vst.msk [vmem:[%s2803_s3 + $0x38] sm:$0xff] %vm1211_vm1, %v1118_v44  ;;  %1269 = vst.msk [vmem:[%s2803_s3 + $0x1c8] sm:$0xff] %vm1211_vm1, %v1168_v46  ;;  %v653_v49 = vadd.f32 %v2298_v45, %v652_v47  ;;  %v903_v50 = vadd.f32 %v2298_v45, %v902_v48  ;;  %v654_v51 = vpop.f32.mrb[17].mxu0  ;;  %v904_v52 = vpop.f32.mrb[17].mxu1 }
 0x129   :  { %v1119_v53 = vmax.f32 %v653_v49, 0.0  ;;  %v1169_v54 = vmax.f32 %v903_v50, 0.0 }
 0x12a   :  { %v657_v55 = vpop.f32.mrb[18].mxu0  ;;  %v907_v56 = vpop.f32.mrb[18].mxu1 }
 0x12b   :  { %1220 = vst.msk [vmem:[%s2803_s3 + $0x40] sm:$0xff] %vm1211_vm1, %v1119_v53  ;;  %1270 = vst.msk [vmem:[%s2803_s3 + $0x1d0] sm:$0xff] %vm1211_vm1, %v1169_v54  ;;  %v658_v57 = vadd.f32 %v2298_v45, %v657_v55  ;;  %v908_v58 = vadd.f32 %v2298_v45, %v907_v56  ;;  %v659_v59 = vpop.f32.mrb[19].mxu0  ;;  %v909_v60 = vpop.f32.mrb[19].mxu1 }
 0x12d   :  { %v1120_v61 = vmax.f32 %v658_v57, 0.0  ;;  %v1170_v62 = vmax.f32 %v908_v58, 0.0 }
 0x12e   :  { %v662_v63 = vpop.f32.mrb[20].mxu0  ;;  %v912_v0 = vpop.f32.mrb[20].mxu1 }
 0x12f   :  { %1221 = vst.msk [vmem:[%s2803_s3 + $0x48] sm:$0xff] %vm1211_vm1, %v1120_v61  ;;  %1271 = vst.msk [vmem:[%s2803_s3 + $0x1d8] sm:$0xff] %vm1211_vm1, %v1170_v62  ;;  %v663_v1 = vadd.f32 %v2298_v45, %v662_v63  ;;  %v913_v2 = vadd.f32 %v2298_v45, %v912_v0  ;;  %v664_v3 = vpop.f32.mrb[21].mxu0  ;;  %v914_v4 = vpop.f32.mrb[21].mxu1 }
 0x131   :  { %v1121_v5 = vmax.f32 %v663_v1, 0.0  ;;  %v1171_v6 = vmax.f32 %v913_v2, 0.0 }
 0x132   :  { %v667_v7 = vpop.f32.mrb[22].mxu0  ;;  %v917_v8 = vpop.f32.mrb[22].mxu1 }
 0x133   :  { %1222 = vst.msk [vmem:[%s2803_s3 + $0x50] sm:$0xff] %vm1211_vm1, %v1121_v5  ;;  %1272 = vst.msk [vmem:[%s2803_s3 + $0x1e0] sm:$0xff] %vm1211_vm1, %v1171_v6  ;;  %v668_v9 = vadd.f32 %v2298_v45, %v667_v7  ;;  %v918_v10 = vadd.f32 %v2298_v45, %v917_v8  ;;  %v669_v11 = vpop.f32.mrb[23].mxu0  ;;  %v919_v12 = vpop.f32.mrb[23].mxu1 }
 0x135   :  { %v1122_v13 = vmax.f32 %v668_v9, 0.0  ;;  %v1172_v14 = vmax.f32 %v918_v10, 0.0 }
 0x136   :  { %v672_v15 = vpop.f32.mrb[24].mxu0  ;;  %v922_v16 = vpop.f32.mrb[24].mxu1 }
 0x137   :  { %1223 = vst.msk [vmem:[%s2803_s3 + $0x58] sm:$0xff] %vm1211_vm1, %v1122_v13  ;;  %1273 = vst.msk [vmem:[%s2803_s3 + $0x1e8] sm:$0xff] %vm1211_vm1, %v1172_v14  ;;  %v673_v17 = vadd.f32 %v2298_v45, %v672_v15  ;;  %v923_v18 = vadd.f32 %v2298_v45, %v922_v16  ;;  %v674_v19 = vpop.f32.mrb[25].mxu0  ;;  %v924_v20 = vpop.f32.mrb[25].mxu1 }
 0x139   :  { %v1123_v21 = vmax.f32 %v673_v17, 0.0  ;;  %v1173_v22 = vmax.f32 %v923_v18, 0.0 }
 0x13a   :  { %v677_v23 = vpop.f32.mrb[26].mxu0  ;;  %v927_v24 = vpop.f32.mrb[26].mxu1 }
 0x13b   :  { %1224 = vst.msk [vmem:[%s2803_s3 + $0x60] sm:$0xff] %vm1211_vm1, %v1123_v21  ;;  %1274 = vst.msk [vmem:[%s2803_s3 + $0x1f0] sm:$0xff] %vm1211_vm1, %v1173_v22  ;;  %v678_v25 = vadd.f32 %v2298_v45, %v677_v23  ;;  %v928_v26 = vadd.f32 %v2298_v45, %v927_v24  ;;  %v679_v27 = vpop.f32.mrb[27].mxu0  ;;  %v929_v28 = vpop.f32.mrb[27].mxu1 }
 0x13d   :  { %v1124_v29 = vmax.f32 %v678_v25, 0.0  ;;  %v1174_v30 = vmax.f32 %v928_v26, 0.0 }
 0x13e   :  { %v682_v31 = vpop.f32.mrb[28].mxu0  ;;  %v932_v32 = vpop.f32.mrb[28].mxu1 }
 0x13f   :  { %1225 = vst.msk [vmem:[%s2803_s3 + $0x68] sm:$0xff] %vm1211_vm1, %v1124_v29  ;;  %1275 = vst.msk [vmem:[%s2803_s3 + $0x1f8] sm:$0xff] %vm1211_vm1, %v1174_v30  ;;  %v683_v33 = vadd.f32 %v2298_v45, %v682_v31  ;;  %v933_v34 = vadd.f32 %v2298_v45, %v932_v32  ;;  %v684_v35 = vpop.f32.mrb[29].mxu0  ;;  %v934_v36 = vpop.f32.mrb[29].mxu1 }
 0x141   :  { %v1125_v37 = vmax.f32 %v683_v33, 0.0  ;;  %v1175_v38 = vmax.f32 %v933_v34, 0.0 }
 0x142   :  { %v687_v39 = vpop.f32.mrb[30].mxu0  ;;  %v937_v40 = vpop.f32.mrb[30].mxu1 }
 0x143   :  { %1226 = vst.msk [vmem:[%s2803_s3 + $0x70] sm:$0xff] %vm1211_vm1, %v1125_v37  ;;  %1276 = vst.msk [vmem:[%s2803_s3 + $0x200] sm:$0xff] %vm1211_vm1, %v1175_v38  ;;  %v688_v41 = vadd.f32 %v2298_v45, %v687_v39  ;;  %v938_v42 = vadd.f32 %v2298_v45, %v937_v40  ;;  %v689_v43 = vpop.f32.mrb[31].mxu0  ;;  %v939_v44 = vpop.f32.mrb[31].mxu1 }
 0x145   :  { %v1126_v46 = vmax.f32 %v688_v41, 0.0  ;;  %v1176_v47 = vmax.f32 %v938_v42, 0.0 }
 0x146   :  { %v692_v48 = vpop.f32.mrb[32].mxu0  ;;  %v942_v49 = vpop.f32.mrb[32].mxu1 }
 0x147   :  { %1227 = vst.msk [vmem:[%s2803_s3 + $0x78] sm:$0xff] %vm1211_vm1, %v1126_v46  ;;  %1277 = vst.msk [vmem:[%s2803_s3 + $0x208] sm:$0xff] %vm1211_vm1, %v1176_v47  ;;  %v693_v50 = vadd.f32 %v2298_v45, %v692_v48  ;;  %v943_v51 = vadd.f32 %v2298_v45, %v942_v49  ;;  %v694_v52 = vpop.f32.mrb[33].mxu0  ;;  %v944_v53 = vpop.f32.mrb[33].mxu1 }
 0x149   :  { %v1127_v54 = vmax.f32 %v693_v50, 0.0  ;;  %v1177_v55 = vmax.f32 %v943_v51, 0.0 }
 0x14a   :  { %v697_v56 = vpop.f32.mrb[34].mxu0  ;;  %v947_v57 = vpop.f32.mrb[34].mxu1 }
 0x14b   :  { %1228 = vst.msk [vmem:[%s2803_s3 + $0x80] sm:$0xff] %vm1211_vm1, %v1127_v54  ;;  %1278 = vst.msk [vmem:[%s2803_s3 + $0x210] sm:$0xff] %vm1211_vm1, %v1177_v55  ;;  %v698_v58 = vadd.f32 %v2298_v45, %v697_v56  ;;  %v948_v59 = vadd.f32 %v2298_v45, %v947_v57  ;;  %v699_v60 = vpop.f32.mrb[35].mxu0  ;;  %v949_v61 = vpop.f32.mrb[35].mxu1 }
 0x14d   :  { %v1128_v62 = vmax.f32 %v698_v58, 0.0  ;;  %v1178_v63 = vmax.f32 %v948_v59, 0.0 }
 0x14e   :  { %v702_v0 = vpop.f32.mrb[36].mxu0  ;;  %v952_v1 = vpop.f32.mrb[36].mxu1 }
 0x14f   :  { %1229 = vst.msk [vmem:[%s2803_s3 + $0x88] sm:$0xff] %vm1211_vm1, %v1128_v62  ;;  %1279 = vst.msk [vmem:[%s2803_s3 + $0x218] sm:$0xff] %vm1211_vm1, %v1178_v63  ;;  %v703_v2 = vadd.f32 %v2298_v45, %v702_v0  ;;  %v953_v3 = vadd.f32 %v2298_v45, %v952_v1  ;;  %v704_v4 = vpop.f32.mrb[37].mxu0  ;;  %v954_v5 = vpop.f32.mrb[37].mxu1 }
 0x151   :  { %v1129_v6 = vmax.f32 %v703_v2, 0.0  ;;  %v1179_v7 = vmax.f32 %v953_v3, 0.0 }
 0x152   :  { %v707_v8 = vpop.f32.mrb[38].mxu0  ;;  %v957_v9 = vpop.f32.mrb[38].mxu1 }
 0x153   :  { %1230 = vst.msk [vmem:[%s2803_s3 + $0x90] sm:$0xff] %vm1211_vm1, %v1129_v6  ;;  %1280 = vst.msk [vmem:[%s2803_s3 + $0x220] sm:$0xff] %vm1211_vm1, %v1179_v7  ;;  %v708_v10 = vadd.f32 %v2298_v45, %v707_v8  ;;  %v958_v11 = vadd.f32 %v2298_v45, %v957_v9  ;;  %v709_v12 = vpop.f32.mrb[39].mxu0  ;;  %v959_v13 = vpop.f32.mrb[39].mxu1 }
 0x155   :  { %v1130_v14 = vmax.f32 %v708_v10, 0.0  ;;  %v1180_v15 = vmax.f32 %v958_v11, 0.0 }
 0x156   :  { %v712_v16 = vpop.f32.mrb[40].mxu0  ;;  %v962_v17 = vpop.f32.mrb[40].mxu1 }
 0x157   :  { %1231 = vst.msk [vmem:[%s2803_s3 + $0x98] sm:$0xff] %vm1211_vm1, %v1130_v14  ;;  %1281 = vst.msk [vmem:[%s2803_s3 + $0x228] sm:$0xff] %vm1211_vm1, %v1180_v15  ;;  %v713_v18 = vadd.f32 %v2298_v45, %v712_v16  ;;  %v963_v19 = vadd.f32 %v2298_v45, %v962_v17  ;;  %v714_v20 = vpop.f32.mrb[41].mxu0  ;;  %v964_v21 = vpop.f32.mrb[41].mxu1 }
 0x159   :  { %v1131_v22 = vmax.f32 %v713_v18, 0.0  ;;  %v1181_v23 = vmax.f32 %v963_v19, 0.0 }
 0x15a   :  { %v717_v24 = vpop.f32.mrb[42].mxu0  ;;  %v967_v25 = vpop.f32.mrb[42].mxu1 }
 0x15b   :  { %1232 = vst.msk [vmem:[%s2803_s3 + $0xa0] sm:$0xff] %vm1211_vm1, %v1131_v22  ;;  %1282 = vst.msk [vmem:[%s2803_s3 + $0x230] sm:$0xff] %vm1211_vm1, %v1181_v23  ;;  %v718_v26 = vadd.f32 %v2298_v45, %v717_v24  ;;  %v968_v27 = vadd.f32 %v2298_v45, %v967_v25  ;;  %v719_v28 = vpop.f32.mrb[43].mxu0  ;;  %v969_v29 = vpop.f32.mrb[43].mxu1 }
 0x15d   :  { %v1132_v30 = vmax.f32 %v718_v26, 0.0  ;;  %v1182_v31 = vmax.f32 %v968_v27, 0.0 }
 0x15e   :  { %v722_v32 = vpop.f32.mrb[44].mxu0  ;;  %v972_v33 = vpop.f32.mrb[44].mxu1 }
 0x15f   :  { %1233 = vst.msk [vmem:[%s2803_s3 + $0xa8] sm:$0xff] %vm1211_vm1, %v1132_v30  ;;  %1283 = vst.msk [vmem:[%s2803_s3 + $0x238] sm:$0xff] %vm1211_vm1, %v1182_v31  ;;  %v723_v34 = vadd.f32 %v2298_v45, %v722_v32  ;;  %v973_v35 = vadd.f32 %v2298_v45, %v972_v33  ;;  %v724_v36 = vpop.f32.mrb[45].mxu0  ;;  %v974_v37 = vpop.f32.mrb[45].mxu1 }
 0x161   :  { %v1133_v38 = vmax.f32 %v723_v34, 0.0  ;;  %v1183_v39 = vmax.f32 %v973_v35, 0.0 }
 0x162   :  { %v727_v40 = vpop.f32.mrb[46].mxu0  ;;  %v977_v41 = vpop.f32.mrb[46].mxu1 }
 0x163   :  { %1234 = vst.msk [vmem:[%s2803_s3 + $0xb0] sm:$0xff] %vm1211_vm1, %v1133_v38  ;;  %1284 = vst.msk [vmem:[%s2803_s3 + $0x240] sm:$0xff] %vm1211_vm1, %v1183_v39  ;;  %v728_v42 = vadd.f32 %v2298_v45, %v727_v40  ;;  %v978_v43 = vadd.f32 %v2298_v45, %v977_v41  ;;  %v729_v44 = vpop.f32.mrb[47].mxu0  ;;  %v979_v46 = vpop.f32.mrb[47].mxu1 }
 0x165   :  { %v1134_v47 = vmax.f32 %v728_v42, 0.0  ;;  %v1184_v48 = vmax.f32 %v978_v43, 0.0 }
 0x166   :  { %v732_v49 = vpop.f32.mrb[48].mxu0  ;;  %v982_v50 = vpop.f32.mrb[48].mxu1 }
 0x167   :  { %1235 = vst.msk [vmem:[%s2803_s3 + $0xb8] sm:$0xff] %vm1211_vm1, %v1134_v47  ;;  %1285 = vst.msk [vmem:[%s2803_s3 + $0x248] sm:$0xff] %vm1211_vm1, %v1184_v48  ;;  %v733_v51 = vadd.f32 %v2298_v45, %v732_v49  ;;  %v983_v52 = vadd.f32 %v2298_v45, %v982_v50  ;;  %v734_v53 = vpop.f32.mrb[49].mxu0  ;;  %v984_v54 = vpop.f32.mrb[49].mxu1 }
 0x169   :  { %v1135_v55 = vmax.f32 %v733_v51, 0.0  ;;  %v1185_v56 = vmax.f32 %v983_v52, 0.0 }
 0x16a   :  { %v737_v57 = vpop.f32.mrb[50].mxu0  ;;  %v987_v58 = vpop.f32.mrb[50].mxu1 }
 0x16b   :  { %1236 = vst.msk [vmem:[%s2803_s3 + $0xc0] sm:$0xff] %vm1211_vm1, %v1135_v55  ;;  %1286 = vst.msk [vmem:[%s2803_s3 + $0x250] sm:$0xff] %vm1211_vm1, %v1185_v56  ;;  %v738_v59 = vadd.f32 %v2298_v45, %v737_v57  ;;  %v988_v60 = vadd.f32 %v2298_v45, %v987_v58  ;;  %v739_v61 = vpop.f32.mrb[51].mxu0  ;;  %v989_v62 = vpop.f32.mrb[51].mxu1 }
 0x16d   :  { %v1136_v63 = vmax.f32 %v738_v59, 0.0  ;;  %v1186_v0 = vmax.f32 %v988_v60, 0.0 }
 0x16e   :  { %v742_v1 = vpop.f32.mrb[52].mxu0  ;;  %v992_v2 = vpop.f32.mrb[52].mxu1 }
 0x16f   :  { %1237 = vst.msk [vmem:[%s2803_s3 + $0xc8] sm:$0xff] %vm1211_vm1, %v1136_v63  ;;  %1287 = vst.msk [vmem:[%s2803_s3 + $0x258] sm:$0xff] %vm1211_vm1, %v1186_v0  ;;  %v743_v3 = vadd.f32 %v2298_v45, %v742_v1  ;;  %v993_v4 = vadd.f32 %v2298_v45, %v992_v2  ;;  %v744_v5 = vpop.f32.mrb[53].mxu0  ;;  %v994_v6 = vpop.f32.mrb[53].mxu1 }
 0x171   :  { %v1137_v7 = vmax.f32 %v743_v3, 0.0  ;;  %v1187_v8 = vmax.f32 %v993_v4, 0.0 }
 0x172   :  { %v747_v9 = vpop.f32.mrb[54].mxu0  ;;  %v997_v10 = vpop.f32.mrb[54].mxu1 }
 0x173   :  { %1238 = vst.msk [vmem:[%s2803_s3 + $0xd0] sm:$0xff] %vm1211_vm1, %v1137_v7  ;;  %1288 = vst.msk [vmem:[%s2803_s3 + $0x260] sm:$0xff] %vm1211_vm1, %v1187_v8  ;;  %v748_v11 = vadd.f32 %v2298_v45, %v747_v9  ;;  %v998_v12 = vadd.f32 %v2298_v45, %v997_v10  ;;  %v749_v13 = vpop.f32.mrb[55].mxu0  ;;  %v999_v14 = vpop.f32.mrb[55].mxu1 }
 0x175   :  { %v1138_v15 = vmax.f32 %v748_v11, 0.0  ;;  %v1188_v16 = vmax.f32 %v998_v12, 0.0 }
 0x176   :  { %v752_v17 = vpop.f32.mrb[56].mxu0  ;;  %v1002_v18 = vpop.f32.mrb[56].mxu1 }
 0x177   :  { %1239 = vst.msk [vmem:[%s2803_s3 + $0xd8] sm:$0xff] %vm1211_vm1, %v1138_v15  ;;  %1289 = vst.msk [vmem:[%s2803_s3 + $0x268] sm:$0xff] %vm1211_vm1, %v1188_v16  ;;  %v753_v19 = vadd.f32 %v2298_v45, %v752_v17  ;;  %v1003_v20 = vadd.f32 %v2298_v45, %v1002_v18  ;;  %v754_v21 = vpop.f32.mrb[57].mxu0  ;;  %v1004_v22 = vpop.f32.mrb[57].mxu1 }
 0x179   :  { %v1139_v23 = vmax.f32 %v753_v19, 0.0  ;;  %v1189_v24 = vmax.f32 %v1003_v20, 0.0 }
 0x17a   :  { %v757_v25 = vpop.f32.mrb[58].mxu0  ;;  %v1007_v26 = vpop.f32.mrb[58].mxu1 }
 0x17b   :  { %1240 = vst.msk [vmem:[%s2803_s3 + $0xe0] sm:$0xff] %vm1211_vm1, %v1139_v23  ;;  %1290 = vst.msk [vmem:[%s2803_s3 + $0x270] sm:$0xff] %vm1211_vm1, %v1189_v24  ;;  %v758_v27 = vadd.f32 %v2298_v45, %v757_v25  ;;  %v1008_v28 = vadd.f32 %v2298_v45, %v1007_v26  ;;  %v759_v29 = vpop.f32.mrb[59].mxu0  ;;  %v1009_v30 = vpop.f32.mrb[59].mxu1 }
 0x17d   :  { %v1140_v31 = vmax.f32 %v758_v27, 0.0  ;;  %v1190_v32 = vmax.f32 %v1008_v28, 0.0 }
 0x17e   :  { %v762_v33 = vpop.f32.mrb[60].mxu0  ;;  %v1012_v34 = vpop.f32.mrb[60].mxu1 }
 0x17f   :  { %1241 = vst.msk [vmem:[%s2803_s3 + $0xe8] sm:$0xff] %vm1211_vm1, %v1140_v31  ;;  %1291 = vst.msk [vmem:[%s2803_s3 + $0x278] sm:$0xff] %vm1211_vm1, %v1190_v32  ;;  %v763_v35 = vadd.f32 %v2298_v45, %v762_v33  ;;  %v1013_v36 = vadd.f32 %v2298_v45, %v1012_v34  ;;  %v764_v37 = vpop.f32.mrb[61].mxu0  ;;  %v1014_v38 = vpop.f32.mrb[61].mxu1 }
 0x181   :  { %v1141_v39 = vmax.f32 %v763_v35, 0.0  ;;  %v1191_v40 = vmax.f32 %v1013_v36, 0.0 }
 0x182   :  { %v767_v41 = vpop.f32.mrb[62].mxu0  ;;  %v1017_v42 = vpop.f32.mrb[62].mxu1 }
 0x183   :  { %1242 = vst.msk [vmem:[%s2803_s3 + $0xf0] sm:$0xff] %vm1211_vm1, %v1141_v39  ;;  %1292 = vst.msk [vmem:[%s2803_s3 + $0x280] sm:$0xff] %vm1211_vm1, %v1191_v40  ;;  %v768_v43 = vadd.f32 %v2298_v45, %v767_v41  ;;  %v1018_v44 = vadd.f32 %v2298_v45, %v1017_v42  ;;  %v769_v46 = vpop.f32.mrb[63].mxu0  ;;  %v1019_v47 = vpop.f32.mrb[63].mxu1 }
 0x185   :  { %v1142_v48 = vmax.f32 %v768_v43, 0.0  ;;  %v1192_v49 = vmax.f32 %v1018_v44, 0.0 }
 0x186   :  { %v772_v50 = vpop.f32.mrb[64].mxu0  ;;  %v1022_v51 = vpop.f32.mrb[64].mxu1 }
 0x187   :  { %1243 = vst.msk [vmem:[%s2803_s3 + $0xf8] sm:$0xff] %vm1211_vm1, %v1142_v48  ;;  %1293 = vst.msk [vmem:[%s2803_s3 + $0x288] sm:$0xff] %vm1211_vm1, %v1192_v49  ;;  %v773_v52 = vadd.f32 %v2298_v45, %v772_v50  ;;  %v1023_v53 = vadd.f32 %v2298_v45, %v1022_v51  ;;  %v774_v54 = vpop.f32.mrb[65].mxu0  ;;  %v1024_v55 = vpop.f32.mrb[65].mxu1 }
 0x189   :  { %v1143_v56 = vmax.f32 %v773_v52, 0.0  ;;  %v1193_v57 = vmax.f32 %v1023_v53, 0.0 }
 0x18a   :  { %v777_v58 = vpop.f32.mrb[66].mxu0  ;;  %v1027_v59 = vpop.f32.mrb[66].mxu1 }
 0x18b   :  { %1244 = vst.msk [vmem:[%s2803_s3 + $0x100] sm:$0xff] %vm1211_vm1, %v1143_v56  ;;  %1294 = vst.msk [vmem:[%s2803_s3 + $0x290] sm:$0xff] %vm1211_vm1, %v1193_v57  ;;  %v778_v60 = vadd.f32 %v2298_v45, %v777_v58  ;;  %v1028_v61 = vadd.f32 %v2298_v45, %v1027_v59  ;;  %v779_v62 = vpop.f32.mrb[67].mxu0  ;;  %v1029_v63 = vpop.f32.mrb[67].mxu1 }
 0x18d   :  { %v1144_v0 = vmax.f32 %v778_v60, 0.0  ;;  %v1194_v1 = vmax.f32 %v1028_v61, 0.0 }
 0x18e   :  { %v782_v2 = vpop.f32.mrb[68].mxu0  ;;  %v1032_v3 = vpop.f32.mrb[68].mxu1 }
 0x18f   :  { %1245 = vst.msk [vmem:[%s2803_s3 + $0x108] sm:$0xff] %vm1211_vm1, %v1144_v0  ;;  %1295 = vst.msk [vmem:[%s2803_s3 + $0x298] sm:$0xff] %vm1211_vm1, %v1194_v1  ;;  %v783_v4 = vadd.f32 %v2298_v45, %v782_v2  ;;  %v1033_v5 = vadd.f32 %v2298_v45, %v1032_v3  ;;  %v784_v6 = vpop.f32.mrb[69].mxu0  ;;  %v1034_v7 = vpop.f32.mrb[69].mxu1 }
 0x191   :  { %v1145_v8 = vmax.f32 %v783_v4, 0.0  ;;  %v1195_v9 = vmax.f32 %v1033_v5, 0.0 }
 0x192   :  { %v787_v10 = vpop.f32.mrb[70].mxu0  ;;  %v1037_v11 = vpop.f32.mrb[70].mxu1 }
 0x193   :  { %1246 = vst.msk [vmem:[%s2803_s3 + $0x110] sm:$0xff] %vm1211_vm1, %v1145_v8  ;;  %1296 = vst.msk [vmem:[%s2803_s3 + $0x2a0] sm:$0xff] %vm1211_vm1, %v1195_v9  ;;  %v788_v12 = vadd.f32 %v2298_v45, %v787_v10  ;;  %v1038_v13 = vadd.f32 %v2298_v45, %v1037_v11  ;;  %v789_v14 = vpop.f32.mrb[71].mxu0  ;;  %v1039_v15 = vpop.f32.mrb[71].mxu1 }
 0x195   :  { %v1146_v16 = vmax.f32 %v788_v12, 0.0  ;;  %v1196_v17 = vmax.f32 %v1038_v13, 0.0 }
 0x196   :  { %v792_v18 = vpop.f32.mrb[72].mxu0  ;;  %v1042_v19 = vpop.f32.mrb[72].mxu1 }
 0x197   :  { %1247 = vst.msk [vmem:[%s2803_s3 + $0x118] sm:$0xff] %vm1211_vm1, %v1146_v16  ;;  %1297 = vst.msk [vmem:[%s2803_s3 + $0x2a8] sm:$0xff] %vm1211_vm1, %v1196_v17  ;;  %v793_v20 = vadd.f32 %v2298_v45, %v792_v18  ;;  %v1043_v21 = vadd.f32 %v2298_v45, %v1042_v19  ;;  %v794_v22 = vpop.f32.mrb[73].mxu0  ;;  %v1044_v23 = vpop.f32.mrb[73].mxu1 }
 0x199   :  { %v1147_v24 = vmax.f32 %v793_v20, 0.0  ;;  %v1197_v25 = vmax.f32 %v1043_v21, 0.0 }
 0x19a   :  { %v797_v26 = vpop.f32.mrb[74].mxu0  ;;  %v1047_v27 = vpop.f32.mrb[74].mxu1 }
 0x19b   :  { %1248 = vst.msk [vmem:[%s2803_s3 + $0x120] sm:$0xff] %vm1211_vm1, %v1147_v24  ;;  %1298 = vst.msk [vmem:[%s2803_s3 + $0x2b0] sm:$0xff] %vm1211_vm1, %v1197_v25  ;;  %v798_v28 = vadd.f32 %v2298_v45, %v797_v26  ;;  %v1048_v29 = vadd.f32 %v2298_v45, %v1047_v27  ;;  %v799_v30 = vpop.f32.mrb[75].mxu0  ;;  %v1049_v31 = vpop.f32.mrb[75].mxu1 }
 0x19d   :  { %v1148_v32 = vmax.f32 %v798_v28, 0.0  ;;  %v1198_v33 = vmax.f32 %v1048_v29, 0.0 }
 0x19e   :  { %v802_v34 = vpop.f32.mrb[76].mxu0  ;;  %v1052_v35 = vpop.f32.mrb[76].mxu1 }
 0x19f   :  { %1249 = vst.msk [vmem:[%s2803_s3 + $0x128] sm:$0xff] %vm1211_vm1, %v1148_v32  ;;  %1299 = vst.msk [vmem:[%s2803_s3 + $0x2b8] sm:$0xff] %vm1211_vm1, %v1198_v33  ;;  %v803_v36 = vadd.f32 %v2298_v45, %v802_v34  ;;  %v1053_v37 = vadd.f32 %v2298_v45, %v1052_v35  ;;  %v804_v38 = vpop.f32.mrb[77].mxu0  ;;  %v1054_v39 = vpop.f32.mrb[77].mxu1 }
 0x1a1   :  { %v1149_v40 = vmax.f32 %v803_v36, 0.0  ;;  %v1199_v41 = vmax.f32 %v1053_v37, 0.0 }
 0x1a2   :  { %v807_v42 = vpop.f32.mrb[78].mxu0  ;;  %v1057_v43 = vpop.f32.mrb[78].mxu1 }
 0x1a3   :  { %1250 = vst.msk [vmem:[%s2803_s3 + $0x130] sm:$0xff] %vm1211_vm1, %v1149_v40  ;;  %1300 = vst.msk [vmem:[%s2803_s3 + $0x2c0] sm:$0xff] %vm1211_vm1, %v1199_v41  ;;  %v808_v44 = vadd.f32 %v2298_v45, %v807_v42  ;;  %v1058_v46 = vadd.f32 %v2298_v45, %v1057_v43  ;;  %v809_v47 = vpop.f32.mrb[79].mxu0  ;;  %v1059_v48 = vpop.f32.mrb[79].mxu1 }
 0x1a5   :  { %v1150_v49 = vmax.f32 %v808_v44, 0.0  ;;  %v1200_v50 = vmax.f32 %v1058_v46, 0.0 }
 0x1a6   :  { %v812_v51 = vpop.f32.mrb[80].mxu0  ;;  %v1062_v52 = vpop.f32.mrb[80].mxu1 }
 0x1a7   :  { %1251 = vst.msk [vmem:[%s2803_s3 + $0x138] sm:$0xff] %vm1211_vm1, %v1150_v49  ;;  %1301 = vst.msk [vmem:[%s2803_s3 + $0x2c8] sm:$0xff] %vm1211_vm1, %v1200_v50  ;;  %v813_v53 = vadd.f32 %v2298_v45, %v812_v51  ;;  %v1063_v54 = vadd.f32 %v2298_v45, %v1062_v52  ;;  %v814_v55 = vpop.f32.mrb[81].mxu0  ;;  %v1064_v56 = vpop.f32.mrb[81].mxu1 }
 0x1a9   :  { %v1151_v57 = vmax.f32 %v813_v53, 0.0  ;;  %v1201_v58 = vmax.f32 %v1063_v54, 0.0 }
 0x1aa   :  { %v817_v59 = vpop.f32.mrb[82].mxu0  ;;  %v1067_v60 = vpop.f32.mrb[82].mxu1 }
 0x1ab   :  { %1252 = vst.msk [vmem:[%s2803_s3 + $0x140] sm:$0xff] %vm1211_vm1, %v1151_v57  ;;  %1302 = vst.msk [vmem:[%s2803_s3 + $0x2d0] sm:$0xff] %vm1211_vm1, %v1201_v58  ;;  %v818_v61 = vadd.f32 %v2298_v45, %v817_v59  ;;  %v1068_v62 = vadd.f32 %v2298_v45, %v1067_v60  ;;  %v819_v63 = vpop.f32.mrb[83].mxu0  ;;  %v1069_v0 = vpop.f32.mrb[83].mxu1 }
 0x1ad   :  { %v1152_v1 = vmax.f32 %v818_v61, 0.0  ;;  %v1202_v2 = vmax.f32 %v1068_v62, 0.0 }
 0x1ae   :  { %v822_v3 = vpop.f32.mrb[84].mxu0  ;;  %v1072_v4 = vpop.f32.mrb[84].mxu1 }
 0x1af   :  { %1253 = vst.msk [vmem:[%s2803_s3 + $0x148] sm:$0xff] %vm1211_vm1, %v1152_v1  ;;  %1303 = vst.msk [vmem:[%s2803_s3 + $0x2d8] sm:$0xff] %vm1211_vm1, %v1202_v2  ;;  %v823_v5 = vadd.f32 %v2298_v45, %v822_v3  ;;  %v1073_v6 = vadd.f32 %v2298_v45, %v1072_v4  ;;  %v824_v7 = vpop.f32.mrb[85].mxu0  ;;  %v1074_v8 = vpop.f32.mrb[85].mxu1 }
 0x1b1   :  { %v1153_v9 = vmax.f32 %v823_v5, 0.0  ;;  %v1203_v10 = vmax.f32 %v1073_v6, 0.0 }
 0x1b2   :  { %v827_v11 = vpop.f32.mrb[86].mxu0  ;;  %v1077_v12 = vpop.f32.mrb[86].mxu1 }
 0x1b3   :  { %1254 = vst.msk [vmem:[%s2803_s3 + $0x150] sm:$0xff] %vm1211_vm1, %v1153_v9  ;;  %1304 = vst.msk [vmem:[%s2803_s3 + $0x2e0] sm:$0xff] %vm1211_vm1, %v1203_v10  ;;  %v828_v13 = vadd.f32 %v2298_v45, %v827_v11  ;;  %v1078_v14 = vadd.f32 %v2298_v45, %v1077_v12  ;;  %v829_v15 = vpop.f32.mrb[87].mxu0  ;;  %v1079_v16 = vpop.f32.mrb[87].mxu1 }
 0x1b5   :  { %v1154_v17 = vmax.f32 %v828_v13, 0.0  ;;  %v1204_v18 = vmax.f32 %v1078_v14, 0.0 }
 0x1b6   :  { %v832_v19 = vpop.f32.mrb[88].mxu0  ;;  %v1082_v20 = vpop.f32.mrb[88].mxu1 }
 0x1b7   :  { %1255 = vst.msk [vmem:[%s2803_s3 + $0x158] sm:$0xff] %vm1211_vm1, %v1154_v17  ;;  %1305 = vst.msk [vmem:[%s2803_s3 + $0x2e8] sm:$0xff] %vm1211_vm1, %v1204_v18  ;;  %v833_v21 = vadd.f32 %v2298_v45, %v832_v19  ;;  %v1083_v22 = vadd.f32 %v2298_v45, %v1082_v20  ;;  %v834_v23 = vpop.f32.mrb[89].mxu0  ;;  %v1084_v24 = vpop.f32.mrb[89].mxu1 }
 0x1b9   :  { %v1155_v25 = vmax.f32 %v833_v21, 0.0  ;;  %v1205_v26 = vmax.f32 %v1083_v22, 0.0 }
 0x1ba   :  { %v837_v27 = vpop.f32.mrb[90].mxu0  ;;  %v1087_v28 = vpop.f32.mrb[90].mxu1 }
 0x1bb   :  { %1256 = vst.msk [vmem:[%s2803_s3 + $0x160] sm:$0xff] %vm1211_vm1, %v1155_v25  ;;  %1306 = vst.msk [vmem:[%s2803_s3 + $0x2f0] sm:$0xff] %vm1211_vm1, %v1205_v26  ;;  %v838_v29 = vadd.f32 %v2298_v45, %v837_v27  ;;  %v1088_v30 = vadd.f32 %v2298_v45, %v1087_v28  ;;  %v839_v31 = vpop.f32.mrb[91].mxu0  ;;  %v1089_v32 = vpop.f32.mrb[91].mxu1 }
 0x1bd   :  { %v1156_v33 = vmax.f32 %v838_v29, 0.0  ;;  %v1206_v34 = vmax.f32 %v1088_v30, 0.0 }
 0x1be   :  { %v842_v35 = vpop.f32.mrb[92].mxu0  ;;  %v1092_v36 = vpop.f32.mrb[92].mxu1 }
 0x1bf   :  { %1257 = vst.msk [vmem:[%s2803_s3 + $0x168] sm:$0xff] %vm1211_vm1, %v1156_v33  ;;  %1307 = vst.msk [vmem:[%s2803_s3 + $0x2f8] sm:$0xff] %vm1211_vm1, %v1206_v34  ;;  %v843_v37 = vadd.f32 %v2298_v45, %v842_v35  ;;  %v1093_v38 = vadd.f32 %v2298_v45, %v1092_v36  ;;  %v844_v39 = vpop.f32.mrb[93].mxu0  ;;  %v1094_v40 = vpop.f32.mrb[93].mxu1 }
 0x1c1   :  { %v1157_v41 = vmax.f32 %v843_v37, 0.0  ;;  %v1207_v42 = vmax.f32 %v1093_v38, 0.0 }
 0x1c2   :  { %v847_v43 = vpop.f32.mrb[94].mxu0  ;;  %v1097_v44 = vpop.f32.mrb[94].mxu1 }
 0x1c3   :  { %1258 = vst.msk [vmem:[%s2803_s3 + $0x170] sm:$0xff] %vm1211_vm1, %v1157_v41  ;;  %1308 = vst.msk [vmem:[%s2803_s3 + $0x300] sm:$0xff] %vm1211_vm1, %v1207_v42  ;;  %v848_v46 = vadd.f32 %v2298_v45, %v847_v43  ;;  %v1098_v47 = vadd.f32 %v2298_v45, %v1097_v44  ;;  %v849_v48 = vpop.f32.mrb[95].mxu0  ;;  %v1099_v49 = vpop.f32.mrb[95].mxu1 }
 0x1c5   :  { %v1158_v50 = vmax.f32 %v848_v46, 0.0  ;;  %v1208_v51 = vmax.f32 %v1098_v47, 0.0 }
 0x1c6   :  { %v852_v52 = vpop.f32.mrb[96].mxu0  ;;  %v1102_v53 = vpop.f32.mrb[96].mxu1 }
 0x1c7   :  { %1259 = vst.msk [vmem:[%s2803_s3 + $0x178] sm:$0xff] %vm1211_vm1, %v1158_v50  ;;  %1309 = vst.msk [vmem:[%s2803_s3 + $0x308] sm:$0xff] %vm1211_vm1, %v1208_v51  ;;  %v853_v54 = vadd.f32 %v2298_v45, %v852_v52  ;;  %v1103_v55 = vadd.f32 %v2298_v45, %v1102_v53  ;;  %v854_v56 = vpop.f32.mrb[97].mxu0  ;;  %v1104_v57 = vpop.f32.mrb[97].mxu1 }
 0x1c9   :  { %v1159_v58 = vmax.f32 %v853_v54, 0.0  ;;  %v1209_v59 = vmax.f32 %v1103_v55, 0.0 }
 0x1ca   :  { %v857_v60 = vpop.f32.mrb[98].mxu0  ;;  %v1107_v61 = vpop.f32.mrb[98].mxu1 }
 0x1cb   :  { %1260 = vst.msk [vmem:[%s2803_s3 + $0x180] sm:$0xff] %vm1211_vm1, %v1159_v58  ;;  %1310 = vst.msk [vmem:[%s2803_s3 + $0x310] sm:$0xff] %vm1211_vm1, %v1209_v59  ;;  %v858_v62 = vadd.f32 %v2298_v45, %v857_v60  ;;  %v1108_v63 = vadd.f32 %v2298_v45, %v1107_v61  ;;  %v859_v0 = vpop.f32.mrb[99].mxu0  ;;  %v1109_v1 = vpop.f32.mrb[99].mxu1 }
 0x1cd   :  { %v1160_v2 = vmax.f32 %v858_v62, 0.0  ;;  %v1210_v3 = vmax.f32 %v1108_v63, 0.0 }
 0x1cf   :  { %1261 = vst.msk [vmem:[%s2803_s3 + $0x188] sm:$0xff] %vm1211_vm1, %v1160_v2  ;;  %1311 = vst.msk [vmem:[%s2803_s3 + $0x318] sm:$0xff] %vm1211_vm1, %v1210_v3 }

// kernel: perception_forward.4
= control target key start
LH: loop header
LB: loop body
LE: loop exit
PB: predicated region body
PF: predicated region fallthrough
CT: control target
= control target key end

     0   :  { %v395_v0 = vmov 0.0|0.0   ;;  %vm286_vm0 = vcmask 261120   ;;  %vm307_vm1 = vcmask 254976   ;;  %s779_s1 = inlined_call_operand.vmem [shape: f32[256,32], index: 1, kind: input, shape index: {}]   ;;  %s780_s0 = inlined_call_operand.vmem [shape: f32[162,256], index: 0, kind: input, shape index: {}]   ;;  %s781_s2 = inlined_call_operand.vmem [shape: f32[1,32], index: 2, kind: input, shape index: {}]   ;;  %s782_s3 = inlined_call_operand.vmem [shape: f32[162,32], index: 3, kind: output, shape index: {}]  }
   0x1   :  { %314 = vmatprep.subr.bf16.mxu0 %v395_v0  ;;  %v56_v1 = vld [vmem:[%s779_s1] sm:$0xff]  ;;  %v57_v2 = vld [vmem:[%s779_s1 + $0x8] sm:$0xff]  ;;  %362 = vmatprep.subr.bf16.mxu1 %v395_v0  ;;  %v58_v3 = vld [vmem:[%s779_s1 + $0x10] sm:$0xff] }
   0x2   :  { %v315_v4 = vpack.c.bf16 %v57_v2, %v56_v1  ;;  %v59_v5 = vld [vmem:[%s779_s1 + $0x18] sm:$0xff]  ;;  %v60_v7 = vld [vmem:[%s779_s1 + $0x20] sm:$0xff]  ;;  %v61_v8 = vld [vmem:[%s779_s1 + $0x28] sm:$0xff] }
   0x3   :  { %v318_v6 = vpack.c.bf16 %v59_v5, %v58_v3  ;;  %v321_v9 = vpack.c.bf16 %v61_v8, %v60_v7  ;;  %v62_v10 = vld [vmem:[%s779_s1 + $0x30] sm:$0xff]  ;;  %v63_v11 = vld [vmem:[%s779_s1 + $0x38] sm:$0xff]  ;;  %v15_v12 = vld [vmem:[%s780_s0 + $0x8] sm:$0xff] }
   0x4   :  { %316 = vmatpush1.bf16.msra.mxu0 %v315_v4  ;;  %378 = vmatpush1.bf16.msra.mxu1 %v315_v4  ;;  %v324_v13 = vpack.c.bf16 %v63_v11, %v62_v10  ;;  %v37_v14 = vld [vmem:[%s780_s0 + $0xb8] sm:$0xff]  ;;  %v64_v15 = vld [vmem:[%s779_s1 + $0x40] sm:$0xff]  ;;  %v65_v16 = vld [vmem:[%s779_s1 + $0x48] sm:$0xff] }
   0x5   :  { %317 = vmatprep.subr.bf16.mxu0 %v395_v0  ;;  %363 = vmatprep.subr.bf16.mxu1 %v395_v0  ;;  %v327_v17 = vpack.c.bf16 %v65_v16, %v64_v15  ;;  %v66_v18 = vld [vmem:[%s779_s1 + $0x50] sm:$0xff]  ;;  %v67_v19 = vld [vmem:[%s779_s1 + $0x58] sm:$0xff]  ;;  %v68_v21 = vld [vmem:[%s779_s1 + $0x60] sm:$0xff] }
   0x6   :  { %159 = vmatprep.mubr.f32.mxu0 %v15_v12  ;;  %214 = vmatprep.mubr.f32.mxu1 %v37_v14  ;;  %v330_v20 = vpack.c.bf16 %v67_v19, %v66_v18  ;;  %v69_v22 = vld [vmem:[%s779_s1 + $0x68] sm:$0xff]  ;;  %v70_v24 = vld [vmem:[%s779_s1 + $0x70] sm:$0xff]  ;;  %v71_v25 = vld [vmem:[%s779_s1 + $0x78] sm:$0xff] }
   0x7   :  { %v333_v23 = vpack.c.bf16 %v69_v22, %v68_v21  ;;  %v336_v26 = vpack.c.bf16 %v71_v25, %v70_v24  ;;  %v72_v27 = vld [vmem:[%s779_s1 + $0x80] sm:$0xff]  ;;  %v73_v28 = vld [vmem:[%s779_s1 + $0x88] sm:$0xff]  ;;  %v74_v30 = vld [vmem:[%s779_s1 + $0x90] sm:$0xff] }
   0x8   :  { %319 = vmatpush1.bf16.msra.mxu0 %v318_v6  ;;  %379 = vmatpush1.bf16.msra.mxu1 %v318_v6  ;;  %v339_v29 = vpack.c.bf16 %v73_v28, %v72_v27  ;;  %v75_v31 = vld [vmem:[%s779_s1 + $0x98] sm:$0xff]  ;;  %v76_v33 = vld [vmem:[%s779_s1 + $0xa0] sm:$0xff]  ;;  %v77_v34 = vld [vmem:[%s779_s1 + $0xa8] sm:$0xff] }
   0x9   :  { %320 = vmatprep.subr.bf16.mxu0 %v395_v0  ;;  %364 = vmatprep.subr.bf16.mxu1 %v395_v0  ;;  %v342_v32 = vpack.c.bf16 %v75_v31, %v74_v30  ;;  %v345_v35 = vpack.c.bf16 %v77_v34, %v76_v33  ;;  %v78_v36 = vld [vmem:[%s779_s1 + $0xb0] sm:$0xff]  ;;  %v79_v37 = vld [vmem:[%s779_s1 + $0xb8] sm:$0xff]  ;;  %v80_v39 = vld [vmem:[%s779_s1 + $0xc0] sm:$0xff] }
   0xa   :  { %v348_v38 = vpack.c.bf16 %v79_v37, %v78_v36  ;;  %v81_v40 = vld [vmem:[%s779_s1 + $0xc8] sm:$0xff]  ;;  %v82_v42 = vld [vmem:[%s779_s1 + $0xd0] sm:$0xff]  ;;  %v83_v43 = vld [vmem:[%s779_s1 + $0xd8] sm:$0xff] }
   0xb   :  { %v351_v41 = vpack.c.bf16 %v81_v40, %v80_v39  ;;  %v354_v44 = vpack.c.bf16 %v83_v43, %v82_v42  ;;  %v84_v45 = vld [vmem:[%s779_s1 + $0xe0] sm:$0xff]  ;;  %v85_v46 = vld [vmem:[%s779_s1 + $0xe8] sm:$0xff]  ;;  %v86_v48 = vld [vmem:[%s779_s1 + $0xf0] sm:$0xff] }
   0xc   :  { %322 = vmatpush1.bf16.msra.mxu0 %v321_v9  ;;  %380 = vmatpush1.bf16.msra.mxu1 %v321_v9  ;;  %v357_v47 = vpack.c.bf16 %v85_v46, %v84_v45  ;;  %v87_v49 = vld [vmem:[%s779_s1 + $0xf8] sm:$0xff]  ;;  %v14_v51 = vld [vmem:[%s780_s0] sm:$0xff]  ;;  %v36_v52 = vld [vmem:[%s780_s0 + $0xb0] sm:$0xff] }
   0xd   :  { %323 = vmatprep.subr.bf16.mxu0 %v395_v0  ;;  %365 = vmatprep.subr.bf16.mxu1 %v395_v0  ;;  %v360_v50 = vpack.c.bf16 %v87_v49, %v86_v48  ;;  %v17_v53 = vld [vmem:[%s780_s0 + $0x18] sm:$0xff]  ;;  %v39_v54 = vld [vmem:[%s780_s0 + $0xc8] sm:$0xff]  ;;  %v16_v55 = vld [vmem:[%s780_s0 + $0x10] sm:$0xff] }
   0xe   :  { %v38_v56 = vld [vmem:[%s780_s0 + $0xc0] sm:$0xff]  ;;  %v19_v57 = vld [vmem:[%s780_s0 + $0x28] sm:$0xff]  ;;  %v41_v58 = vld [vmem:[%s780_s0 + $0xd8] sm:$0xff] }
   0xf   :  { %v18_v59 = vld [vmem:[%s780_s0 + $0x20] sm:$0xff]  ;;  %v40_v60 = vld [vmem:[%s780_s0 + $0xd0] sm:$0xff]  ;;  %v21_v61 = vld [vmem:[%s780_s0 + $0x38] sm:$0xff] }
  0x10   :  { %325 = vmatpush1.bf16.msra.mxu0 %v324_v13  ;;  %381 = vmatpush1.bf16.msra.mxu1 %v324_v13  ;;  %v43_v62 = vld [vmem:[%s780_s0 + $0xe8] sm:$0xff]  ;;  %v20_v63 = vld [vmem:[%s780_s0 + $0x30] sm:$0xff]  ;;  %v45_v2 = vld [vmem:[%s780_s0 + $0xf8] sm:$0xff] }
  0x11   :  { %326 = vmatprep.subr.bf16.mxu0 %v395_v0  ;;  %366 = vmatprep.subr.bf16.mxu1 %v395_v0  ;;  %v23_v1 = vld [vmem:[%s780_s0 + $0x48] sm:$0xff]  ;;  %v22_v3 = vld [vmem:[%s780_s0 + $0x40] sm:$0xff]  ;;  %v44_v4 = vld [vmem:[%s780_s0 + $0xf0] sm:$0xff] }
  0x12   :  { %v25_v5 = vld [vmem:[%s780_s0 + $0x58] sm:$0xff]  ;;  %v47_v6 = vld [vmem:[%s780_s0 + $0x108] sm:$0xff]  ;;  %v24_v7 = vld [vmem:[%s780_s0 + $0x50] sm:$0xff] }
  0x13   :  { %v46_v8 = vld [vmem:[%s780_s0 + $0x100] sm:$0xff]  ;;  %v27_v9 = vld [vmem:[%s780_s0 + $0x68] sm:$0xff]  ;;  %v49_v10 = vld [vmem:[%s780_s0 + $0x118] sm:$0xff] }
  0x14   :  { %328 = vmatpush1.bf16.msra.mxu0 %v327_v17  ;;  %382 = vmatpush1.bf16.msra.mxu1 %v327_v17  ;;  %v26_v11 = vld [vmem:[%s780_s0 + $0x60] sm:$0xff]  ;;  %v48_v12 = vld [vmem:[%s780_s0 + $0x110] sm:$0xff]  ;;  %v29_v13 = vld [vmem:[%s780_s0 + $0x78] sm:$0xff] }
  0x15   :  { %329 = vmatprep.subr.bf16.mxu0 %v395_v0  ;;  %367 = vmatprep.subr.bf16.mxu1 %v395_v0  ;;  %v51_v14 = vld [vmem:[%s780_s0 + $0x128] sm:$0xff]  ;;  %v28_v15 = vld [vmem:[%s780_s0 + $0x70] sm:$0xff]  ;;  %v50_v16 = vld [vmem:[%s780_s0 + $0x120] sm:$0xff] }
  0x16   :  { %v31_v17 = vld [vmem:[%s780_s0 + $0x88] sm:$0xff]  ;;  %v53_v18 = vld [vmem:[%s780_s0 + $0x138] sm:$0xff]  ;;  %v30_v19 = vld [vmem:[%s780_s0 + $0x80] sm:$0xff] }
  0x17   :  { %v33_v21 = vld [vmem:[%s780_s0 + $0x98] sm:$0xff]  ;;  %v55_v22 = vld [vmem:[%s780_s0 + $0x148] sm:$0x3]  ;;  %v54_v24 = vld [vmem:[%s780_s0 + $0x140] sm:$0x3] }
  0x18   :  { %331 = vmatpush1.bf16.msra.mxu0 %v330_v20  ;;  %383 = vmatpush1.bf16.msra.mxu1 %v330_v20  ;;  %v52_v20 = vld [vmem:[%s780_s0 + $0x130] sm:$0xff]  ;;  %v35_v25 = vld [vmem:[%s780_s0 + $0xa8] sm:$0xff]  ;;  %v673_v27 = vld [vmem:[%s781_s2] ss:$0 sm:$0xff] }
  0x19   :  { %332 = vmatprep.subr.bf16.mxu0 %v395_v0  ;;  %368 = vmatprep.subr.bf16.mxu1 %v395_v0 }
  0x1c   :  { %334 = vmatpush1.bf16.msra.mxu0 %v333_v23  ;;  %384 = vmatpush1.bf16.msra.mxu1 %v333_v23  ;;  %v32_v23 = vld [vmem:[%s780_s0 + $0x90] sm:$0xff] }
  0x1d   :  { %335 = vmatprep.subr.bf16.mxu0 %v395_v0  ;;  %369 = vmatprep.subr.bf16.mxu1 %v395_v0 }
  0x20   :  { %337 = vmatpush1.bf16.msra.mxu0 %v336_v26  ;;  %385 = vmatpush1.bf16.msra.mxu1 %v336_v26  ;;  %v34_v26 = vld [vmem:[%s780_s0 + $0xa0] sm:$0xff] }
  0x21   :  { %338 = vmatprep.subr.bf16.mxu0 %v395_v0  ;;  %370 = vmatprep.subr.bf16.mxu1 %v395_v0 }
  0x24   :  { %340 = vmatpush1.bf16.msra.mxu0 %v339_v29  ;;  %386 = vmatpush1.bf16.msra.mxu1 %v339_v29 }
  0x25   :  { %341 = vmatprep.subr.bf16.mxu0 %v395_v0  ;;  %371 = vmatprep.subr.bf16.mxu1 %v395_v0 }
  0x28   :  { %343 = vmatpush1.bf16.msra.mxu0 %v342_v32  ;;  %387 = vmatpush1.bf16.msra.mxu1 %v342_v32 }
  0x29   :  { %344 = vmatprep.subr.bf16.mxu0 %v395_v0  ;;  %372 = vmatprep.subr.bf16.mxu1 %v395_v0 }
  0x2c   :  { %346 = vmatpush1.bf16.msra.mxu0 %v345_v35  ;;  %388 = vmatpush1.bf16.msra.mxu1 %v345_v35 }
  0x2d   :  { %347 = vmatprep.subr.bf16.mxu0 %v395_v0  ;;  %373 = vmatprep.subr.bf16.mxu1 %v395_v0 }
  0x30   :  { %349 = vmatpush1.bf16.msra.mxu0 %v348_v38  ;;  %389 = vmatpush1.bf16.msra.mxu1 %v348_v38 }
  0x31   :  { %350 = vmatprep.subr.bf16.mxu0 %v395_v0  ;;  %374 = vmatprep.subr.bf16.mxu1 %v395_v0 }
  0x34   :  { %352 = vmatpush1.bf16.msra.mxu0 %v351_v41  ;;  %390 = vmatpush1.bf16.msra.mxu1 %v351_v41 }
  0x35   :  { %353 = vmatprep.subr.bf16.mxu0 %v395_v0  ;;  %375 = vmatprep.subr.bf16.mxu1 %v395_v0 }
  0x38   :  { %355 = vmatpush1.bf16.msra.mxu0 %v354_v44  ;;  %391 = vmatpush1.bf16.msra.mxu1 %v354_v44 }
  0x39   :  { %356 = vmatprep.subr.bf16.mxu0 %v395_v0  ;;  %376 = vmatprep.subr.bf16.mxu1 %v395_v0 }
  0x3c   :  { %358 = vmatpush1.bf16.msra.mxu0 %v357_v47  ;;  %392 = vmatpush1.bf16.msra.mxu1 %v357_v47 }
  0x3d   :  { %359 = vmatprep.subr.bf16.mxu0 %v395_v0  ;;  %377 = vmatprep.subr.bf16.mxu1 %v395_v0  ;;  %v42_v0 = vld [vmem:[%s780_s0 + $0xe0] sm:$0xff] }
  0x40   :  { %361 = vmatpush1.bf16.msra.mxu0 %v360_v50  ;;  %393 = vmatpush1.bf16.msra.mxu1 %v360_v50 }
  0x43   :  { %160 = vmatmul.mubr.f32.vlgmr.msra.gmra.mrb[0].mxu0 %v14_v51  ;;  %215 = vmatmul.mubr.f32.vlgmr.msra.gmra.mrb[0].mxu1 %v36_v52 }
  0x44   :  { %164 = vmatprep.mubr.f32.mxu0 %v17_v53  ;;  %219 = vmatprep.mubr.f32.mxu1 %v39_v54 }
  0x47   :  { %165 = vmatmul.mubr.f32.gmra.mrb[2].mxu0 %v16_v55  ;;  %220 = vmatmul.mubr.f32.gmra.mrb[2].mxu1 %v38_v56 }
  0x48   :  { %169 = vmatprep.mubr.f32.mxu0 %v19_v57  ;;  %224 = vmatprep.mubr.f32.mxu1 %v41_v58 }
  0x4b   :  { %170 = vmatmul.mubr.f32.gmra.mrb[4].mxu0 %v18_v59  ;;  %225 = vmatmul.mubr.f32.gmra.mrb[4].mxu1 %v40_v60 }
  0x4c   :  { %174 = vmatprep.mubr.f32.mxu0 %v21_v61  ;;  %229 = vmatprep.mubr.f32.mxu1 %v43_v62 }
  0x4f   :  { %175 = vmatmul.mubr.f32.gmra.mrb[6].mxu0 %v20_v63  ;;  %230 = vmatmul.mubr.f32.gmra.mrb[6].mxu1 %v42_v0 }
  0x50   :  { %179 = vmatprep.mubr.f32.mxu0 %v23_v1  ;;  %234 = vmatprep.mubr.f32.mxu1 %v45_v2 }
  0x53   :  { %180 = vmatmul.mubr.f32.gmra.mrb[8].mxu0 %v22_v3  ;;  %235 = vmatmul.mubr.f32.gmra.mrb[8].mxu1 %v44_v4 }
  0x54   :  { %184 = vmatprep.mubr.f32.mxu0 %v25_v5  ;;  %239 = vmatprep.mubr.f32.mxu1 %v47_v6 }
  0x57   :  { %185 = vmatmul.mubr.f32.gmra.mrb[10].mxu0 %v24_v7  ;;  %240 = vmatmul.mubr.f32.gmra.mrb[10].mxu1 %v46_v8 }
  0x58   :  { %189 = vmatprep.mubr.f32.mxu0 %v27_v9  ;;  %244 = vmatprep.mubr.f32.mxu1 %v49_v10 }
  0x5b   :  { %190 = vmatmul.mubr.f32.gmra.mrb[12].mxu0 %v26_v11  ;;  %245 = vmatmul.mubr.f32.gmra.mrb[12].mxu1 %v48_v12 }
  0x5c   :  { %194 = vmatprep.mubr.f32.mxu0 %v29_v13  ;;  %249 = vmatprep.mubr.f32.mxu1 %v51_v14 }
  0x5f   :  { %195 = vmatmul.mubr.f32.gmra.mrb[14].mxu0 %v28_v15  ;;  %250 = vmatmul.mubr.f32.gmra.mrb[14].mxu1 %v50_v16 }
  0x60   :  { %199 = vmatprep.mubr.f32.mxu0 %v31_v17  ;;  %254 = vmatprep.mubr.f32.mxu1 %v53_v18 }
  0x63   :  { %200 = vmatmul.mubr.f32.gmra.mrb[16].mxu0 %v30_v19  ;;  %255 = vmatmul.mubr.f32.gmra.mrb[16].mxu1 %v52_v20 }
  0x64   :  { %204 = vmatprep.mubr.f32.mxu0 %v33_v21  ;;  %259 = vmatprep.mubr.f32.mxu1 %v55_v22 }
  0x67   :  { %205 = vmatmul.mubr.f32.gmra.mrb[18].mxu0 %v32_v23  ;;  %260 = vmatmul.mubr.f32.gmra.mrb[18].mxu1 %v54_v24 }
  0x68   :  { %209 = vmatprep.mubr.f32.mxu0 %v35_v25 }
  0x6b   :  { %210 = vmatmul.mubr.f32.gmra.mrb[20].mxu0 %v34_v26 }
 0x116   :  { %v161_v28 = vpop.f32.mrb[0].mxu0  ;;  %v216_v29 = vpop.f32.mrb[0].mxu1 }
 0x117   :  { %v162_v30 = vadd.f32 %v673_v27, %v161_v28  ;;  %v163_v31 = vpop.f32.mrb[1].mxu0  ;;  %v217_v32 = vadd.f32 %v673_v27, %v216_v29  ;;  %v218_v33 = vpop.f32.mrb[1].mxu1 }
 0x119   :  { %v265_v34 = vmax.f32 %v162_v30, 0.0  ;;  %v276_v35 = vmax.f32 %v217_v32, 0.0 }
 0x11a   :  { %v166_v36 = vpop.f32.mrb[2].mxu0  ;;  %v221_v37 = vpop.f32.mrb[2].mxu1 }
 0x11b   :  { %287 = vst.msk [vmem:[%s782_s3] sm:$0xff] %vm286_vm0, %v265_v34  ;;  %298 = vst.msk [vmem:[%s782_s3 + $0x58] sm:$0xff] %vm286_vm0, %v276_v35  ;;  %v167_v38 = vadd.f32 %v673_v27, %v166_v36  ;;  %v168_v39 = vpop.f32.mrb[3].mxu0  ;;  %v222_v40 = vadd.f32 %v673_v27, %v221_v37  ;;  %v223_v41 = vpop.f32.mrb[3].mxu1 }
 0x11d   :  { %v266_v42 = vmax.f32 %v167_v38, 0.0  ;;  %v277_v43 = vmax.f32 %v222_v40, 0.0 }
 0x11e   :  { %v171_v44 = vpop.f32.mrb[4].mxu0  ;;  %v226_v45 = vpop.f32.mrb[4].mxu1 }
 0x11f   :  { %288 = vst.msk [vmem:[%s782_s3 + $0x8] sm:$0xff] %vm286_vm0, %v266_v42  ;;  %299 = vst.msk [vmem:[%s782_s3 + $0x60] sm:$0xff] %vm286_vm0, %v277_v43  ;;  %v172_v46 = vadd.f32 %v673_v27, %v171_v44  ;;  %v173_v47 = vpop.f32.mrb[5].mxu0  ;;  %v227_v48 = vadd.f32 %v673_v27, %v226_v45  ;;  %v228_v49 = vpop.f32.mrb[5].mxu1 }
 0x121   :  { %v267_v50 = vmax.f32 %v172_v46, 0.0  ;;  %v278_v51 = vmax.f32 %v227_v48, 0.0 }
 0x122   :  { %v176_v52 = vpop.f32.mrb[6].mxu0  ;;  %v231_v53 = vpop.f32.mrb[6].mxu1 }
 0x123   :  { %289 = vst.msk [vmem:[%s782_s3 + $0x10] sm:$0xff] %vm286_vm0, %v267_v50  ;;  %300 = vst.msk [vmem:[%s782_s3 + $0x68] sm:$0xff] %vm286_vm0, %v278_v51  ;;  %v177_v54 = vadd.f32 %v673_v27, %v176_v52  ;;  %v178_v55 = vpop.f32.mrb[7].mxu0  ;;  %v232_v56 = vadd.f32 %v673_v27, %v231_v53  ;;  %v233_v57 = vpop.f32.mrb[7].mxu1 }
 0x125   :  { %v268_v58 = vmax.f32 %v177_v54, 0.0  ;;  %v279_v59 = vmax.f32 %v232_v56, 0.0 }
 0x126   :  { %v181_v60 = vpop.f32.mrb[8].mxu0  ;;  %v236_v61 = vpop.f32.mrb[8].mxu1 }
 0x127   :  { %290 = vst.msk [vmem:[%s782_s3 + $0x18] sm:$0xff] %vm286_vm0, %v268_v58  ;;  %301 = vst.msk [vmem:[%s782_s3 + $0x70] sm:$0xff] %vm286_vm0, %v279_v59  ;;  %v182_v62 = vadd.f32 %v673_v27, %v181_v60  ;;  %v183_v63 = vpop.f32.mrb[9].mxu0  ;;  %v237_v0 = vadd.f32 %v673_v27, %v236_v61  ;;  %v238_v1 = vpop.f32.mrb[9].mxu1 }
 0x129   :  { %v269_v2 = vmax.f32 %v182_v62, 0.0  ;;  %v280_v3 = vmax.f32 %v237_v0, 0.0 }
 0x12a   :  { %v186_v4 = vpop.f32.mrb[10].mxu0  ;;  %v241_v5 = vpop.f32.mrb[10].mxu1 }
 0x12b   :  { %291 = vst.msk [vmem:[%s782_s3 + $0x20] sm:$0xff] %vm286_vm0, %v269_v2  ;;  %302 = vst.msk [vmem:[%s782_s3 + $0x78] sm:$0xff] %vm286_vm0, %v280_v3  ;;  %v187_v6 = vadd.f32 %v673_v27, %v186_v4  ;;  %v188_v7 = vpop.f32.mrb[11].mxu0  ;;  %v242_v8 = vadd.f32 %v673_v27, %v241_v5  ;;  %v243_v9 = vpop.f32.mrb[11].mxu1 }
 0x12d   :  { %v270_v10 = vmax.f32 %v187_v6, 0.0  ;;  %v281_v11 = vmax.f32 %v242_v8, 0.0 }
 0x12e   :  { %v191_v12 = vpop.f32.mrb[12].mxu0  ;;  %v246_v13 = vpop.f32.mrb[12].mxu1 }
 0x12f   :  { %292 = vst.msk [vmem:[%s782_s3 + $0x28] sm:$0xff] %vm286_vm0, %v270_v10  ;;  %303 = vst.msk [vmem:[%s782_s3 + $0x80] sm:$0xff] %vm286_vm0, %v281_v11  ;;  %v192_v14 = vadd.f32 %v673_v27, %v191_v12  ;;  %v193_v15 = vpop.f32.mrb[13].mxu0  ;;  %v247_v16 = vadd.f32 %v673_v27, %v246_v13  ;;  %v248_v17 = vpop.f32.mrb[13].mxu1 }
 0x131   :  { %v271_v18 = vmax.f32 %v192_v14, 0.0  ;;  %v282_v19 = vmax.f32 %v247_v16, 0.0 }
 0x132   :  { %v196_v20 = vpop.f32.mrb[14].mxu0  ;;  %v251_v21 = vpop.f32.mrb[14].mxu1 }
 0x133   :  { %293 = vst.msk [vmem:[%s782_s3 + $0x30] sm:$0xff] %vm286_vm0, %v271_v18  ;;  %304 = vst.msk [vmem:[%s782_s3 + $0x88] sm:$0xff] %vm286_vm0, %v282_v19  ;;  %v197_v22 = vadd.f32 %v673_v27, %v196_v20  ;;  %v198_v23 = vpop.f32.mrb[15].mxu0  ;;  %v252_v24 = vadd.f32 %v673_v27, %v251_v21  ;;  %v253_v25 = vpop.f32.mrb[15].mxu1 }
 0x135   :  { %v272_v26 = vmax.f32 %v197_v22, 0.0  ;;  %v283_v28 = vmax.f32 %v252_v24, 0.0 }
 0x136   :  { %v201_v29 = vpop.f32.mrb[16].mxu0  ;;  %v256_v30 = vpop.f32.mrb[16].mxu1 }
 0x137   :  { %294 = vst.msk [vmem:[%s782_s3 + $0x38] sm:$0xff] %vm286_vm0, %v272_v26  ;;  %305 = vst.msk [vmem:[%s782_s3 + $0x90] sm:$0xff] %vm286_vm0, %v283_v28  ;;  %v202_v31 = vadd.f32 %v673_v27, %v201_v29  ;;  %v203_v32 = vpop.f32.mrb[17].mxu0  ;;  %v257_v33 = vadd.f32 %v673_v27, %v256_v30  ;;  %v258_v34 = vpop.f32.mrb[17].mxu1 }
 0x139   :  { %v273_v35 = vmax.f32 %v202_v31, 0.0  ;;  %v284_v36 = vmax.f32 %v257_v33, 0.0 }
 0x13a   :  { %v206_v37 = vpop.f32.mrb[18].mxu0  ;;  %v261_v38 = vpop.f32.mrb[18].mxu1 }
 0x13b   :  { %295 = vst.msk [vmem:[%s782_s3 + $0x40] sm:$0xff] %vm286_vm0, %v273_v35  ;;  %306 = vst.msk [vmem:[%s782_s3 + $0x98] sm:$0xff] %vm286_vm0, %v284_v36  ;;  %v207_v39 = vadd.f32 %v673_v27, %v206_v37  ;;  %v208_v40 = vpop.f32.mrb[19].mxu0  ;;  %v262_v41 = vadd.f32 %v673_v27, %v261_v38  ;;  %v263_v42 = vpop.f32.mrb[19].mxu1 }
 0x13d   :  { %v274_v43 = vmax.f32 %v207_v39, 0.0  ;;  %v285_v44 = vmax.f32 %v262_v41, 0.0 }
 0x13e   :  { %v211_v45 = vpop.f32.mrb[20].mxu0 }
 0x13f   :  { %296 = vst.msk [vmem:[%s782_s3 + $0x48] sm:$0xff] %vm286_vm0, %v274_v43  ;;  %v212_v46 = vadd.f32 %v673_v27, %v211_v45  ;;  %v213_v47 = vpop.f32.mrb[21].mxu0 }
 0x140   :  { %308 = vst.msk [vmem:[%s782_s3 + $0xa0] sm:$0x3] %vm307_vm1, %v285_v44 }
 0x141   :  { %v275_v48 = vmax.f32 %v212_v46, 0.0 }
 0x143   :  { %297 = vst.msk [vmem:[%s782_s3 + $0x50] sm:$0xff] %vm286_vm0, %v275_v48 }

// kernel: perception_forward.5
= control target key start
LH: loop header
LB: loop body
LE: loop exit
PB: predicated region body
PF: predicated region fallthrough
CT: control target
= control target key end

     0   :  { %v1989_v43 = vmov 1983009808   ;;  %v362_v45 = vlaneseq  ;;  %s3071_s0 = inlined_call_operand.vmem [shape: f32[2,2592], index: 0, kind: input, shape index: {}]   ;;  %s3072_s1 = inlined_call_operand.vmem [shape: f32[2592,32], index: 1, kind: input, shape index: {}]   ;;  %s3073_s2 = inlined_call_operand.vmem [shape: f32[1,32], index: 2, kind: input, shape index: {}]   ;;  %s3074_s3 = inlined_call_operand.hbm [shape: f32[2,32], index: 3, kind: output, shape index: {}]  }
   0x1   :  { %v37_v0 = vld [vmem:[%s3072_s1 + $0x80] sm:$0xff]  ;;  %v38_v1 = vld [vmem:[%s3072_s1 + $0x88] sm:$0xff]  ;;  %v39_v11 = vld [vmem:[%s3072_s1 + $0x90] sm:$0xff]  ;;  %v360_v44 = vunpack.c.l.s4 %v1989_v43 }
   0x2   :  { %v21_v2 = vld [vmem:[%s3072_s1] sm:$0xff]  ;;  %v1629_v3 = vpack.c.bf16 %v38_v1, %v37_v0  ;;  %v22_v4 = vld [vmem:[%s3072_s1 + $0x8] sm:$0xff]  ;;  %v40_v13 = vld [vmem:[%s3072_s1 + $0x98] sm:$0xff]  ;;  %v363_v60 = vshrl.u32 %v362_v45, 7 }
   0x3   :  { %v69_v5 = vld [vmem:[%s3072_s1 + $0x180] sm:$0xff]  ;;  %v70_v6 = vld [vmem:[%s3072_s1 + $0x188] sm:$0xff]  ;;  %v1631_v7 = vpack.c.bf16 %v22_v4, %v21_v2  ;;  %v23_v14 = vld [vmem:[%s3072_s1 + $0x10] sm:$0xff]  ;;  %v1633_v16 = vpack.c.bf16 %v40_v13, %v39_v11  ;;  %v361_v59 = vunpack.c.0.s8 %v360_v44 }
   0x4   :  { %v1661_v8 = vpack.c.bf16 %v70_v6, %v69_v5  ;;  %v53_v9 = vld [vmem:[%s3072_s1 + $0x100] sm:$0xff]  ;;  %v54_v10 = vld [vmem:[%s3072_s1 + $0x108] sm:$0xff]  ;;  %1630 = vmatprep.subr.bf16.mxu0 %v1629_v3  ;;  %v24_v15 = vld [vmem:[%s3072_s1 + $0x18] sm:$0xff] }
   0x5   :  { %v1663_v12 = vpack.c.bf16 %v54_v10, %v53_v9  ;;  %1632 = vmatpush3.bf16.msra.mxu0 %v1631_v7  ;;  %v1635_v17 = vpack.c.bf16 %v24_v15, %v23_v14  ;;  %v71_v18 = vld [vmem:[%s3072_s1 + $0x190] sm:$0xff]  ;;  %v72_v19 = vld [vmem:[%s3072_s1 + $0x198] sm:$0xff]  ;;  %v41_v23 = vld [vmem:[%s3072_s1 + $0xa0] sm:$0xff]  ;;  %v2158_v10 = vsub.s32 %v361_v59, %v363_v60 }
   0x6   :  { %1662 = vmatprep.subr.bf16.mxu1 %v1661_v8  ;;  %v55_v20 = vld [vmem:[%s3072_s1 + $0x110] sm:$0xff]  ;;  %v1665_v21 = vpack.c.bf16 %v72_v19, %v71_v18  ;;  %v56_v22 = vld [vmem:[%s3072_s1 + $0x118] sm:$0xff]  ;;  %v42_v24 = vld [vmem:[%s3072_s1 + $0xa8] sm:$0xff]  ;;  %1634 = vmatprep.subr.bf16.mxu0 %v1633_v16 }
   0x7   :  { %1664 = vmatpush3.bf16.msra.mxu1 %v1663_v12  ;;  %v1667_v25 = vpack.c.bf16 %v56_v22, %v55_v20  ;;  %v1637_v26 = vpack.c.bf16 %v42_v24, %v41_v23  ;;  %v25_v27 = vld [vmem:[%s3072_s1 + $0x20] sm:$0xff]  ;;  %v26_v28 = vld [vmem:[%s3072_s1 + $0x28] sm:$0xff]  ;;  %v43_v35 = vld [vmem:[%s3072_s1 + $0xb0] sm:$0xff] }
   0x8   :  { %v73_v29 = vld [vmem:[%s3072_s1 + $0x1a0] sm:$0xff]  ;;  %1666 = vmatprep.subr.bf16.mxu1 %v1665_v21  ;;  %v74_v30 = vld [vmem:[%s3072_s1 + $0x1a8] sm:$0xff]  ;;  %v1639_v33 = vpack.c.bf16 %v26_v28, %v25_v27  ;;  %v44_v36 = vld [vmem:[%s3072_s1 + $0xb8] sm:$0xff] }
   0x9   :  { %v57_v31 = vld [vmem:[%s3072_s1 + $0x120] sm:$0xff]  ;;  %v58_v32 = vld [vmem:[%s3072_s1 + $0x128] sm:$0xff]  ;;  %1636 = vmatpush3.bf16.msra.mxu0 %v1635_v17  ;;  %v1669_v34 = vpack.c.bf16 %v74_v30, %v73_v29  ;;  %v27_v37 = vld [vmem:[%s3072_s1 + $0x30] sm:$0xff]  ;;  %v1641_v39 = vpack.c.bf16 %v44_v36, %v43_v35 }
   0xa   :  { %1638 = vmatprep.subr.bf16.mxu0 %v1637_v26  ;;  %v1671_v38 = vpack.c.bf16 %v58_v32, %v57_v31  ;;  %v28_v40 = vld [vmem:[%s3072_s1 + $0x38] sm:$0xff]  ;;  %v75_v41 = vld [vmem:[%s3072_s1 + $0x1b0] sm:$0xff]  ;;  %v45_v49 = vld [vmem:[%s3072_s1 + $0xc0] sm:$0xff] }
   0xb   :  { %1668 = vmatpush3.bf16.msra.mxu1 %v1667_v25  ;;  %v76_v42 = vld [vmem:[%s3072_s1 + $0x1b8] sm:$0xff]  ;;  %v59_v47 = vld [vmem:[%s3072_s1 + $0x130] sm:$0xff]  ;;  %v46_v50 = vld [vmem:[%s3072_s1 + $0xc8] sm:$0xff]  ;;  %v1643_v51 = vpack.c.bf16 %v28_v40, %v27_v37 }
   0xc   :  { %1670 = vmatprep.subr.bf16.mxu1 %v1669_v34  ;;  %v1673_v46 = vpack.c.bf16 %v76_v42, %v75_v41  ;;  %v60_v48 = vld [vmem:[%s3072_s1 + $0x138] sm:$0xff]  ;;  %v77_v52 = vld [vmem:[%s3072_s1 + $0x1c0] sm:$0xff]  ;;  %v78_v53 = vld [vmem:[%s3072_s1 + $0x1c8] sm:$0xff]  ;;  %v1645_v55 = vpack.c.bf16 %v46_v50, %v45_v49 }
   0xd   :  { %1640 = vmatpush3.bf16.msra.mxu0 %v1639_v33  ;;  %v1675_v54 = vpack.c.bf16 %v60_v48, %v59_v47  ;;  %v29_v56 = vld [vmem:[%s3072_s1 + $0x40] sm:$0xff]  ;;  %v30_v57 = vld [vmem:[%s3072_s1 + $0x48] sm:$0xff]  ;;  %v1677_v61 = vpack.c.bf16 %v78_v53, %v77_v52  ;;  %v47_v63 = vld [vmem:[%s3072_s1 + $0xd0] sm:$0xff] }
   0xe   :  { %1642 = vmatprep.subr.bf16.mxu0 %v1641_v39  ;;  %v61_v58 = vld [vmem:[%s3072_s1 + $0x140] sm:$0xff]  ;;  %v62_v62 = vld [vmem:[%s3072_s1 + $0x148] sm:$0xff]  ;;  %v48_v0 = vld [vmem:[%s3072_s1 + $0xd8] sm:$0xff]  ;;  %v1647_v3 = vpack.c.bf16 %v30_v57, %v29_v56 }
   0xf   :  { %1672 = vmatpush3.bf16.msra.mxu1 %v1671_v38  ;;  %v79_v1 = vld [vmem:[%s3072_s1 + $0x1d0] sm:$0xff]  ;;  %v80_v2 = vld [vmem:[%s3072_s1 + $0x1d8] sm:$0xff]  ;;  %v1679_v5 = vpack.c.bf16 %v62_v62, %v61_v58  ;;  %v1649_v6 = vpack.c.bf16 %v48_v0, %v47_v63  ;;  %v49_v12 = vld [vmem:[%s3072_s1 + $0xe0] sm:$0xff] }
  0x10   :  { %1674 = vmatprep.subr.bf16.mxu1 %v1673_v46  ;;  %v31_v4 = vld [vmem:[%s3072_s1 + $0x50] sm:$0xff]  ;;  %v32_v7 = vld [vmem:[%s3072_s1 + $0x58] sm:$0xff]  ;;  %v1681_v11 = vpack.c.bf16 %v80_v2, %v79_v1  ;;  %v50_v13 = vld [vmem:[%s3072_s1 + $0xe8] sm:$0xff] }
  0x11   :  { %1644 = vmatpush3.bf16.msra.mxu0 %v1643_v51  ;;  %v63_v8 = vld [vmem:[%s3072_s1 + $0x150] sm:$0xff]  ;;  %v64_v9 = vld [vmem:[%s3072_s1 + $0x158] sm:$0xff]  ;;  %v81_v14 = vld [vmem:[%s3072_s1 + $0x1e0] sm:$0xff]  ;;  %v1651_v16 = vpack.c.bf16 %v32_v7, %v31_v4  ;;  %v1653_v19 = vpack.c.bf16 %v50_v13, %v49_v12 }
  0x12   :  { %1646 = vmatprep.subr.bf16.mxu0 %v1645_v55  ;;  %v82_v15 = vld [vmem:[%s3072_s1 + $0x1e8] sm:$0xff]  ;;  %v1683_v17 = vpack.c.bf16 %v64_v9, %v63_v8  ;;  %v15_v18 = vld [vmem:[%s3071_s0] sm:$0xff]  ;;  %v51_v27 = vld [vmem:[%s3072_s1 + $0xf0] sm:$0xff] }
  0x13   :  { %1676 = vmatpush3.bf16.msra.mxu1 %v1675_v54  ;;  %v33_v20 = vld [vmem:[%s3072_s1 + $0x60] sm:$0xff]  ;;  %v34_v21 = vld [vmem:[%s3072_s1 + $0x68] sm:$0xff]  ;;  %v365_v23 = vrot.slane %v15_v18, %v2158_v10  ;;  %v358_v24 = vcombine.high %v15_v18, %v15_v18  ;;  %v1685_v25 = vpack.c.bf16 %v82_v15, %v81_v14  ;;  %v52_v28 = vld [vmem:[%s3072_s1 + $0xf8] sm:$0xff] }
  0x14   :  { %1678 = vmatprep.subr.bf16.mxu1 %v1677_v61  ;;  %v65_v22 = vld [vmem:[%s3072_s1 + $0x160] sm:$0xff]  ;;  %v66_v26 = vld [vmem:[%s3072_s1 + $0x168] sm:$0xff]  ;;  %v83_v29 = vld [vmem:[%s3072_s1 + $0x1f0] sm:$0xff]  ;;  %v1655_v33 = vpack.c.bf16 %v34_v21, %v33_v20  ;;  %v1657_v35 = vpack.c.bf16 %v52_v28, %v51_v27 }
  0x15   :  { %1648 = vmatpush3.bf16.msra.mxu0 %v1647_v3  ;;  %v84_v30 = vld [vmem:[%s3072_s1 + $0x1f8] sm:$0xff]  ;;  %v373_v31 = vcombine.high %v365_v23, %v365_v23  ;;  %v372_v32 = vrot.slane %v358_v24, %v2158_v10  ;;  %v1687_v34 = vpack.c.bf16 %v66_v26, %v65_v22  ;;  %v35_v36 = vld [vmem:[%s3072_s1 + $0x70] sm:$0xff]  ;;  %v101_v42 = vld [vmem:[%s3072_s1 + $0x280] sm:$0xff] }
  0x16   :  { %1650 = vmatprep.subr.bf16.mxu0 %v1649_v6  ;;  %v36_v37 = vld [vmem:[%s3072_s1 + $0x78] sm:$0xff]  ;;  %v67_v38 = vld [vmem:[%s3072_s1 + $0x170] sm:$0xff]  ;;  %v1689_v40 = vpack.c.bf16 %v84_v30, %v83_v29  ;;  %v102_v43 = vld [vmem:[%s3072_s1 + $0x288] sm:$0xff] }
  0x17   :  { %1680 = vmatpush3.bf16.msra.mxu1 %v1679_v5  ;;  %v374_v39 = vcombine.high %v372_v32, %v372_v32  ;;  %537 = vmatprep.mubr.f32.mxu0 %v373_v31  ;;  %v68_v41 = vld [vmem:[%s3072_s1 + $0x178] sm:$0xff]  ;;  %v133_v44 = vld [vmem:[%s3072_s1 + $0x380] sm:$0xff]  ;;  %v134_v45 = vld [vmem:[%s3072_s1 + $0x388] sm:$0xff]  ;;  %v1659_v46 = vpack.c.bf16 %v36_v37, %v35_v36  ;;  %v1693_v48 = vpack.c.bf16 %v102_v43, %v101_v42 }
  0x18   :  { %1682 = vmatprep.subr.bf16.mxu1 %v1681_v11  ;;  %v1691_v47 = vpack.c.bf16 %v68_v41, %v67_v38  ;;  %v85_v49 = vld [vmem:[%s3072_s1 + $0x200] sm:$0xff]  ;;  %v86_v50 = vld [vmem:[%s3072_s1 + $0x208] sm:$0xff]  ;;  %v1725_v52 = vpack.c.bf16 %v134_v45, %v133_v44  ;;  %v103_v54 = vld [vmem:[%s3072_s1 + $0x290] sm:$0xff] }
  0x19   :  { %1652 = vmatpush3.bf16.msra.mxu0 %v1651_v16  ;;  %607 = vmatprep.mubr.f32.mxu1 %v374_v39  ;;  %v117_v51 = vld [vmem:[%s3072_s1 + $0x300] sm:$0xff]  ;;  %v118_v53 = vld [vmem:[%s3072_s1 + $0x308] sm:$0xff]  ;;  %v104_v55 = vld [vmem:[%s3072_s1 + $0x298] sm:$0xff]  ;;  %v1695_v58 = vpack.c.bf16 %v86_v50, %v85_v49 }
  0x1a   :  { %1654 = vmatprep.subr.bf16.mxu0 %v1653_v19  ;;  %v135_v56 = vld [vmem:[%s3072_s1 + $0x390] sm:$0xff]  ;;  %v136_v57 = vld [vmem:[%s3072_s1 + $0x398] sm:$0xff]  ;;  %v1727_v59 = vpack.c.bf16 %v118_v53, %v117_v51  ;;  %v1697_v60 = vpack.c.bf16 %v104_v55, %v103_v54  ;;  %v105_v2 = vld [vmem:[%s3072_s1 + $0x2a0] sm:$0xff] }
  0x1b   :  { %1684 = vmatpush3.bf16.msra.mxu1 %v1683_v17  ;;  %v87_v61 = vld [vmem:[%s3072_s1 + $0x210] sm:$0xff]  ;;  %v88_v62 = vld [vmem:[%s3072_s1 + $0x218] sm:$0xff]  ;;  %v1729_v0 = vpack.c.bf16 %v136_v57, %v135_v56  ;;  %v106_v3 = vld [vmem:[%s3072_s1 + $0x2a8] sm:$0xff] }
  0x1c   :  { %1686 = vmatprep.subr.bf16.mxu1 %v1685_v25  ;;  %v119_v63 = vld [vmem:[%s3072_s1 + $0x310] sm:$0xff]  ;;  %v120_v1 = vld [vmem:[%s3072_s1 + $0x318] sm:$0xff]  ;;  %v137_v4 = vld [vmem:[%s3072_s1 + $0x3a0] sm:$0xff]  ;;  %v1699_v6 = vpack.c.bf16 %v88_v62, %v87_v61  ;;  %v1701_v8 = vpack.c.bf16 %v106_v3, %v105_v2 }
  0x1d   :  { %1656 = vmatpush3.bf16.msra.mxu0 %v1655_v33  ;;  %v138_v5 = vld [vmem:[%s3072_s1 + $0x3a8] sm:$0xff]  ;;  %v1731_v7 = vpack.c.bf16 %v120_v1, %v119_v63  ;;  %v89_v9 = vld [vmem:[%s3072_s1 + $0x220] sm:$0xff]  ;;  %v107_v15 = vld [vmem:[%s3072_s1 + $0x2b0] sm:$0xff] }
  0x1e   :  { %1658 = vmatprep.subr.bf16.mxu0 %v1657_v35  ;;  %v90_v11 = vld [vmem:[%s3072_s1 + $0x228] sm:$0xff]  ;;  %v121_v12 = vld [vmem:[%s3072_s1 + $0x320] sm:$0xff]  ;;  %v1733_v13 = vpack.c.bf16 %v138_v5, %v137_v4  ;;  %v108_v16 = vld [vmem:[%s3072_s1 + $0x2b8] sm:$0xff] }
  0x1f   :  { %1688 = vmatpush3.bf16.msra.mxu1 %v1687_v34  ;;  %v122_v14 = vld [vmem:[%s3072_s1 + $0x328] sm:$0xff]  ;;  %v139_v17 = vld [vmem:[%s3072_s1 + $0x3b0] sm:$0xff]  ;;  %v140_v18 = vld [vmem:[%s3072_s1 + $0x3b8] sm:$0xff]  ;;  %v1703_v19 = vpack.c.bf16 %v90_v11, %v89_v9  ;;  %v1705_v22 = vpack.c.bf16 %v108_v16, %v107_v15 }
  0x20   :  { %1690 = vmatprep.subr.bf16.mxu1 %v1689_v40  ;;  %v91_v20 = vld [vmem:[%s3072_s1 + $0x230] sm:$0xff]  ;;  %v1735_v21 = vpack.c.bf16 %v122_v14, %v121_v12  ;;  %v124_v25 = vld [vmem:[%s3072_s1 + $0x338] sm:$0xff]  ;;  %v1737_v26 = vpack.c.bf16 %v140_v18, %v139_v17  ;;  %v109_v27 = vld [vmem:[%s3072_s1 + $0x2c0] sm:$0xff] }
  0x21   :  { %1660 = vmatpush3.bf16.msra.mxu0 %v1659_v46  ;;  %v123_v24 = vld [vmem:[%s3072_s1 + $0x330] sm:$0xff]  ;;  %v110_v28 = vld [vmem:[%s3072_s1 + $0x2c8] sm:$0xff]  ;;  %v141_v30 = vld [vmem:[%s3072_s1 + $0x3c0] sm:$0xff] }
  0x22   :  { %1694 = vmatprep.subr.bf16.mxu0 %v1693_v48  ;;  %v16_v29 = vld [vmem:[%s3071_s0 + $0x8] sm:$0xff]  ;;  %v1739_v35 = vpack.c.bf16 %v124_v25, %v123_v24  ;;  %v1709_v36 = vpack.c.bf16 %v110_v28, %v109_v27  ;;  %v93_v37 = vld [vmem:[%s3072_s1 + $0x240] sm:$0xff]  ;;  %v111_v44 = vld [vmem:[%s3072_s1 + $0x2d0] sm:$0xff] }
  0x23   :  { %1692 = vmatpush3.bf16.msra.mxu1 %v1691_v47  ;;  %v142_v31 = vld [vmem:[%s3072_s1 + $0x3c8] sm:$0xff]  ;;  %v375_v33 = vcombine.high %v16_v29, %v16_v29  ;;  %v125_v39 = vld [vmem:[%s3072_s1 + $0x340] sm:$0xff]  ;;  %v112_v45 = vld [vmem:[%s3072_s1 + $0x2d8] sm:$0xff] }
  0x24   :  { %1726 = vmatprep.subr.bf16.mxu1 %v1725_v52  ;;  %538 = vmatmul.mubr.f32.vlgmr.msra.gmra.mrb[0].mxu0 %v365_v23  ;;  %v92_v23 = vld [vmem:[%s3072_s1 + $0x238] sm:$0xff]  ;;  %v94_v38 = vld [vmem:[%s3072_s1 + $0x248] sm:$0xff]  ;;  %v1741_v42 = vpack.c.bf16 %v142_v31, %v141_v30  ;;  %v143_v46 = vld [vmem:[%s3072_s1 + $0x3d0] sm:$0xff]  ;;  %v1713_v51 = vpack.c.bf16 %v112_v45, %v111_v44 }
  0x25   :  { %1696 = vmatpush3.bf16.msra.mxu0 %v1695_v58  ;;  %v1707_v34 = vpack.c.bf16 %v92_v23, %v91_v20  ;;  %v2339_v41 = vrot.slane %v375_v33, %v2158_v10  ;;  %v126_v43 = vld [vmem:[%s3072_s1 + $0x348] sm:$0xff]  ;;  %v144_v47 = vld [vmem:[%s3072_s1 + $0x3d8] sm:$0xff]  ;;  %v1711_v49 = vpack.c.bf16 %v94_v38, %v93_v37  ;;  %v95_v52 = vld [vmem:[%s3072_s1 + $0x250] sm:$0xff] }
  0x26   :  { %608 = vmatmul.mubr.f32.vlgmr.msra.gmra.mrb[0].mxu1 %v372_v32  ;;  %1698 = vmatprep.subr.bf16.mxu0 %v1697_v60  ;;  %v2325_v32 = vrot.slane %v16_v29, %v2158_v10  ;;  %v1743_v50 = vpack.c.bf16 %v126_v43, %v125_v39  ;;  %v96_v53 = vld [vmem:[%s3072_s1 + $0x258] sm:$0xff]  ;;  %v127_v54 = vld [vmem:[%s3072_s1 + $0x350] sm:$0xff]  ;;  %v1745_v55 = vpack.c.bf16 %v144_v47, %v143_v46  ;;  %v113_v57 = vld [vmem:[%s3072_s1 + $0x2e0] sm:$0xff] }
  0x27   :  { %1728 = vmatpush3.bf16.msra.mxu1 %v1727_v59  ;;  %v391_v48 = vcombine.high %v2339_v41, %v2339_v41  ;;  %v128_v56 = vld [vmem:[%s3072_s1 + $0x358] sm:$0xff]  ;;  %v114_v58 = vld [vmem:[%s3072_s1 + $0x2e8] sm:$0xff]  ;;  %v145_v59 = vld [vmem:[%s3072_s1 + $0x3e0] sm:$0xff]  ;;  %v1715_v61 = vpack.c.bf16 %v96_v53, %v95_v52 }
  0x28   :  { %1730 = vmatprep.subr.bf16.mxu1 %v1729_v0  ;;  %v390_v40 = vcombine.high %v2325_v32, %v2325_v32  ;;  %v146_v60 = vld [vmem:[%s3072_s1 + $0x3e8] sm:$0xff]  ;;  %v1747_v62 = vpack.c.bf16 %v128_v56, %v127_v54  ;;  %v1717_v63 = vpack.c.bf16 %v114_v58, %v113_v57  ;;  %v97_v0 = vld [vmem:[%s3072_s1 + $0x260] sm:$0xff]  ;;  %v115_v5 = vld [vmem:[%s3072_s1 + $0x2f0] sm:$0xff] }
  0x29   :  { %1700 = vmatpush3.bf16.msra.mxu0 %v1699_v6  ;;  %747 = vmatprep.mubr.f32.mxu1 %v391_v48  ;;  %v98_v1 = vld [vmem:[%s3072_s1 + $0x268] sm:$0xff]  ;;  %v129_v2 = vld [vmem:[%s3072_s1 + $0x360] sm:$0xff]  ;;  %v1749_v3 = vpack.c.bf16 %v146_v60, %v145_v59  ;;  %v116_v6 = vld [vmem:[%s3072_s1 + $0x2f8] sm:$0xff] }
  0x2a   :  { %1702 = vmatprep.subr.bf16.mxu0 %v1701_v8  ;;  %677 = vmatprep.mubr.f32.mxu0 %v390_v40  ;;  %v130_v4 = vld [vmem:[%s3072_s1 + $0x368] sm:$0xff]  ;;  %v148_v8 = vld [vmem:[%s3072_s1 + $0x3f8] sm:$0xff]  ;;  %v1719_v9 = vpack.c.bf16 %v98_v1, %v97_v0  ;;  %v1721_v12 = vpack.c.bf16 %v116_v6, %v115_v5  ;;  %v131_v15 = vld [vmem:[%s3072_s1 + $0x370] sm:$0xff] }
  0x2b   :  { %1732 = vmatpush3.bf16.msra.mxu1 %v1731_v7  ;;  %v147_v7 = vld [vmem:[%s3072_s1 + $0x3f0] sm:$0xff]  ;;  %v1751_v11 = vpack.c.bf16 %v130_v4, %v129_v2  ;;  %v100_v14 = vld [vmem:[%s3072_s1 + $0x278] sm:$0xff]  ;;  %v165_v18 = vld [vmem:[%s3072_s1 + $0x480] sm:$0xff] }
  0x2c   :  { %1734 = vmatprep.subr.bf16.mxu1 %v1733_v13  ;;  %v99_v13 = vld [vmem:[%s3072_s1 + $0x270] sm:$0xff]  ;;  %v1753_v16 = vpack.c.bf16 %v148_v8, %v147_v7  ;;  %v132_v17 = vld [vmem:[%s3072_s1 + $0x378] sm:$0xff]  ;;  %v197_v20 = vld [vmem:[%s3072_s1 + $0x580] sm:$0xff] }
  0x2d   :  { %1704 = vmatpush3.bf16.msra.mxu0 %v1703_v19  ;;  %v166_v19 = vld [vmem:[%s3072_s1 + $0x488] sm:$0xff]  ;;  %v149_v23 = vld [vmem:[%s3072_s1 + $0x400] sm:$0xff]  ;;  %v1755_v24 = vpack.c.bf16 %v132_v17, %v131_v15  ;;  %v167_v30 = vld [vmem:[%s3072_s1 + $0x490] sm:$0xff] }
  0x2e   :  { %1706 = vmatprep.subr.bf16.mxu0 %v1705_v22  ;;  %v1723_v22 = vpack.c.bf16 %v100_v14, %v99_v13  ;;  %v1757_v25 = vpack.c.bf16 %v166_v19, %v165_v18  ;;  %v181_v27 = vld [vmem:[%s3072_s1 + $0x500] sm:$0xff]  ;;  %v182_v28 = vld [vmem:[%s3072_s1 + $0x508] sm:$0xff]  ;;  %v168_v31 = vld [vmem:[%s3072_s1 + $0x498] sm:$0xff] }
  0x2f   :  { %1736 = vmatpush3.bf16.msra.mxu1 %v1735_v21  ;;  %v198_v21 = vld [vmem:[%s3072_s1 + $0x588] sm:$0xff]  ;;  %v199_v33 = vld [vmem:[%s3072_s1 + $0x590] sm:$0xff]  ;;  %v1761_v38 = vpack.c.bf16 %v168_v31, %v167_v30  ;;  %v152_v40 = vld [vmem:[%s3072_s1 + $0x418] sm:$0xff] }
  0x30   :  { %1738 = vmatprep.subr.bf16.mxu1 %v1737_v26  ;;  %v150_v26 = vld [vmem:[%s3072_s1 + $0x408] sm:$0xff]  ;;  %v1789_v29 = vpack.c.bf16 %v198_v21, %v197_v20  ;;  %v17_v37 = vld [vmem:[%s3071_s0 + $0x10] sm:$0xff]  ;;  %v184_v46 = vld [vmem:[%s3072_s1 + $0x518] sm:$0xff] }
  0x31   :  { %1708 = vmatpush3.bf16.msra.mxu0 %v1707_v34  ;;  %v200_v34 = vld [vmem:[%s3072_s1 + $0x598] sm:$0xff]  ;;  %v151_v39 = vld [vmem:[%s3072_s1 + $0x410] sm:$0xff]  ;;  %v2467_v43 = vrot.slane %v17_v37, %v2158_v10  ;;  %v392_v44 = vcombine.high %v17_v37, %v17_v37  ;;  %v169_v47 = vld [vmem:[%s3072_s1 + $0x4a0] sm:$0xff] }
  0x32   :  { %1710 = vmatprep.subr.bf16.mxu0 %v1709_v36  ;;  %v1791_v36 = vpack.c.bf16 %v182_v28, %v181_v27  ;;  %v1793_v45 = vpack.c.bf16 %v200_v34, %v199_v33  ;;  %v170_v48 = vld [vmem:[%s3072_s1 + $0x4a8] sm:$0xff]  ;;  %v1763_v53 = vpack.c.bf16 %v152_v40, %v151_v39  ;;  %v185_v57 = vld [vmem:[%s3072_s1 + $0x520] sm:$0xff]  ;;  %v171_v60 = vld [vmem:[%s3072_s1 + $0x4b0] sm:$0xff] }
  0x33   :  { %1740 = vmatpush3.bf16.msra.mxu1 %v1739_v35  ;;  %v1759_v35 = vpack.c.bf16 %v150_v26, %v149_v23  ;;  %v2488_v52 = vrot.slane %v392_v44, %v2158_v10  ;;  %v1765_v54 = vpack.c.bf16 %v170_v48, %v169_v47  ;;  %v154_v56 = vld [vmem:[%s3072_s1 + $0x428] sm:$0xff]  ;;  %v156_v4 = vld [vmem:[%s3072_s1 + $0x438] sm:$0xff]  ;;  %v187_v5 = vld [vmem:[%s3072_s1 + $0x530] sm:$0xff] }
  0x34   :  { %1742 = vmatprep.subr.bf16.mxu1 %v1741_v42  ;;  %v183_v42 = vld [vmem:[%s3072_s1 + $0x510] sm:$0xff]  ;;  %v186_v59 = vld [vmem:[%s3072_s1 + $0x528] sm:$0xff]  ;;  %v188_v7 = vld [vmem:[%s3072_s1 + $0x538] sm:$0xff] }
  0x35   :  { %1712 = vmatpush3.bf16.msra.mxu0 %v1711_v49  ;;  %v201_v49 = vld [vmem:[%s3072_s1 + $0x5a0] sm:$0xff]  ;;  %v1799_v1 = vpack.c.bf16 %v186_v59, %v185_v57  ;;  %v1803_v14 = vpack.c.bf16 %v188_v7, %v187_v5  ;;  %v158_v17 = vld [vmem:[%s3072_s1 + $0x448] sm:$0xff]  ;;  %v175_v21 = vld [vmem:[%s3072_s1 + $0x4d0] sm:$0xff] }
  0x36   :  { %1714 = vmatprep.subr.bf16.mxu0 %v1713_v51  ;;  %v407_v51 = vcombine.high %v2467_v43, %v2467_v43  ;;  %v173_v8 = vld [vmem:[%s3072_s1 + $0x4c0] sm:$0xff]  ;;  %v190_v20 = vld [vmem:[%s3072_s1 + $0x548] sm:$0xff]  ;;  %v207_v23 = vld [vmem:[%s3072_s1 + $0x5d0] sm:$0xff] }
  0x37   :  { %1744 = vmatpush3.bf16.msra.mxu1 %v1743_v50  ;;  %v202_v50 = vld [vmem:[%s3072_s1 + $0x5a8] sm:$0xff]  ;;  %v189_v18 = vld [vmem:[%s3072_s1 + $0x540] sm:$0xff]  ;;  %v159_v28 = vld [vmem:[%s3072_s1 + $0x450] sm:$0xff] }
  0x38   :  { %1746 = vmatprep.subr.bf16.mxu1 %v1745_v55  ;;  %v153_v55 = vld [vmem:[%s3072_s1 + $0x420] sm:$0xff]  ;;  %v1797_v58 = vpack.c.bf16 %v202_v50, %v201_v49  ;;  %v1807_v26 = vpack.c.bf16 %v190_v20, %v189_v18  ;;  %v191_v30 = vld [vmem:[%s3072_s1 + $0x550] sm:$0xff]  ;;  %v192_v33 = vld [vmem:[%s3072_s1 + $0x558] sm:$0xff] }
  0x39   :  { %1716 = vmatpush3.bf16.msra.mxu0 %v1715_v61  ;;  %v172_v61 = vld [vmem:[%s3072_s1 + $0x4b8] sm:$0xff]  ;;  %v1767_v0 = vpack.c.bf16 %v154_v56, %v153_v55  ;;  %v177_v34 = vld [vmem:[%s3072_s1 + $0x4e0] sm:$0xff]  ;;  %v210_v37 = vld [vmem:[%s3072_s1 + $0x5e8] sm:$0xff]  ;;  %v1811_v39 = vpack.c.bf16 %v192_v33, %v191_v30 }
  0x3a   :  { %1718 = vmatprep.subr.bf16.mxu0 %v1717_v63  ;;  %v204_v63 = vld [vmem:[%s3072_s1 + $0x5b8] sm:$0xff]  ;;  %v1769_v2 = vpack.c.bf16 %v172_v61, %v171_v60  ;;  %v162_v44 = vld [vmem:[%s3072_s1 + $0x468] sm:$0xff]  ;;  %v179_v48 = vld [vmem:[%s3072_s1 + $0x4f0] sm:$0xff] }
  0x3b   :  { %1748 = vmatpush3.bf16.msra.mxu1 %v1747_v62  ;;  %v203_v62 = vld [vmem:[%s3072_s1 + $0x5b0] sm:$0xff]  ;;  %v194_v47 = vld [vmem:[%s3072_s1 + $0x568] sm:$0xff]  ;;  %v180_v49 = vld [vmem:[%s3072_s1 + $0x4f8] sm:$0xff] }
  0x3c   :  { %1750 = vmatprep.subr.bf16.mxu1 %v1749_v3  ;;  %v155_v3 = vld [vmem:[%s3072_s1 + $0x430] sm:$0xff]  ;;  %v1801_v6 = vpack.c.bf16 %v204_v63, %v203_v62  ;;  %v1785_v55 = vpack.c.bf16 %v180_v49, %v179_v48  ;;  %v164_v57 = vld [vmem:[%s3072_s1 + $0x478] sm:$0xff]  ;;  %v229_v60 = vld [vmem:[%s3072_s1 + $0x680] sm:$0xff] }
  0x3d   :  { %1720 = vmatpush3.bf16.msra.mxu0 %v1719_v9  ;;  %v174_v9 = vld [vmem:[%s3072_s1 + $0x4c8] sm:$0xff]  ;;  %v1771_v13 = vpack.c.bf16 %v156_v4, %v155_v3  ;;  %v211_v50 = vld [vmem:[%s3072_s1 + $0x5f0] sm:$0xff]  ;;  %v196_v59 = vld [vmem:[%s3072_s1 + $0x578] sm:$0xff] }
  0x3e   :  { %1722 = vmatprep.subr.bf16.mxu0 %v1721_v12  ;;  %v206_v12 = vld [vmem:[%s3072_s1 + $0x5c8] sm:$0xff]  ;;  %v1773_v15 = vpack.c.bf16 %v174_v9, %v173_v8  ;;  %v163_v56 = vld [vmem:[%s3072_s1 + $0x470] sm:$0xff]  ;;  %v261_v62 = vld [vmem:[%s3072_s1 + $0x780] sm:$0xff] }
  0x3f   :  { %1752 = vmatpush3.bf16.msra.mxu1 %v1751_v11  ;;  %v205_v11 = vld [vmem:[%s3072_s1 + $0x5c0] sm:$0xff]  ;;  %v230_v61 = vld [vmem:[%s3072_s1 + $0x688] sm:$0xff]  ;;  %v231_v9 = vld [vmem:[%s3072_s1 + $0x690] sm:$0xff] }
  0x40   :  { %1754 = vmatprep.subr.bf16.mxu1 %v1753_v16  ;;  %v157_v16 = vld [vmem:[%s3072_s1 + $0x440] sm:$0xff]  ;;  %v1805_v19 = vpack.c.bf16 %v206_v12, %v205_v11  ;;  %v262_v63 = vld [vmem:[%s3072_s1 + $0x788] sm:$0xff]  ;;  %v1821_v3 = vpack.c.bf16 %v230_v61, %v229_v60  ;;  %v232_v11 = vld [vmem:[%s3072_s1 + $0x698] sm:$0xff] }
  0x41   :  { %1724 = vmatpush3.bf16.msra.mxu0 %v1723_v22  ;;  %v176_v22 = vld [vmem:[%s3072_s1 + $0x4d8] sm:$0xff]  ;;  %v213_v4 = vld [vmem:[%s3072_s1 + $0x600] sm:$0xff]  ;;  %v214_v5 = vld [vmem:[%s3072_s1 + $0x608] sm:$0xff]  ;;  %v1853_v7 = vpack.c.bf16 %v262_v63, %v261_v62  ;;  %v1825_v18 = vpack.c.bf16 %v232_v11, %v231_v9 }
  0x42   :  { %1758 = vmatprep.subr.bf16.mxu0 %v1757_v25  ;;  %v1775_v25 = vpack.c.bf16 %v158_v17, %v157_v16  ;;  %v1777_v27 = vpack.c.bf16 %v176_v22, %v175_v21  ;;  %v246_v8 = vld [vmem:[%s3072_s1 + $0x708] sm:$0xff]  ;;  %v1823_v16 = vpack.c.bf16 %v214_v5, %v213_v4  ;;  %v216_v20 = vld [vmem:[%s3072_s1 + $0x618] sm:$0xff]  ;;  %v247_v21 = vld [vmem:[%s3072_s1 + $0x710] sm:$0xff] }
  0x43   :  { %1756 = vmatpush3.bf16.msra.mxu1 %v1755_v24  ;;  %v208_v24 = vld [vmem:[%s3072_s1 + $0x5d8] sm:$0xff]  ;;  %v251_v48 = vld [vmem:[%s3072_s1 + $0x730] sm:$0xff]  ;;  %v254_v60 = vld [vmem:[%s3072_s1 + $0x748] sm:$0xff] }
  0x44   :  { %1790 = vmatprep.subr.bf16.mxu1 %v1789_v29  ;;  %678 = vmatmul.mubr.f32.vlgmr.msra.gmra.mrb[2].mxu0 %v2325_v32  ;;  %v1795_v32 = vpack.c.bf16 %v184_v46, %v183_v42  ;;  %v160_v29 = vld [vmem:[%s3072_s1 + $0x458] sm:$0xff]  ;;  %v1809_v31 = vpack.c.bf16 %v208_v24, %v207_v23  ;;  %v161_v42 = vld [vmem:[%s3072_s1 + $0x460] sm:$0xff]  ;;  %v239_v62 = vld [vmem:[%s3072_s1 + $0x6d0] sm:$0xff] }
  0x45   :  { %1760 = vmatpush3.bf16.msra.mxu0 %v1759_v35  ;;  %817 = vmatprep.mubr.f32.mxu0 %v407_v51  ;;  %v178_v35 = vld [vmem:[%s3072_s1 + $0x4e8] sm:$0xff]  ;;  %v212_v51 = vld [vmem:[%s3072_s1 + $0x5f8] sm:$0xff]  ;;  %v233_v24 = vld [vmem:[%s3072_s1 + $0x6a0] sm:$0xff] }
  0x46   :  { %748 = vmatmul.mubr.f32.vlgmr.msra.gmra.mrb[2].mxu1 %v2339_v41  ;;  %1762 = vmatprep.subr.bf16.mxu0 %v1761_v38  ;;  %v408_v41 = vcombine.high %v2488_v52, %v2488_v52  ;;  %v1779_v38 = vpack.c.bf16 %v160_v29, %v159_v28  ;;  %v1781_v40 = vpack.c.bf16 %v178_v35, %v177_v34  ;;  %v248_v23 = vld [vmem:[%s3072_s1 + $0x718] sm:$0xff]  ;;  %v266_v28 = vld [vmem:[%s3072_s1 + $0x7a8] sm:$0xff]  ;;  %v249_v35 = vld [vmem:[%s3072_s1 + $0x720] sm:$0xff] }
  0x47   :  { %1792 = vmatpush3.bf16.msra.mxu1 %v1791_v36  ;;  %v209_v36 = vld [vmem:[%s3072_s1 + $0x5e0] sm:$0xff]  ;;  %v218_v34 = vld [vmem:[%s3072_s1 + $0x628] sm:$0xff]  ;;  %v240_v63 = vld [vmem:[%s3072_s1 + $0x6d8] sm:$0xff] }
  0x48   :  { %1794 = vmatprep.subr.bf16.mxu1 %v1793_v45  ;;  %887 = vmatprep.mubr.f32.mxu1 %v408_v41  ;;  %v193_v45 = vld [vmem:[%s3072_s1 + $0x560] sm:$0xff]  ;;  %v1813_v46 = vpack.c.bf16 %v210_v37, %v209_v36  ;;  %v195_v41 = vld [vmem:[%s3072_s1 + $0x570] sm:$0xff] }
  0x49   :  { %1764 = vmatpush3.bf16.msra.mxu0 %v1763_v53  ;;  %v1783_v53 = vpack.c.bf16 %v162_v44, %v161_v42  ;;  %v235_v37 = vld [vmem:[%s3072_s1 + $0x6b0] sm:$0xff] }
  0x4a   :  { %1766 = vmatprep.subr.bf16.mxu0 %v1765_v54  ;;  %v1815_v54 = vpack.c.bf16 %v194_v47, %v193_v45  ;;  %v220_v47 = vld [vmem:[%s3072_s1 + $0x638] sm:$0xff] }
  0x4b   :  { %1796 = vmatpush3.bf16.msra.mxu1 %v1795_v32  ;;  %v18_v32 = vld [vmem:[%s3071_s0 + $0x18] sm:$0xff] }
  0x4c   :  { %1798 = vmatprep.subr.bf16.mxu1 %v1797_v58  ;;  %v1817_v58 = vpack.c.bf16 %v212_v51, %v211_v50  ;;  %v2659_v12 = vrot.slane %v18_v32, %v2158_v10  ;;  %v252_v50 = vld [vmem:[%s3072_s1 + $0x738] sm:$0xff]  ;;  %v237_v51 = vld [vmem:[%s3072_s1 + $0x6c0] sm:$0xff] }
  0x4d   :  { %1768 = vmatpush3.bf16.msra.mxu0 %v1767_v0  ;;  %v409_v0 = vcombine.high %v18_v32, %v18_v32  ;;  %v269_v32 = vld [vmem:[%s3072_s1 + $0x7c0] sm:$0xff] }
  0x4e   :  { %1770 = vmatprep.subr.bf16.mxu0 %v1769_v2  ;;  %v1819_v2 = vpack.c.bf16 %v196_v59, %v195_v41  ;;  %v253_v59 = vld [vmem:[%s3072_s1 + $0x740] sm:$0xff] }
  0x4f   :  { %1800 = vmatpush3.bf16.msra.mxu1 %v1799_v1  ;;  %v1787_v1 = vpack.c.bf16 %v164_v57, %v163_v56  ;;  %v221_v56 = vld [vmem:[%s3072_s1 + $0x640] sm:$0xff]  ;;  %v1867_v57 = vpack.c.bf16 %v252_v50, %v251_v48 }
  0x50   :  { %1802 = vmatprep.subr.bf16.mxu1 %v1801_v6  ;;  %v245_v6 = vld [vmem:[%s3072_s1 + $0x700] sm:$0xff] }
  0x51   :  { %1772 = vmatpush3.bf16.msra.mxu0 %v1771_v13  ;;  %v263_v13 = vld [vmem:[%s3072_s1 + $0x790] sm:$0xff]  ;;  %v1855_v17 = vpack.c.bf16 %v246_v8, %v245_v6 }
  0x52   :  { %1774 = vmatprep.subr.bf16.mxu0 %v1773_v15  ;;  %v2668_v15 = vrot.slane %v409_v0, %v2158_v10 }
  0x53   :  { %1804 = vmatpush3.bf16.msra.mxu1 %v1803_v14  ;;  %v264_v14 = vld [vmem:[%s3072_s1 + $0x798] sm:$0xff] }
  0x54   :  { %1806 = vmatprep.subr.bf16.mxu1 %v1805_v19  ;;  %v215_v19 = vld [vmem:[%s3072_s1 + $0x610] sm:$0xff]  ;;  %v1857_v22 = vpack.c.bf16 %v264_v14, %v263_v13  ;;  %v425_v29 = vcombine.high %v2668_v15, %v2668_v15 }
  0x55   :  { %1776 = vmatpush3.bf16.msra.mxu0 %v1775_v25  ;;  %v234_v25 = vld [vmem:[%s3072_s1 + $0x6a8] sm:$0xff]  ;;  %v1827_v30 = vpack.c.bf16 %v216_v20, %v215_v19 }
  0x56   :  { %1778 = vmatprep.subr.bf16.mxu0 %v1777_v27  ;;  %v265_v27 = vld [vmem:[%s3072_s1 + $0x7a0] sm:$0xff]  ;;  %v1829_v33 = vpack.c.bf16 %v234_v25, %v233_v24 }
  0x57   :  { %1808 = vmatpush3.bf16.msra.mxu1 %v1807_v26  ;;  %v424_v26 = vcombine.high %v2659_v12, %v2659_v12  ;;  %v1861_v36 = vpack.c.bf16 %v266_v28, %v265_v27 }
  0x58   :  { %1810 = vmatprep.subr.bf16.mxu1 %v1809_v31  ;;  %v1859_v31 = vpack.c.bf16 %v248_v23, %v247_v21 }
  0x59   :  { %1780 = vmatpush3.bf16.msra.mxu0 %v1779_v38  ;;  %v236_v38 = vld [vmem:[%s3072_s1 + $0x6b8] sm:$0xff] }
  0x5a   :  { %1782 = vmatprep.subr.bf16.mxu0 %v1781_v40  ;;  %v268_v40 = vld [vmem:[%s3072_s1 + $0x7b8] sm:$0xff]  ;;  %v1833_v45 = vpack.c.bf16 %v236_v38, %v235_v37 }
  0x5b   :  { %1812 = vmatpush3.bf16.msra.mxu1 %v1811_v39  ;;  %v267_v39 = vld [vmem:[%s3072_s1 + $0x7b0] sm:$0xff] }
  0x5c   :  { %1814 = vmatprep.subr.bf16.mxu1 %v1813_v46  ;;  %v219_v46 = vld [vmem:[%s3072_s1 + $0x630] sm:$0xff]  ;;  %v1865_v49 = vpack.c.bf16 %v268_v40, %v267_v39 }
  0x5d   :  { %1784 = vmatpush3.bf16.msra.mxu0 %v1783_v53  ;;  %v238_v53 = vld [vmem:[%s3072_s1 + $0x6c8] sm:$0xff] }
  0x5e   :  { %1786 = vmatprep.subr.bf16.mxu0 %v1785_v55  ;;  %v1835_v55 = vpack.c.bf16 %v220_v47, %v219_v46  ;;  %v1837_v41 = vpack.c.bf16 %v238_v53, %v237_v51 }
  0x5f   :  { %1816 = vmatpush3.bf16.msra.mxu1 %v1815_v54  ;;  %v270_v54 = vld [vmem:[%s3072_s1 + $0x7c8] sm:$0xff] }
  0x60   :  { %1818 = vmatprep.subr.bf16.mxu1 %v1817_v58  ;;  %v222_v58 = vld [vmem:[%s3072_s1 + $0x648] sm:$0xff]  ;;  %v1869_v61 = vpack.c.bf16 %v270_v54, %v269_v32 }
  0x61   :  { %1788 = vmatpush3.bf16.msra.mxu0 %v1787_v1 }
  0x62   :  { %1822 = vmatprep.subr.bf16.mxu0 %v1821_v3 }
  0x63   :  { %1820 = vmatpush3.bf16.msra.mxu1 %v1819_v2 }
  0x64   :  { %1854 = vmatprep.subr.bf16.mxu1 %v1853_v7  ;;  %818 = vmatmul.mubr.f32.vlgmr.msra.gmra.mrb[4].mxu0 %v2467_v43  ;;  %v217_v43 = vld [vmem:[%s3072_s1 + $0x620] sm:$0xff] }
  0x65   :  { %1824 = vmatpush3.bf16.msra.mxu0 %v1823_v16  ;;  %957 = vmatprep.mubr.f32.mxu0 %v424_v26  ;;  %v1831_v42 = vpack.c.bf16 %v218_v34, %v217_v43 }
  0x66   :  { %888 = vmatmul.mubr.f32.vlgmr.msra.gmra.mrb[4].mxu1 %v2488_v52  ;;  %1826 = vmatprep.subr.bf16.mxu0 %v1825_v18  ;;  %v250_v52 = vld [vmem:[%s3072_s1 + $0x728] sm:$0xff] }
  0x67   :  { %1856 = vmatpush3.bf16.msra.mxu1 %v1855_v17  ;;  %1027 = vmatprep.mubr.f32.mxu1 %v425_v29  ;;  %v1863_v44 = vpack.c.bf16 %v250_v52, %v249_v35 }
  0x68   :  { %1858 = vmatprep.subr.bf16.mxu1 %v1857_v22 }
  0x69   :  { %1828 = vmatpush3.bf16.msra.mxu0 %v1827_v30 }
  0x6a   :  { %1830 = vmatprep.subr.bf16.mxu0 %v1829_v33 }
  0x6b   :  { %1860 = vmatpush3.bf16.msra.mxu1 %v1859_v31 }
  0x6c   :  { %1862 = vmatprep.subr.bf16.mxu1 %v1861_v36 }
  0x6d   :  { %1832 = vmatpush3.bf16.msra.mxu0 %v1831_v42 }
  0x6e   :  { %1834 = vmatprep.subr.bf16.mxu0 %v1833_v45 }
  0x6f   :  { %1864 = vmatpush3.bf16.msra.mxu1 %v1863_v44 }
  0x70   :  { %1866 = vmatprep.subr.bf16.mxu1 %v1865_v49 }
  0x71   :  { %8 = vsyncpa [#allocation3], 0  ;;  %v271_v0 = vld [vmem:[%s3072_s1 + $0x7d0] sm:$0xff]  ;;  %v272_v1 = vld [vmem:[%s3072_s1 + $0x7d8] sm:$0xff]  ;;  %1836 = vmatpush3.bf16.msra.mxu0 %v1835_v55  ;;  %v1839_v2 = vpack.c.bf16 %v222_v58, %v221_v56  ;;  %v1871_v3 = vpack.c.bf16 %v254_v60, %v253_v59  ;;  %v1841_v4 = vpack.c.bf16 %v240_v63, %v239_v62  ;;  %vm1991_vm0 = vmmov 0  }
  0x72   :  { %1838 = vmatprep.subr.bf16.mxu0 %v1837_v41  ;;  %v223_v5 = vld [vmem:[%s3072_s1 + $0x650] sm:$0xff]  ;;  %v224_v6 = vld [vmem:[%s3072_s1 + $0x658] sm:$0xff]  ;;  %v1873_v8 = vpack.c.bf16 %v272_v1, %v271_v0  ;;  %v241_v11 = vld [vmem:[%s3072_s1 + $0x6e0] sm:$0xff]  ;;  %vm470_vm1 = vcmask 261120   ;;  %vm1244_vm2 = vcmask 254976  }
  0x73   :  { %1868 = vmatpush3.bf16.msra.mxu1 %v1867_v57  ;;  %v255_v7 = vld [vmem:[%s3072_s1 + $0x750] sm:$0xff]  ;;  %v256_v9 = vld [vmem:[%s3072_s1 + $0x758] sm:$0xff]  ;;  %v242_v13 = vld [vmem:[%s3072_s1 + $0x6e8] sm:$0xff]  ;;  %v1843_v17 = vpack.c.bf16 %v224_v6, %v223_v5 }
  0x74   :  { %1870 = vmatprep.subr.bf16.mxu1 %v1869_v61  ;;  %v273_v14 = vld [vmem:[%s3072_s1 + $0x7e0] sm:$0xff]  ;;  %v274_v16 = vld [vmem:[%s3072_s1 + $0x7e8] sm:$0xff]  ;;  %v1875_v18 = vpack.c.bf16 %v256_v9, %v255_v7  ;;  %v1845_v19 = vpack.c.bf16 %v242_v13, %v241_v11  ;;  %v243_v25 = vld [vmem:[%s3072_s1 + $0x6f0] sm:$0xff] }
  0x75   :  { %1840 = vmatpush3.bf16.msra.mxu0 %v1839_v2  ;;  %v225_v20 = vld [vmem:[%s3072_s1 + $0x660] sm:$0xff]  ;;  %v226_v21 = vld [vmem:[%s3072_s1 + $0x668] sm:$0xff]  ;;  %v1877_v23 = vpack.c.bf16 %v274_v16, %v273_v14  ;;  %v244_v26 = vld [vmem:[%s3072_s1 + $0x6f8] sm:$0xff] }
  0x76   :  { %1842 = vmatprep.subr.bf16.mxu0 %v1841_v4  ;;  %v257_v22 = vld [vmem:[%s3072_s1 + $0x760] sm:$0xff]  ;;  %v258_v24 = vld [vmem:[%s3072_s1 + $0x768] sm:$0xff]  ;;  %v275_v27 = vld [vmem:[%s3072_s1 + $0x7f0] sm:$0xff]  ;;  %v1847_v29 = vpack.c.bf16 %v226_v21, %v225_v20  ;;  %v1849_v33 = vpack.c.bf16 %v244_v26, %v243_v25 }
  0x77   :  { %1872 = vmatpush3.bf16.msra.mxu1 %v1871_v3  ;;  %v276_v28 = vld [vmem:[%s3072_s1 + $0x7f8] sm:$0xff]  ;;  %v19_v30 = vld [vmem:[%s3071_s0 + $0x20] sm:$0xff]  ;;  %v1879_v31 = vpack.c.bf16 %v258_v24, %v257_v22  ;;  %v227_v43 = vld [vmem:[%s3072_s1 + $0x670] sm:$0xff] }
  0x78   :  { %1874 = vmatprep.subr.bf16.mxu1 %v1873_v8  ;;  %v228_v34 = vld [vmem:[%s3072_s1 + $0x678] sm:$0xff]  ;;  %v259_v35 = vld [vmem:[%s3072_s1 + $0x770] sm:$0xff]  ;;  %v1881_v36 = vpack.c.bf16 %v276_v28, %v275_v27  ;;  %v293_v37 = vld [vmem:[%s3072_s1 + $0x880] sm:$0xff]  ;;  %v426_v42 = vcombine.high %v19_v30, %v19_v30  ;;  %v2866_v54 = vrot.slane %v19_v30, %v2158_v10 }
  0x79   :  { %1844 = vmatpush3.bf16.msra.mxu0 %v1843_v17  ;;  %v260_v52 = vld [vmem:[%s3072_s1 + $0x778] sm:$0xff]  ;;  %v294_v38 = vld [vmem:[%s3072_s1 + $0x888] sm:$0xff]  ;;  %v325_v39 = vld [vmem:[%s3072_s1 + $0x980] sm:$0xff]  ;;  %v1851_v44 = vpack.c.bf16 %v228_v34, %v227_v43 }
  0x7a   :  { %1846 = vmatprep.subr.bf16.mxu0 %v1845_v19  ;;  %v326_v40 = vld [vmem:[%s3072_s1 + $0x988] sm:$0xff]  ;;  %v1883_v45 = vpack.c.bf16 %v260_v52, %v259_v35  ;;  %v1885_v46 = vpack.c.bf16 %v294_v38, %v293_v37  ;;  %v277_v47 = vld [vmem:[%s3072_s1 + $0x800] sm:$0xff]  ;;  %v295_v53 = vld [vmem:[%s3072_s1 + $0x890] sm:$0xff]  ;;  %v2875_v57 = vrot.slane %v426_v42, %v2158_v10  ;;  %v441_v2 = vcombine.high %v2866_v54, %v2866_v54 }
  0x7b   :  { %1876 = vmatpush3.bf16.msra.mxu1 %v1875_v18  ;;  %v278_v48 = vld [vmem:[%s3072_s1 + $0x808] sm:$0xff]  ;;  %v309_v49 = vld [vmem:[%s3072_s1 + $0x900] sm:$0xff]  ;;  %v1917_v50 = vpack.c.bf16 %v326_v40, %v325_v39  ;;  %v296_v32 = vld [vmem:[%s3072_s1 + $0x898] sm:$0xff] }
  0x7c   :  { %1878 = vmatprep.subr.bf16.mxu1 %v1877_v23  ;;  %v310_v51 = vld [vmem:[%s3072_s1 + $0x908] sm:$0xff]  ;;  %v327_v55 = vld [vmem:[%s3072_s1 + $0x990] sm:$0xff]  ;;  %v328_v56 = vld [vmem:[%s3072_s1 + $0x998] sm:$0xff]  ;;  %v1887_v41 = vpack.c.bf16 %v278_v48, %v277_v47  ;;  %v1889_v59 = vpack.c.bf16 %v296_v32, %v295_v53  ;;  %v442_v5 = vcombine.high %v2875_v57, %v2875_v57 }
  0x7d   :  { %1848 = vmatpush3.bf16.msra.mxu0 %v1847_v29  ;;  %v1919_v58 = vpack.c.bf16 %v310_v51, %v309_v49  ;;  %v279_v60 = vld [vmem:[%s3072_s1 + $0x810] sm:$0xff]  ;;  %v280_v61 = vld [vmem:[%s3072_s1 + $0x818] sm:$0xff]  ;;  %v1921_v10 = vpack.c.bf16 %v328_v56, %v327_v55  ;;  %v297_v0 = vld [vmem:[%s3072_s1 + $0x8a0] sm:$0xff] }
  0x7e   :  { %1850 = vmatprep.subr.bf16.mxu0 %v1849_v33  ;;  %v311_v62 = vld [vmem:[%s3072_s1 + $0x910] sm:$0xff]  ;;  %v312_v63 = vld [vmem:[%s3072_s1 + $0x918] sm:$0xff]  ;;  %v298_v1 = vld [vmem:[%s3072_s1 + $0x8a8] sm:$0xff]  ;;  %v1891_v6 = vpack.c.bf16 %v280_v61, %v279_v60 }
  0x7f   :  { %1880 = vmatpush3.bf16.msra.mxu1 %v1879_v31  ;;  %v329_v3 = vld [vmem:[%s3072_s1 + $0x9a0] sm:$0xff]  ;;  %v330_v4 = vld [vmem:[%s3072_s1 + $0x9a8] sm:$0xff]  ;;  %v1923_v7 = vpack.c.bf16 %v312_v63, %v311_v62  ;;  %v1893_v8 = vpack.c.bf16 %v298_v1, %v297_v0  ;;  %v299_v14 = vld [vmem:[%s3072_s1 + $0x8b0] sm:$0xff] }
  0x80   :  { %1882 = vmatprep.subr.bf16.mxu1 %v1881_v36  ;;  %v282_v9 = vld [vmem:[%s3072_s1 + $0x828] sm:$0xff]  ;;  %v313_v11 = vld [vmem:[%s3072_s1 + $0x920] sm:$0xff]  ;;  %v1925_v13 = vpack.c.bf16 %v330_v4, %v329_v3  ;;  %v300_v16 = vld [vmem:[%s3072_s1 + $0x8b8] sm:$0xff] }
  0x81   :  { %1852 = vmatpush3.bf16.msra.mxu0 %v1851_v44  ;;  %v331_v17 = vld [vmem:[%s3072_s1 + $0x9b0] sm:$0xff]  ;;  %v332_v18 = vld [vmem:[%s3072_s1 + $0x9b8] sm:$0xff]  ;;  %v1897_v21 = vpack.c.bf16 %v300_v16, %v299_v14  ;;  %v301_v27 = vld [vmem:[%s3072_s1 + $0x8c0] sm:$0xff] }
  0x82   :  { %1886 = vmatprep.subr.bf16.mxu0 %v1885_v46  ;;  %v283_v22 = vld [vmem:[%s3072_s1 + $0x830] sm:$0xff]  ;;  %v284_v23 = vld [vmem:[%s3072_s1 + $0x838] sm:$0xff]  ;;  %v1929_v25 = vpack.c.bf16 %v332_v18, %v331_v17  ;;  %v302_v28 = vld [vmem:[%s3072_s1 + $0x8c8] sm:$0xff]  ;;  %v1990_v18 = vmov 0.0|0.0  }
  0x83   :  { %1884 = vmatpush3.bf16.msra.mxu1 %v1883_v45  ;;  %v315_v24 = vld [vmem:[%s3072_s1 + $0x930] sm:$0xff]  ;;  %v316_v26 = vld [vmem:[%s3072_s1 + $0x938] sm:$0xff]  ;;  %v333_v29 = vld [vmem:[%s3072_s1 + $0x9c0] sm:$0xff]  ;;  %v1899_v31 = vpack.c.bf16 %v284_v23, %v283_v22  ;;  %v1901_v43 = vpack.c.bf16 %v302_v28, %v301_v27  ;;  %v1992_v22 = vmov 0.0  }
  0x84   :  { %1918 = vmatprep.subr.bf16.mxu1 %v1917_v50  ;;  %958 = vmatmul.mubr.f32.vlgmr.msra.gmra.mrb[6].mxu0 %v2659_v12  ;;  %v281_v12 = vld [vmem:[%s3072_s1 + $0x820] sm:$0xff]  ;;  %v334_v30 = vld [vmem:[%s3072_s1 + $0x9c8] sm:$0xff]  ;;  %v1931_v33 = vpack.c.bf16 %v316_v26, %v315_v24  ;;  %v303_v38 = vld [vmem:[%s3072_s1 + $0x8d0] sm:$0xff] }
  0x85   :  { %1888 = vmatpush3.bf16.msra.mxu0 %v1887_v41  ;;  %1097 = vmatprep.mubr.f32.mxu0 %v441_v2  ;;  %v1895_v19 = vpack.c.bf16 %v282_v9, %v281_v12  ;;  %v285_v34 = vld [vmem:[%s3072_s1 + $0x840] sm:$0xff]  ;;  %v286_v35 = vld [vmem:[%s3072_s1 + $0x848] sm:$0xff]  ;;  %v1933_v52 = vpack.c.bf16 %v334_v30, %v333_v29  ;;  %v304_v39 = vld [vmem:[%s3072_s1 + $0x8d8] sm:$0xff] }
  0x86   :  { %1028 = vmatmul.mubr.f32.vlgmr.msra.gmra.mrb[6].mxu1 %v2668_v15  ;;  %1890 = vmatprep.subr.bf16.mxu0 %v1889_v59  ;;  %v314_v15 = vld [vmem:[%s3072_s1 + $0x928] sm:$0xff]  ;;  %v317_v36 = vld [vmem:[%s3072_s1 + $0x940] sm:$0xff]  ;;  %v335_v40 = vld [vmem:[%s3072_s1 + $0x9d0] sm:$0xff]  ;;  %v1903_v44 = vpack.c.bf16 %v286_v35, %v285_v34  ;;  %v1905_v46 = vpack.c.bf16 %v304_v39, %v303_v38 }
  0x87   :  { %1920 = vmatpush3.bf16.msra.mxu1 %v1919_v58  ;;  %1167 = vmatprep.mubr.f32.mxu1 %v442_v5  ;;  %v1927_v20 = vpack.c.bf16 %v314_v15, %v313_v11  ;;  %v318_v37 = vld [vmem:[%s3072_s1 + $0x948] sm:$0xff]  ;;  %v336_v42 = vld [vmem:[%s3072_s1 + $0x9d8] sm:$0xff]  ;;  %v287_v47 = vld [vmem:[%s3072_s1 + $0x850] sm:$0xff] }
  0x88   :  { %1922 = vmatprep.subr.bf16.mxu1 %v1921_v10  ;;  %v1935_v45 = vpack.c.bf16 %v318_v37, %v317_v36  ;;  %v288_v48 = vld [vmem:[%s3072_s1 + $0x858] sm:$0xff]  ;;  %v319_v49 = vld [vmem:[%s3072_s1 + $0x950] sm:$0xff]  ;;  %v1937_v50 = vpack.c.bf16 %v336_v42, %v335_v40  ;;  %v305_v53 = vld [vmem:[%s3072_s1 + $0x8e0] sm:$0xff] }
  0x89   :  { %1892 = vmatpush3.bf16.msra.mxu0 %v1891_v6  ;;  %v320_v51 = vld [vmem:[%s3072_s1 + $0x958] sm:$0xff]  ;;  %v306_v32 = vld [vmem:[%s3072_s1 + $0x8e8] sm:$0xff]  ;;  %v337_v55 = vld [vmem:[%s3072_s1 + $0x9e0] sm:$0xff]  ;;  %v1907_v41 = vpack.c.bf16 %v288_v48, %v287_v47 }
  0x8a   :  { %1894 = vmatprep.subr.bf16.mxu0 %v1893_v8  ;;  %v338_v56 = vld [vmem:[%s3072_s1 + $0x9e8] sm:$0xff]  ;;  %v1939_v58 = vpack.c.bf16 %v320_v51, %v319_v49  ;;  %v1909_v59 = vpack.c.bf16 %v306_v32, %v305_v53  ;;  %v289_v60 = vld [vmem:[%s3072_s1 + $0x860] sm:$0xff]  ;;  %v307_v0 = vld [vmem:[%s3072_s1 + $0x8f0] sm:$0xff] }
  0x8b   :  { %1924 = vmatpush3.bf16.msra.mxu1 %v1923_v7  ;;  %v290_v61 = vld [vmem:[%s3072_s1 + $0x868] sm:$0xff]  ;;  %v321_v62 = vld [vmem:[%s3072_s1 + $0x960] sm:$0xff]  ;;  %v1941_v10 = vpack.c.bf16 %v338_v56, %v337_v55  ;;  %v308_v1 = vld [vmem:[%s3072_s1 + $0x8f8] sm:$0xff] }
  0x8c   :  { %1926 = vmatprep.subr.bf16.mxu1 %v1925_v13  ;;  %v322_v63 = vld [vmem:[%s3072_s1 + $0x968] sm:$0xff]  ;;  %v339_v2 = vld [vmem:[%s3072_s1 + $0x9f0] sm:$0xff]  ;;  %v340_v3 = vld [vmem:[%s3072_s1 + $0x9f8] sm:$0xff]  ;;  %v1911_v4 = vpack.c.bf16 %v290_v61, %v289_v60  ;;  %v1913_v6 = vpack.c.bf16 %v308_v1, %v307_v0 }
  0x8d   :  { %1896 = vmatpush3.bf16.msra.mxu0 %v1895_v19  ;;  %v1943_v5 = vpack.c.bf16 %v322_v63, %v321_v62  ;;  %v291_v7 = vld [vmem:[%s3072_s1 + $0x870] sm:$0xff]  ;;  %v292_v8 = vld [vmem:[%s3072_s1 + $0x878] sm:$0xff]  ;;  %v1945_v12 = vpack.c.bf16 %v340_v3, %v339_v2  ;;  %v341_v14 = vld [vmem:[%s3072_s1 + $0xa00] sm:$0xff] }
  0x8e   :  { %1898 = vmatprep.subr.bf16.mxu0 %v1897_v21  ;;  %v323_v9 = vld [vmem:[%s3072_s1 + $0x970] sm:$0xff]  ;;  %v324_v11 = vld [vmem:[%s3072_s1 + $0x978] sm:$0xff]  ;;  %v1915_v13 = vpack.c.bf16 %v292_v8, %v291_v7  ;;  %v342_v16 = vld [vmem:[%s3072_s1 + $0xa08] sm:$0xff] }
  0x8f   :  { %1928 = vmatpush3.bf16.msra.mxu1 %v1927_v20  ;;  %v1947_v15 = vpack.c.bf16 %v324_v11, %v323_v9  ;;  %v1950_v17 = vpack.c.bf16 %v342_v16, %v341_v14  ;;  %v343_v19 = vld [vmem:[%s3072_s1 + $0xa10] sm:$0xff]  ;;  %v344_v20 = vld [vmem:[%s3072_s1 + $0xa18] sm:$0xff]  ;;  %v1261_v23 = vld.sshfl [vmem:[%s3071_s0 + $0x28] sm:$0x3 pattern:$0x76325410] }
  0x90   :  { %1930 = vmatprep.subr.bf16.mxu1 %v1929_v25  ;;  %v1953_v21 = vpack.c.bf16 %v344_v20, %v343_v19  ;;  %s1993_s0 = smov [#allocation2]  }
  0x91   :  { %1900 = vmatpush3.bf16.msra.mxu0 %v1899_v31 }
  0x92   :  { %1902 = vmatprep.subr.bf16.mxu0 %v1901_v43 }
  0x93   :  { %1932 = vmatpush3.bf16.msra.mxu1 %v1931_v33 }
  0x94   :  { %1934 = vmatprep.subr.bf16.mxu1 %v1933_v52 }
  0x95   :  { %1904 = vmatpush3.bf16.msra.mxu0 %v1903_v44 }
  0x96   :  { %1906 = vmatprep.subr.bf16.mxu0 %v1905_v46 }
  0x97   :  { %1936 = vmatpush3.bf16.msra.mxu1 %v1935_v45 }
  0x98   :  { %1938 = vmatprep.subr.bf16.mxu1 %v1937_v50 }
  0x99   :  { %1908 = vmatpush3.bf16.msra.mxu0 %v1907_v41 }
  0x9a   :  { %1910 = vmatprep.subr.bf16.mxu0 %v1909_v59 }
  0x9b   :  { %1940 = vmatpush3.bf16.msra.mxu1 %v1939_v58 }
  0x9c   :  { %1942 = vmatprep.subr.bf16.mxu1 %v1941_v10 }
  0x9d   :  { %1912 = vmatpush3.bf16.msra.mxu0 %v1911_v4 }
  0x9e   :  { %1914 = vmatprep.subr.bf16.mxu0 %v1913_v6 }
  0x9f   :  { %1944 = vmatpush3.bf16.msra.mxu1 %v1943_v5 }
  0xa0   :  { %1946 = vmatprep.subr.bf16.mxu1 %v1945_v12 }
  0xa1   :  { %1916 = vmatpush3.bf16.msra.mxu0 %v1915_v13 }
  0xa2   :  { %1949 = vmatprep.subr.bf16.mxu0 %v1990_v18 }
  0xa3   :  { %1948 = vmatpush3.bf16.msra.mxu1 %v1947_v15 }
  0xa4   :  { %1098 = vmatmul.mubr.f32.vlgmr.msra.gmra.mrb[8].mxu0 %v2866_v54  ;;  %v1260_v54 = vld [vmem:[%s3073_s2] ss:$0 sm:$0xff]  ;;  %s1252_s2 = sshll.u32 %s1993_s0, 4  ;;  %s1253_s2 = int_to_ptr.vmem [resolvable:$true] %s1252_s2 }
  0xa5   :  { %1951 = vmatpush3.bf16.msra.mxu0 %v1950_v17  ;;  %1626 = vmatprep.mubr.msk.f32.mxu0 %vm1991_vm0, %v1992_v22  ;;  %s1965_s25 = scalar_lea.vmem %s1253_s2, 32  ;;  %p1970_p1 = scmp.lt.s32.totalorder %s1253_s2, %s1253_s2 }
  0xa6   :  { %1168 = vmatmul.mubr.f32.vlgmr.msra.gmra.mrb[8].mxu1 %v2875_v57  ;;  %1952 = vmatprep.subr.bf16.mxu0 %v1990_v18  ;;  %p1966_p0 = scmp.ne.s32.totalorder %s1253_s2, %s1965_s25  ;;  %p1971_p2 = scmp.lt.s32.totalorder %s1965_s25, %s1965_s25 }
  0xa8   :  { %p1972_p3 = por %p1971_p2, %p1970_p1 }
  0xa9   :  { %1954 = vmatpush3.bf16.msra.mxu0 %v1953_v21 }
  0xaa   :  { %p1973_p4 = pnand %p1972_p3, %p1966_p0 }
  0xac   :  { %1627 = vmatmul.mubr.msk.f32.vlgmr.msra.gmra.mrb[10].mxu0 %vm470_vm1, %v1261_v23 }
  0xf7   :  { %v1295_v24 = vpop.f32.mrb[0].mxu0 }
  0xf8   :  { %v1296_v25 = vpop.f32.mrb[1].mxu0 }
  0xf9   :  { %v1330_v26 = vpop.f32.mrb[0].mxu1  ;;  %v1297_v57 = vadd.f32 %v1296_v25, %v1295_v24 }
  0xfa   :  { %v1331_v27 = vpop.f32.mrb[1].mxu1 }
  0xfb   :  { %v1332_v28 = vadd.f32 %v1331_v27, %v1330_v26  ;;  %v540_v29 = vadd.f32 %v1297_v57, %v1260_v54 }
  0xfd   :  { %v610_v30 = vadd.f32 %v1332_v28, %v540_v29 }
 0x117   :  { %v1365_v31 = vpop.f32.mrb[2].mxu0 }
 0x118   :  { %v1366_v33 = vpop.f32.mrb[3].mxu0 }
 0x119   :  { %v1400_v43 = vpop.f32.mrb[2].mxu1  ;;  %v1367_v34 = vadd.f32 %v1366_v33, %v1365_v31 }
 0x11a   :  { %v1401_v35 = vpop.f32.mrb[3].mxu1 }
 0x11b   :  { %v1402_v36 = vadd.f32 %v1401_v35, %v1400_v43  ;;  %v680_v52 = vadd.f32 %v1367_v34, %v610_v30 }
 0x11d   :  { %v750_v37 = vadd.f32 %v1402_v36, %v680_v52 }
 0x137   :  { %v1435_v38 = vpop.f32.mrb[4].mxu0 }
 0x138   :  { %v1436_v39 = vpop.f32.mrb[5].mxu0 }
 0x139   :  { %v1470_v40 = vpop.f32.mrb[4].mxu1  ;;  %v1437_v42 = vadd.f32 %v1436_v39, %v1435_v38 }
 0x13a   :  { %v1471_v44 = vpop.f32.mrb[5].mxu1 }
 0x13b   :  { %v1472_v45 = vadd.f32 %v1471_v44, %v1470_v40  ;;  %v820_v46 = vadd.f32 %v1437_v42, %v750_v37 }
 0x13d   :  { %v890_v47 = vadd.f32 %v1472_v45, %v820_v46 }
 0x157   :  { %v1505_v48 = vpop.f32.mrb[6].mxu0 }
 0x158   :  { %v1506_v49 = vpop.f32.mrb[7].mxu0 }
 0x159   :  { %v1540_v50 = vpop.f32.mrb[6].mxu1  ;;  %v1507_v51 = vadd.f32 %v1506_v49, %v1505_v48 }
 0x15a   :  { %v1541_v53 = vpop.f32.mrb[7].mxu1 }
 0x15b   :  { %v1542_v32 = vadd.f32 %v1541_v53, %v1540_v50  ;;  %v960_v55 = vadd.f32 %v1507_v51, %v890_v47 }
 0x15d   :  { %v1030_v56 = vadd.f32 %v1542_v32, %v960_v55 }
 0x177   :  { %v1575_v41 = vpop.f32.mrb[8].mxu0 }
 0x178   :  { %v1576_v58 = vpop.f32.mrb[9].mxu0 }
 0x179   :  { %v1610_v59 = vpop.f32.mrb[8].mxu1  ;;  %v1577_v60 = vadd.f32 %v1576_v58, %v1575_v41 }
 0x17a   :  { %v1611_v61 = vpop.f32.mrb[9].mxu1 }
 0x17b   :  { %v1612_v62 = vadd.f32 %v1611_v61, %v1610_v59  ;;  %v1100_v10 = vadd.f32 %v1577_v60, %v1030_v56 }
 0x17d   :  { %v1170_v63 = vadd.f32 %v1612_v62, %v1100_v10 }
 0x17f   :  { %v1239_v0 = vpop.f32.mrb[10].mxu0 }
 0x180   :  { %v1240_v1 = vadd.f32 %v1239_v0, %v1170_v63  ;;  %v1628_v2 = vpop.f32.mrb[11].mxu0 }
 0x182   :  { %v1243_v3 = vmax.f32 %v1240_v1, 0.0 }
 0x184   :  { %1245 = vst.msk [vmem:[#allocation2] sm:$0x3] %vm1244_vm2, %v1243_v3 }
 0x185   :  { %1976 = shalt.err (!%p1973_p4)
}
 0x186   :  { %s1977_s28 = scalar_lea.hbm %s3074_s3, 32 }
 0x187   :  { %p1978_p5 = scmp.ne.s32.totalorder %s3074_s3, %s1977_s28  ;;  %p1981_p6 = scmp.lt.u32.totalorder %s1977_s28, %s3074_s3 }
 0x189   :  { %p1983_p7 = pnand %p1981_p6, %p1978_p5 }
 0x18b   :  { %1986 = shalt.err (!%p1983_p7)
}
 0x18c   :  { %1255 = dma.vmem_to_hbm [thread:$0]  %s1253_s2, 32, %s3074_s3, [#allocation3]  }
 0x18d   :  { %1987 = dma.done.wait [#allocation3], 32  }
 0x18e   :  { %1988 = vsyncadd [#allocation3], 4294967264 }
 0x18f   :  { %1259 = vsyncpa [#allocation3], 1 }

</bundles_post_ra>
